<compile_context>
chip_gen: v5e
topology: v5e:2x2
jax: 0.10.0
libtpu: 0.0.40
codegen_flags: <defaults>
</compile_context>

<pallas_src>
import functools

import jax
import jax.numpy as jnp
from jax.experimental import pallas as pl
from jax.experimental.pallas import tpu as pltpu


# --------------------------- generation-aware budgets ---------------------------

def _vmem_capacity_bytes():
    try:
        info = pltpu.get_tpu_info()
        cap = getattr(info, "vmem_capacity_bytes", None)
        if cap:
            return int(cap)
    except Exception:
        pass
    return 64 * 1024 * 1024  # conservative fallback (v7x-sized)


_VMEM_PHYS = _vmem_capacity_bytes()
_BIG_VMEM = _VMEM_PHYS >= 96 * 1024 * 1024          # v5e / v6e (128 MiB physical)
_VMEM_LIMIT = (64 if _BIG_VMEM else 32) * 1024 * 1024
_TILE_BUDGET = int(_VMEM_LIMIT * 0.6)                # leave headroom for Mosaic


def _pick_tile(dim, candidates):
    """Largest candidate tile that evenly divides `dim`; else the full dim."""
    for c in candidates:
        if dim % c == 0:
            return c
    return dim


def _dense_tiles(M, N, K, fuse_ln, has_residual):
    mmax = 1024 if _BIG_VMEM else 512
    tm = _pick_tile(M, tuple(t for t in (1024, 512, 256, 128, 64, 32, 16, 8)
                             if t <= mmax))
    if fuse_ln:
        tn = N                                       # full row needed for mean/var
    else:
        tn = _pick_tile(N, tuple(t for t in (1024, 768, 512, 384, 256, 128)
                                 if t <= mmax))
    tk = _pick_tile(K, tuple(t for t in (1024, 768, 512, 384, 256, 128)
                             if t <= (1024 if _BIG_VMEM else 768)))

    def fits(tm_, tn_, tk_):
        b = (2 * tm_ * tk_ * 2          # x  (bf16, double buffered)
             + 2 * tk_ * tn_ * 2        # w  (bf16, double buffered)
             + 2 * tm_ * tn_ * 2        # out (bf16, double buffered)
             + tm_ * tn_ * 4            # f32 accumulator scratch
             + 2 * tn_ * 4 * (3 if fuse_ln else 1))   # bias (+ gamma/beta)
        if has_residual:
            b += 2 * tm_ * tn_ * 2      # residual (bf16, double buffered)
        return b <= _TILE_BUDGET

    while not fits(tm, tn, tk):
        if tk > 128 and K % (tk // 2) == 0:
            tk //= 2
        elif (not fuse_ln) and tn > 128 and N % (tn // 2) == 0:
            tn //= 2
        elif tm > 8 and M % (tm // 2) == 0:
            tm //= 2
        else:
            break
    return tm, tn, tk


# ----------------------------- Pallas kernels -----------------------------

def _dense_kernel(*refs, activation, has_residual, has_ln, eps):
    x_ref, w_ref, b_ref = refs[0], refs[1], refs[2]
    idx = 3
    r_ref = g_ref = be_ref = None
    if has_residual:
        r_ref = refs[idx]; idx += 1
    if has_ln:
        g_ref, be_ref = refs[idx], refs[idx + 1]; idx += 2
    o_ref, acc_ref = refs[idx], refs[idx + 1]

    @pl.when(pl.program_id(2) == 0)
    def _():
        acc_ref[...] = jnp.zeros_like(acc_ref)

    acc_ref[...] += jnp.dot(x_ref[...], w_ref[...],
                            preferred_element_type=jnp.float32)

    @pl.when(pl.program_id(2) == pl.num_programs(2) - 1)
    def _():
        y = acc_ref[...] + b_ref[...]
        if activation == "gelu":
            # exact (erf) GELU, matching torch.nn.GELU / HF BERT "gelu"
            y = 0.5 * y * (1.0 + jax.lax.erf(y * (2.0 ** -0.5)))
        if r_ref is not None:
            y = y + r_ref[...].astype(jnp.float32)
        if g_ref is not None:                       # fused LayerNorm epilogue
            mu = jnp.mean(y, axis=-1, keepdims=True)
            var = jnp.mean(jnp.square(y - mu), axis=-1, keepdims=True)
            y = (y - mu) * jax.lax.rsqrt(var + eps) * g_ref[...] + be_ref[...]
        o_ref[...] = y.astype(o_ref.dtype)


def dense(x, w, b, activation=None, residual=None, ln=None):
    """y = act(x @ w + b) (+ residual) (-> fused LayerNorm).  bf16 MXU matmul with
    f32 VMEM accumulator; epilogue math in f32; output stored as bf16."""
    M, K = x.shape
    N = w.shape[1]
    has_residual = residual is not None
    fuse_ln = ln is not None
    tm, tn, tk = _dense_tiles(M, N, K, fuse_ln, has_residual)

    args = [x.astype(jnp.bfloat16), w.astype(jnp.bfloat16),
            b.reshape(1, N).astype(jnp.float32)]
    in_specs = [
        pl.BlockSpec((tm, tk), lambda i, j, k: (i, k)),
        pl.BlockSpec((tk, tn), lambda i, j, k: (k, j)),
        pl.BlockSpec((1, tn), lambda i, j, k: (0, j)),
    ]
    if has_residual:
        args.append(residual.astype(jnp.bfloat16))
        in_specs.append(pl.BlockSpec((tm, tn), lambda i, j, k: (i, j)))
    eps = 0.0
    if fuse_ln:
        g, be, eps = ln
        args.append(g.reshape(1, N).astype(jnp.float32))
        args.append(be.reshape(1, N).astype(jnp.float32))
        in_specs.append(pl.BlockSpec((1, tn), lambda i, j, k: (0, j)))
        in_specs.append(pl.BlockSpec((1, tn), lambda i, j, k: (0, j)))

    return pl.pallas_call(
        functools.partial(_dense_kernel, activation=activation,
                          has_residual=has_residual, has_ln=fuse_ln, eps=eps),
        out_shape=jax.ShapeDtypeStruct((M, N), jnp.bfloat16),
        grid=(M // tm, N // tn, K // tk),
        in_specs=in_specs,
        out_specs=pl.BlockSpec((tm, tn), lambda i, j, k: (i, j)),
        scratch_shapes=[pltpu.VMEM((tm, tn), jnp.float32)],
        compiler_params=pltpu.CompilerParams(
            dimension_semantics=("parallel", "parallel", "arbitrary"),
            vmem_limit_bytes=_VMEM_LIMIT),
    )(*args)


def _layernorm_kernel(x_ref, g_ref, b_ref, o_ref, *, eps):
    x = x_ref[...].astype(jnp.float32)
    mu = jnp.mean(x, axis=-1, keepdims=True)
    var = jnp.mean(jnp.square(x - mu), axis=-1, keepdims=True)
    o_ref[...] = ((x - mu) * jax.lax.rsqrt(var + eps) * g_ref[...]
                  + b_ref[...]).astype(o_ref.dtype)


def layernorm(x, g, b, eps=1e-12):
    M, D = x.shape
    tm = _pick_tile(M, (1024, 512, 256, 128, 64, 32, 16, 8))
    return pl.pallas_call(
        functools.partial(_layernorm_kernel, eps=eps),
        out_shape=jax.ShapeDtypeStruct((M, D), jnp.bfloat16),
        grid=(M // tm,),
        in_specs=[pl.BlockSpec((tm, D), lambda i: (i, 0)),
                  pl.BlockSpec((1, D), lambda i: (0, 0)),
                  pl.BlockSpec((1, D), lambda i: (0, 0))],
        out_specs=pl.BlockSpec((tm, D), lambda i: (i, 0)),
        compiler_params=pltpu.CompilerParams(
            dimension_semantics=("parallel",),
            vmem_limit_bytes=_VMEM_LIMIT),
    )(x, g.reshape(1, D).astype(jnp.float32), b.reshape(1, D).astype(jnp.float32))


def _attention_kernel(*refs, heads, dh, scale, has_mask):
    if has_mask:
        q_ref, k_ref, v_ref, m_ref, o_ref = refs
    else:
        q_ref, k_ref, v_ref, o_ref = refs
        m_ref = None
    q = q_ref[0]                      # [Sq, Dg] bf16
    k = k_ref[0]                      # [Sk, Dg] bf16
    v = v_ref[0]                      # [Sk, Dg] bf16
    Sq, Sk = q.shape[0], k.shape[0]

    m = None
    if m_ref is not None:
        # hoisted out of the head loop; broadcast materialized exactly once
        m = jnp.broadcast_to(m_ref[0], (Sq, Sk))

    for h in range(heads):            # heads inside one lane-aligned 128-wide block
        lo = h * dh
        qh = q[:, lo:lo + dh]
        kh = k[:, lo:lo + dh]
        vh = v[:, lo:lo + dh]
        # q @ k^T via dot_general contracting last dims (no explicit transpose)
        s = jax.lax.dot_general(qh, kh, (((1,), (1,)), ((), ())),
                                preferred_element_type=jnp.float32) * scale
        if m is not None:
            s = s + m
        s = s - jnp.max(s, axis=-1, keepdims=True)
        p = jnp.exp(s)
        # approx reciprocal rides the EUP slot; tiny deviation from exact softmax
        p = p * pl.reciprocal(jnp.sum(p, axis=-1, keepdims=True), approx=True)
        o = jax.lax.dot_general(p.astype(vh.dtype), vh, (((1,), (0,)), ((), ())),
                                preferred_element_type=jnp.float32)
        o_ref[0, :, lo:lo + dh] = o.astype(o_ref.dtype)   # direct slice store


def attention_core(q_src, k_src, v_src, D, num_heads, key_mask,
                   q_col0=0, k_col0=0, v_col0=0):
    """Multi-head attention.

    Q lives in q_src[..., q_col0:q_col0+D]; K/V live in k_src / v_src at their
    column offsets (sources may be the same fused QKV / KV projection output,
    avoiding any JAX-side slicing of the fused activation)."""
    B, Sq = q_src.shape[0], q_src.shape[1]
    Sk = k_src.shape[1]
    Dh = D // num_heads
    scale = Dh ** -0.5

    if D % 128 == 0 and (Dh % 128 == 0 or 128 % Dh == 0):
        Dg = Dh if Dh % 128 == 0 else 128            # lane-aligned head groups
    else:
        # lane-misaligned head width: fall back to whole-D blocks (tiny models)
        q_src = jax.lax.slice_in_dim(q_src, q_col0, q_col0 + D, axis=2)
        k_new = jax.lax.slice_in_dim(k_src, k_col0, k_col0 + D, axis=2)
        v_src = jax.lax.slice_in_dim(v_src, v_col0, v_col0 + D, axis=2)
        k_src = k_new
        q_col0 = k_col0 = v_col0 = 0
        Dg = D

    G = D // Dg
    qb, kb, vb = q_col0 // Dg, k_col0 // Dg, v_col0 // Dg
    heads = Dg // Dh

    args = [q_src.astype(jnp.bfloat16), k_src.astype(jnp.bfloat16),
            v_src.astype(jnp.bfloat16)]
    in_specs = [
        pl.BlockSpec((1, Sq, Dg), lambda b, g, base=qb: (b, 0, base + g)),
        pl.BlockSpec((1, Sk, Dg), lambda b, g, base=kb: (b, 0, base + g)),
        pl.BlockSpec((1, Sk, Dg), lambda b, g, base=vb: (b, 0, base + g)),
    ]
    has_mask = key_mask is not None
    if has_mask:
        m = (1.0 - key_mask.astype(jnp.float32)) * -10000.0    # additive key mask
        args.append(m.reshape(B, 1, Sk))
        in_specs.append(pl.BlockSpec((1, 1, Sk), lambda b, g: (b, 0, 0)))

    return pl.pallas_call(
        functools.partial(_attention_kernel, heads=heads, dh=Dh, scale=scale,
                          has_mask=has_mask),
        out_shape=jax.ShapeDtypeStruct((B, Sq, D), jnp.bfloat16),
        grid=(B, G),
        in_specs=in_specs,
        out_specs=pl.BlockSpec((1, Sq, Dg), lambda b, g: (b, 0, g)),
        compiler_params=pltpu.CompilerParams(
            dimension_semantics=("parallel", "parallel"),
            vmem_limit_bytes=_VMEM_LIMIT),
    )(*args)


# --------------------------- model building blocks ---------------------------

def vit_block(x, p, num_heads, key_mask=None):
    B, S, D = x.shape
    h = layernorm(x.reshape(B * S, D), p["ln1_g"], p["ln1_b"], eps=1e-6)
    qkv = dense(h, p["attn"]["wqkv"], p["attn"]["bqkv"]).reshape(B, S, 3 * D)
    a = attention_core(qkv, qkv, qkv, D, num_heads, key_mask,
                       q_col0=0, k_col0=D, v_col0=2 * D)
    # output projection with fused residual add
    x = dense(a.reshape(B * S, D), p["proj_w"], p["proj_b"],
              residual=x.reshape(B * S, D)).reshape(B, S, D)
    h = layernorm(x.reshape(B * S, D), p["ln2_g"], p["ln2_b"], eps=1e-6)
    h = dense(h, p["fc1_w"], p["fc1_b"], activation="gelu")
    x = dense(h, p["fc2_w"], p["fc2_b"],
              residual=x.reshape(B * S, D)).reshape(B, S, D)
    return x


def vit_forward(image, p, vcfg):
    B, C, H, W = image.shape
    ps = vcfg["patch_size"]
    D = vcfg["embed_dim"]
    nh, nw = H // ps, W // ps
    # Conv2d(stride=patch) == unfold patches + matmul
    patches = image.reshape(B, C, nh, ps, nw, ps).transpose(0, 2, 4, 1, 3, 5)
    patches = patches.reshape(B * nh * nw, C * ps * ps).astype(jnp.bfloat16)
    x = dense(patches, p["patch_w"], p["patch_b"]).reshape(B, nh * nw, D)
    cls = jnp.broadcast_to(p["cls_token"], (B, 1, D))
    x = jnp.concatenate([cls, x.astype(jnp.float32)], axis=1)
    x = (x + p["pos_embed"]).astype(jnp.bfloat16)

    # pad sequence so M = B*S tiles cleanly (8, or 128 for long sequences);
    # padded keys are removed from attention with an additive mask
    S0 = x.shape[1]
    pad_unit = 128 if S0 > 96 else 8
    S = ((S0 + pad_unit - 1) // pad_unit) * pad_unit
    if S != S0:
        x = jnp.pad(x, ((0, 0), (0, S - S0), (0, 0)))
        key_mask = jnp.broadcast_to(
            (jnp.arange(S) < S0).astype(jnp.int32)[None], (B, S))
    else:
        key_mask = None

    for blk in p["blocks"]:
        x = vit_block(x, blk, vcfg["num_heads"], key_mask)
    x = layernorm(x.reshape(B * S, D), p["norm_g"], p["norm_b"],
                  eps=1e-6).reshape(B, S, D)
    return x, S0


def bert_layer(x, p, num_heads, key_mask, enc_hidden=None, enc_key_mask=None):
    B, S, D = x.shape
    qkv = dense(x.reshape(B * S, D), p["self_attn"]["wqkv"],
                p["self_attn"]["bqkv"]).reshape(B, S, 3 * D)
    a = attention_core(qkv, qkv, qkv, D, num_heads, key_mask,
                       q_col0=0, k_col0=D, v_col0=2 * D)
    # self-output projection + residual + LayerNorm fused into one kernel
    x = dense(a.reshape(B * S, D), p["self_out_w"], p["self_out_b"],
              residual=x.reshape(B * S, D),
              ln=(p["self_ln_g"], p["self_ln_b"], 1e-12)).reshape(B, S, D)
    if enc_hidden is not None:
        Sk, Dk = enc_hidden.shape[1], enc_hidden.shape[2]
        q = dense(x.reshape(B * S, D), p["cross_attn"]["wq"],
                  p["cross_attn"]["bq"]).reshape(B, S, D)
        kv = dense(enc_hidden.reshape(B * Sk, Dk), p["cross_attn"]["wkv"],
                   p["cross_attn"]["bkv"]).reshape(B, Sk, 2 * D)
        c = attention_core(q, kv, kv, D, num_heads, enc_key_mask,
                           q_col0=0, k_col0=0, v_col0=D)
        x = dense(c.reshape(B * S, D), p["cross_out_w"], p["cross_out_b"],
                  residual=x.reshape(B * S, D),
                  ln=(p["cross_ln_g"], p["cross_ln_b"], 1e-12)).reshape(B, S, D)
    i = dense(x.reshape(B * S, D), p["inter_w"], p["inter_b"], activation="gelu")
    x = dense(i, p["out_w"], p["out_b"], residual=x.reshape(B * S, D),
              ln=(p["out_ln_g"], p["out_ln_b"], 1e-12)).reshape(B, S, D)
    return x


def bert_forward(input_ids, attention_mask, p, bcfg, enc_hidden=None,
                 enc_attn_mask=None):
    B, S = input_ids.shape
    D = bcfg["hidden"]
    # embedding gather stays in plain JAX (glue)
    # TODO(synk): token_type embeddings omitted (single-segment constant offset).
    x = p["word_emb"][input_ids] + p["pos_emb"][None, :S, :]
    x = layernorm(x.astype(jnp.bfloat16).reshape(B * S, D),
                  p["emb_ln_g"], p["emb_ln_b"]).reshape(B, S, D)
    for layer in p["layers"]:
        x = bert_layer(x, layer, bcfg["num_heads"], attention_mask,
                       enc_hidden, enc_attn_mask)
    return x


# --------------------------- parameter construction ---------------------------

class KeyGen:
    def __init__(self, key):
        self.key = key

    def __call__(self):
        self.key, sub = jax.random.split(self.key)
        return sub


def init_params(key, cfg):
    kg = KeyGen(key)

    def w16(shape):   # matmul weights stored in bf16 (MXU-native)
        return (jax.random.normal(kg(), shape, jnp.float32) * 0.02).astype(jnp.bfloat16)

    def nrm(shape):
        return jax.random.normal(kg(), shape, jnp.float32) * 0.02

    def zeros(n):
        return jnp.zeros((n,), jnp.float32)

    def ones(n):
        return jnp.ones((n,), jnp.float32)

    vcfg, bcfg = cfg["vit"], cfg["bert"]
    D = vcfg["embed_dim"]
    p_ = vcfg["patch_size"]
    C = vcfg["in_chans"]
    npatch = (vcfg["img_size"] // p_) ** 2
    M = D * vcfg["mlp_ratio"]

    visual = {
        "patch_w": w16((C * p_ * p_, D)), "patch_b": zeros(D),
        "cls_token": nrm((1, 1, D)),
        "pos_embed": nrm((1, npatch + 1, D)),
        "norm_g": ones(D), "norm_b": zeros(D),
        "blocks": [],
    }
    for _ in range(vcfg["depth"]):
        visual["blocks"].append({
            "ln1_g": ones(D), "ln1_b": zeros(D),
            "attn": {"wqkv": w16((D, 3 * D)), "bqkv": zeros(3 * D)},   # fused QKV
            "proj_w": w16((D, D)), "proj_b": zeros(D),
            "ln2_g": ones(D), "ln2_b": zeros(D),
            "fc1_w": w16((D, M)), "fc1_b": zeros(M),
            "fc2_w": w16((M, D)), "fc2_b": zeros(D),
        })

    H = bcfg["hidden"]
    I = bcfg["intermediate"]
    Dv = bcfg["encoder_width"]
    text = {
        "word_emb": nrm((bcfg["vocab"], H)),
        "pos_emb": nrm((bcfg["max_pos"], H)),
        "emb_ln_g": ones(H), "emb_ln_b": zeros(H),
        "layers": [],
    }
    for _ in range(bcfg["depth"]):
        text["layers"].append({
            "self_attn": {"wqkv": w16((H, 3 * H)), "bqkv": zeros(3 * H)},
            "self_out_w": w16((H, H)), "self_out_b": zeros(H),
            "self_ln_g": ones(H), "self_ln_b": zeros(H),
            "cross_attn": {"wq": w16((H, H)), "bq": zeros(H),
                           "wkv": w16((Dv, 2 * H)), "bkv": zeros(2 * H)},  # fused KV
            "cross_out_w": w16((H, H)), "cross_out_b": zeros(H),
            "cross_ln_g": ones(H), "cross_ln_b": zeros(H),
            "inter_w": w16((H, I)), "inter_b": zeros(I),
            "out_w": w16((I, H)), "out_b": zeros(H),
            "out_ln_g": ones(H), "out_ln_b": zeros(H),
        })
    return {"visual": visual, "text": text}


# ------------------------------- "tokenizer" -------------------------------
# TODO(synk): HF BertTokenizer (string -> wordpiece ids) has no Pallas/JAX
# equivalent; replaced with a deterministic character-hash tokenizer.

def simple_tokenize(captions, seq_len, vocab, cls_id=1, sep_id=2, pad_id=0):
    ids, mask = [], []
    for c in captions:
        toks = [cls_id] + [4 + (ord(ch) % (vocab - 4)) for ch in c][: seq_len - 2] + [sep_id]
        m = [1] * len(toks)
        while len(toks) < seq_len:
            toks.append(pad_id)
            m.append(0)
        ids.append(toks)
        mask.append(m)
    return jnp.array(ids, jnp.int32), jnp.array(mask, jnp.int32)


# ------------------------------ BLIP_Base forward ------------------------------

def blip_base_forward(params, image, input_ids, attn_mask, mode, cfg):
    assert mode in ("image", "text", "multimodal"), \
        "mode parameter must be image, text, or multimodal"
    if mode == "image":
        x, S0 = vit_forward(image, params["visual"], cfg["vit"])
        return x[:, :S0].astype(jnp.float32)
    elif mode == "text":
        out = bert_forward(input_ids, attn_mask, params["text"], cfg["bert"])
        return out.astype(jnp.float32)
    else:  # multimodal
        img, S0 = vit_forward(image, params["visual"], cfg["vit"])
        Simg = img.shape[1]
        image_atts = jnp.broadcast_to(
            (jnp.arange(Simg) < S0).astype(jnp.int32)[None], (img.shape[0], Simg))
        input_ids = input_ids.at[:, 0].set(cfg["enc_token_id"])
        out = bert_forward(input_ids, attn_mask, params["text"], cfg["bert"],
                           enc_hidden=img, enc_attn_mask=image_atts)
        return out.astype(jnp.float32)


# ----------------------------------- main -----------------------------------

if __name__ == "__main__":
    cfg = {
        "vit": {"img_size": 32, "patch_size": 16, "in_chans": 3,
                "embed_dim": 256, "depth": 2, "num_heads": 4, "mlp_ratio": 4},
        "bert": {"hidden": 128, "depth": 2, "num_heads": 2, "intermediate": 256,
                 "vocab": 64, "max_pos": 32, "encoder_width": 256},
        "seq_len": 16,
        "enc_token_id": 3,
    }
    key = jax.random.PRNGKey(0)
    params = init_params(key, cfg)

    image = jax.random.normal(jax.random.PRNGKey(0), (2, 3, 32, 32), jnp.float32)
    caption = ["a dog riding a skateboard", "a cat"]
    input_ids, attn_mask = simple_tokenize(caption, cfg["seq_len"],
                                           cfg["bert"]["vocab"])

    fwd_image = jax.jit(lambda p, im, ids, m: blip_base_forward(p, im, ids, m, "image", cfg))
    fwd_text = jax.jit(lambda p, im, ids, m: blip_base_forward(p, im, ids, m, "text", cfg))
    fwd_mm = jax.jit(lambda p, im, ids, m: blip_base_forward(p, im, ids, m, "multimodal", cfg))

    out_img = jax.block_until_ready(fwd_image(params, image, input_ids, attn_mask))
    out_txt = jax.block_until_ready(fwd_text(params, image, input_ids, attn_mask))
    out_mm = jax.block_until_ready(fwd_mm(params, image, input_ids, attn_mask))

    assert out_img.shape == (2, 5, 256), out_img.shape
    assert out_txt.shape == (2, 16, 128), out_txt.shape
    assert out_mm.shape == (2, 16, 128), out_mm.shape
    print("KERNEL_OK")
</pallas_src>

<mosaic_0001>
module attributes {stable_mosaic.version = 11 : i64} {
  func.func @_dense_kernel(%arg0: i32, %arg1: i32, %arg2: i32, %arg3: memref<8x768xbf16, #tpu.memory_space<vmem>>, %arg4: memref<768x256xbf16, #tpu.memory_space<vmem>>, %arg5: memref<1x256xf32, #tpu.memory_space<vmem>>, %arg6: memref<8x256xbf16, #tpu.memory_space<vmem>>, %arg7: memref<8x256xf32, #tpu.memory_space<vmem>>) attributes {dimension_semantics = [#tpu.dimension_semantics<parallel>, #tpu.dimension_semantics<parallel>, #tpu.dimension_semantics<arbitrary>], iteration_bounds = array<i64: 1, 1, 1>, scalar_prefetch = 0 : i64, scratch_operands = 1 : i64, tpu.core_type = #tpu.core_type<tc>, window_params = [{transform_indices = @transform_0, window_bounds = array<i64: 8, 768>}, {transform_indices = @transform_1, window_bounds = array<i64: 768, 256>}, {transform_indices = @transform_2, window_bounds = array<i64: 1, 256>}, {transform_indices = @transform_3, window_bounds = array<i64: 8, 256>}]} {
    %c0_i32 = arith.constant 0 : i32
    %0 = arith.cmpi eq, %arg2, %c0_i32 : i32
    %1 = arith.extui %0 : i1 to i32
    %c0_i32_0 = arith.constant 0 : i32
    %2 = arith.cmpi ne, %1, %c0_i32_0 : i32
    scf.if %2 {
      %cst_10 = arith.constant 0.000000e+00 : f32
      %12 = vector.broadcast %cst_10 : f32 to vector<8x256xf32>
      %c0_11 = arith.constant 0 : index
      %c0_12 = arith.constant 0 : index
      %13 = vector.load %arg7[%c0_11, %c0_12] : memref<8x256xf32, #tpu.memory_space<vmem>>, vector<8x256xf32>
      tpu.vector_store %arg7[%c0_11, %c0_12], %12 {strides = array<i32>} : memref<8x256xf32, #tpu.memory_space<vmem>>, vector<8x256xf32>,
    } else {
    }
    %c0 = arith.constant 0 : index
    %c0_1 = arith.constant 0 : index
    %3 = vector.load %arg7[%c0, %c0_1] : memref<8x256xf32, #tpu.memory_space<vmem>>, vector<8x256xf32>
    %c0_2 = arith.constant 0 : index
    %c0_3 = arith.constant 0 : index
    %4 = vector.load %arg3[%c0_2, %c0_3] : memref<8x768xbf16, #tpu.memory_space<vmem>>, vector<8x768xbf16>
    %c0_4 = arith.constant 0 : index
    %c0_5 = arith.constant 0 : index
    %5 = vector.load %arg4[%c0_4, %c0_5] : memref<768x256xbf16, #tpu.memory_space<vmem>>, vector<768x256xbf16>
    %cst = arith.constant dense<0.000000e+00> : vector<8x256xf32>
    %6 = tpu.matmul %4, %5, %cst {dimension_numbers = #tpu.dot_dimension_numbers<[1], [0], [0], [1], [0, 0, 1, 1], [], []>} : vector<8x768xbf16>, vector<768x256xbf16>, vector<8x256xf32> -> vector<8x256xf32>
    %7 = arith.addf %3, %6 : vector<8x256xf32>
    %c0_6 = arith.constant 0 : index
    %c0_7 = arith.constant 0 : index
    %8 = vector.load %arg7[%c0_6, %c0_7] : memref<8x256xf32, #tpu.memory_space<vmem>>, vector<8x256xf32>
    tpu.vector_store %arg7[%c0_6, %c0_7], %7 {strides = array<i32>} : memref<8x256xf32, #tpu.memory_space<vmem>>, vector<8x256xf32>,
    %c0_i32_8 = arith.constant 0 : i32
    %9 = arith.cmpi eq, %arg2, %c0_i32_8 : i32
    %10 = arith.extui %9 : i1 to i32
    %c0_i32_9 = arith.constant 0 : i32
    %11 = arith.cmpi ne, %10, %c0_i32_9 : i32
    scf.if %11 {
      %c0_10 = arith.constant 0 : index
      %c0_11 = arith.constant 0 : index
      %12 = vector.load %arg7[%c0_10, %c0_11] : memref<8x256xf32, #tpu.memory_space<vmem>>, vector<8x256xf32>
      %c0_12 = arith.constant 0 : index
      %c0_13 = arith.constant 0 : index
      %13 = vector.load %arg5[%c0_12, %c0_13] : memref<1x256xf32, #tpu.memory_space<vmem>>, vector<1x256xf32>
      %14 = vector.broadcast %13 : vector<1x256xf32> to vector<8x256xf32>
      %15 = arith.addf %12, %14 : vector<8x256xf32>
      %16 = arith.truncf %15 : vector<8x256xf32> to vector<8x256xbf16>
      %c0_14 = arith.constant 0 : index
      %c0_15 = arith.constant 0 : index
      %17 = vector.load %arg6[%c0_14, %c0_15] : memref<8x256xbf16, #tpu.memory_space<vmem>>, vector<8x256xbf16>
      tpu.vector_store %arg6[%c0_14, %c0_15], %16 {strides = array<i32>} : memref<8x256xbf16, #tpu.memory_space<vmem>>, vector<8x256xbf16>,
    } else {
    }
    return
  }
  func.func @transform_0(%arg0: i32, %arg1: i32, %arg2: i32) -> (i32, i32) {
    %c0_i32 = arith.constant 0 : i32
    return %arg0, %arg2 : i32, i32
  }
  func.func @transform_1(%arg0: i32, %arg1: i32, %arg2: i32) -> (i32, i32) {
    %c0_i32 = arith.constant 0 : i32
    return %arg2, %arg1 : i32, i32
  }
  func.func @transform_2(%arg0: i32, %arg1: i32, %arg2: i32) -> (i32, i32) {
    %c0_i32 = arith.constant 0 : i32
    %c0_i32_0 = arith.constant 0 : i32
    return %c0_i32, %arg1 : i32, i32
  }
  func.func @transform_3(%arg0: i32, %arg1: i32, %arg2: i32) -> (i32, i32) {
    %c0_i32 = arith.constant 0 : i32
    return %arg0, %arg1 : i32, i32
  }
}

module attributes {stable_mosaic.version = 11 : i64} {
  func.func @_attention_kernel(%arg0: i32, %arg1: i32, %arg2: memref<1x8x128xbf16, #tpu.memory_space<vmem>>, %arg3: memref<1x8x128xbf16, #tpu.memory_space<vmem>>, %arg4: memref<1x8x128xbf16, #tpu.memory_space<vmem>>, %arg5: memref<1x1x8xf32, #tpu.memory_space<vmem>>, %arg6: memref<1x8x128xbf16, #tpu.memory_space<vmem>>) attributes {dimension_semantics = [#tpu.dimension_semantics<parallel>, #tpu.dimension_semantics<parallel>], iteration_bounds = array<i64: 2, 2>, scalar_prefetch = 0 : i64, scratch_operands = 0 : i64, tpu.core_type = #tpu.core_type<tc>, window_params = [{transform_indices = @transform_0, window_bounds = array<i64: 1, 8, 128>}, {transform_indices = @transform_1, window_bounds = array<i64: 1, 8, 128>}, {transform_indices = @transform_2, window_bounds = array<i64: 1, 8, 128>}, {transform_indices = @transform_3, window_bounds = array<i64: 1, 1, 8>}, {transform_indices = @transform_4, window_bounds = array<i64: 1, 8, 128>}]} {
    %c0 = arith.constant 0 : index
    %c0_0 = arith.constant 0 : index
    %c0_1 = arith.constant 0 : index
    %0 = vector.load %arg2[%c0, %c0_0, %c0_1] : memref<1x8x128xbf16, #tpu.memory_space<vmem>>, vector<1x8x128xbf16>
    %1 = vector.shape_cast %0 : vector<1x8x128xbf16> to vector<8x128xbf16>
    %c0_2 = arith.constant 0 : index
    %c0_3 = arith.constant 0 : index
    %c0_4 = arith.constant 0 : index
    %2 = vector.load %arg3[%c0_2, %c0_3, %c0_4] : memref<1x8x128xbf16, #tpu.memory_space<vmem>>, vector<1x8x128xbf16>
    %3 = vector.shape_cast %2 : vector<1x8x128xbf16> to vector<8x128xbf16>
    %c0_5 = arith.constant 0 : index
    %c0_6 = arith.constant 0 : index
    %c0_7 = arith.constant 0 : index
    %4 = vector.load %arg4[%c0_5, %c0_6, %c0_7] : memref<1x8x128xbf16, #tpu.memory_space<vmem>>, vector<1x8x128xbf16>
    %5 = vector.shape_cast %4 : vector<1x8x128xbf16> to vector<8x128xbf16>
    %c0_8 = arith.constant 0 : index
    %c0_9 = arith.constant 0 : index
    %c0_10 = arith.constant 0 : index
    %6 = vector.load %arg5[%c0_8, %c0_9, %c0_10] : memref<1x1x8xf32, #tpu.memory_space<vmem>>, vector<1x1x8xf32>
    %7 = vector.shape_cast %6 : vector<1x1x8xf32> to vector<1x8xf32>
    %8 = vector.shape_cast %7 : vector<1x8xf32> to vector<1x8xf32>
    %9 = vector.broadcast %8 : vector<1x8xf32> to vector<8x8xf32>
    %10 = vector.extract_strided_slice %1 {offsets = [0, 0], sizes = [8, 64], strides = [1, 1]} : vector<8x128xbf16> to vector<8x64xbf16>
    %11 = vector.extract_strided_slice %3 {offsets = [0, 0], sizes = [8, 64], strides = [1, 1]} : vector<8x128xbf16> to vector<8x64xbf16>
    %12 = vector.extract_strided_slice %5 {offsets = [0, 0], sizes = [8, 64], strides = [1, 1]} : vector<8x128xbf16> to vector<8x64xbf16>
    %cst = arith.constant dense<0.000000e+00> : vector<8x8xf32>
    %13 = tpu.matmul %10, %11, %cst {dimension_numbers = #tpu.dot_dimension_numbers<[1], [1], [0], [0], [0, 0, 1, 0], [], []>} : vector<8x64xbf16>, vector<8x64xbf16>, vector<8x8xf32> -> vector<8x8xf32>
    %cst_11 = arith.constant 1.250000e-01 : f32
    %14 = vector.broadcast %cst_11 : f32 to vector<8x8xf32>
    %15 = arith.mulf %13, %14 : vector<8x8xf32>
    %16 = arith.addf %15, %9 : vector<8x8xf32>
    %cst_12 = arith.constant dense<0xFF800000> : vector<8xf32>
    %17 = vector.multi_reduction <maximumf>, %16, %cst_12 [1] : vector<8x8xf32> to vector<8xf32>
    %18 = vector.shape_cast %17 : vector<8xf32> to vector<8x1xf32>
    %19 = vector.broadcast %18 : vector<8x1xf32> to vector<8x8xf32>
    %20 = arith.subf %16, %19 : vector<8x8xf32>
    %21 = math.exp %20 : vector<8x8xf32>
    %cst_13 = arith.constant dense<0.000000e+00> : vector<8xf32>
    %22 = vector.multi_reduction <add>, %21, %cst_13 [1] : vector<8x8xf32> to vector<8xf32>
    %23 = vector.shape_cast %22 : vector<8xf32> to vector<8x1xf32>
    %24 = tpu.reciprocal %23 {approx = true} : vector<8x1xf32> -> vector<8x1xf32>
    %25 = vector.broadcast %24 : vector<8x1xf32> to vector<8x8xf32>
    %26 = arith.mulf %21, %25 : vector<8x8xf32>
    %27 = arith.truncf %26 : vector<8x8xf32> to vector<8x8xbf16>
    %cst_14 = arith.constant dense<0.000000e+00> : vector<8x64xf32>
    %28 = tpu.matmul %27, %12, %cst_14 {dimension_numbers = #tpu.dot_dimension_numbers<[1], [0], [0], [1], [0, 0, 1, 1], [], []>} : vector<8x8xbf16>, vector<8x64xbf16>, vector<8x64xf32> -> vector<8x64xf32>
    %29 = arith.truncf %28 : vector<8x64xf32> to vector<8x64xbf16>
    %c0_15 = arith.constant 0 : index
    %c0_16 = arith.constant 0 : index
    %c0_17 = arith.constant 0 : index
    %30 = vector.load %arg6[%c0_15, %c0_16, %c0_17] : memref<1x8x128xbf16, #tpu.memory_space<vmem>>, vector<1x8x64xbf16>
    %31 = vector.shape_cast %30 : vector<1x8x64xbf16> to vector<8x64xbf16>
    %32 = vector.shape_cast %29 : vector<8x64xbf16> to vector<1x8x64xbf16>
    tpu.vector_store %arg6[%c0_15, %c0_16, %c0_17], %32 {strides = array<i32>} : memref<1x8x128xbf16, #tpu.memory_space<vmem>>, vector<1x8x64xbf16>,
    %33 = vector.extract_strided_slice %1 {offsets = [0, 64], sizes = [8, 64], strides = [1, 1]} : vector<8x128xbf16> to vector<8x64xbf16>
    %34 = vector.extract_strided_slice %3 {offsets = [0, 64], sizes = [8, 64], strides = [1, 1]} : vector<8x128xbf16> to vector<8x64xbf16>
    %35 = vector.extract_strided_slice %5 {offsets = [0, 64], sizes = [8, 64], strides = [1, 1]} : vector<8x128xbf16> to vector<8x64xbf16>
    %cst_18 = arith.constant dense<0.000000e+00> : vector<8x8xf32>
    %36 = tpu.matmul %33, %34, %cst_18 {dimension_numbers = #tpu.dot_dimension_numbers<[1], [1], [0], [0], [0, 0, 1, 0], [], []>} : vector<8x64xbf16>, vector<8x64xbf16>, vector<8x8xf32> -> vector<8x8xf32>
    %cst_19 = arith.constant 1.250000e-01 : f32
    %37 = vector.broadcast %cst_19 : f32 to vector<8x8xf32>
    %38 = arith.mulf %36, %37 : vector<8x8xf32>
    %39 = arith.addf %38, %9 : vector<8x8xf32>
    %cst_20 = arith.constant dense<0xFF800000> : vector<8xf32>
    %40 = vector.multi_reduction <maximumf>, %39, %cst_20 [1] : vector<8x8xf32> to vector<8xf32>
    %41 = vector.shape_cast %40 : vector<8xf32> to vector<8x1xf32>
    %42 = vector.broadcast %41 : vector<8x1xf32> to vector<8x8xf32>
    %43 = arith.subf %39, %42 : vector<8x8xf32>
    %44 = math.exp %43 : vector<8x8xf32>
    %cst_21 = arith.constant dense<0.000000e+00> : vector<8xf32>
    %45 = vector.multi_reduction <add>, %44, %cst_21 [1] : vector<8x8xf32> to vector<8xf32>
    %46 = vector.shape_cast %45 : vector<8xf32> to vector<8x1xf32>
    %47 = tpu.reciprocal %46 {approx = true} : vector<8x1xf32> -> vector<8x1xf32>
    %48 = vector.broadcast %47 : vector<8x1xf32> to vector<8x8xf32>
    %49 = arith.mulf %44, %48 : vector<8x8xf32>
    %50 = arith.truncf %49 : vector<8x8xf32> to vector<8x8xbf16>
    %cst_22 = arith.constant dense<0.000000e+00> : vector<8x64xf32>
    %51 = tpu.matmul %50, %35, %cst_22 {dimension_numbers = #tpu.dot_dimension_numbers<[1], [0], [0], [1], [0, 0, 1, 1], [], []>} : vector<8x8xbf16>, vector<8x64xbf16>, vector<8x64xf32> -> vector<8x64xf32>
    %52 = arith.truncf %51 : vector<8x64xf32> to vector<8x64xbf16>
    %c0_23 = arith.constant 0 : index
    %c0_24 = arith.constant 0 : index
    %c64 = arith.constant 64 : index
    %53 = vector.load %arg6[%c0_23, %c0_24, %c64] : memref<1x8x128xbf16, #tpu.memory_space<vmem>>, vector<1x8x64xbf16>
    %54 = vector.shape_cast %53 : vector<1x8x64xbf16> to vector<8x64xbf16>
    %55 = vector.shape_cast %52 : vector<8x64xbf16> to vector<1x8x64xbf16>
    tpu.vector_store %arg6[%c0_23, %c0_24, %c64], %55 {strides = array<i32>} : memref<1x8x128xbf16, #tpu.memory_space<vmem>>, vector<1x8x64xbf16>,
    return
  }
  func.func @transform_0(%arg0: i32, %arg1: i32) -> (i32, i32, i32) {
    %c0_i32 = arith.constant 0 : i32
    %0 = arith.addi %c0_i32, %arg1 : i32
    %c0_i32_0 = arith.constant 0 : i32
    %c0_i32_1 = arith.constant 0 : i32
    return %arg0, %c0_i32_0, %0 : i32, i32, i32
  }
  func.func @transform_1(%arg0: i32, %arg1: i32) -> (i32, i32, i32) {
    %c2_i32 = arith.constant 2 : i32
    %0 = arith.addi %c2_i32, %arg1 : i32
    %c0_i32 = arith.constant 0 : i32
    %c0_i32_0 = arith.constant 0 : i32
    return %arg0, %c0_i32, %0 : i32, i32, i32
  }
  func.func @transform_2(%arg0: i32, %arg1: i32) -> (i32, i32, i32) {
    %c4_i32 = arith.constant 4 : i32
    %0 = arith.addi %c4_i32, %arg1 : i32
    %c0_i32 = arith.constant 0 : i32
    %c0_i32_0 = arith.constant 0 : i32
    return %arg0, %c0_i32, %0 : i32, i32, i32
  }
  func.func @transform_3(%arg0: i32, %arg1: i32) -> (i32, i32, i32) {
    %c0_i32 = arith.constant 0 : i32
    %c0_i32_0 = arith.constant 0 : i32
    %c0_i32_1 = arith.constant 0 : i32
    return %arg0, %c0_i32, %c0_i32_0 : i32, i32, i32
  }
  func.func @transform_4(%arg0: i32, %arg1: i32) -> (i32, i32, i32) {
    %c0_i32 = arith.constant 0 : i32
    %c0_i32_0 = arith.constant 0 : i32
    return %arg0, %c0_i32, %arg1 : i32, i32, i32
  }
}

module attributes {stable_mosaic.version = 11 : i64} {
  func.func @_layernorm_kernel(%arg0: i32, %arg1: memref<16x256xbf16, #tpu.memory_space<vmem>>, %arg2: memref<1x256xf32, #tpu.memory_space<vmem>>, %arg3: memref<1x256xf32, #tpu.memory_space<vmem>>, %arg4: memref<16x256xbf16, #tpu.memory_space<vmem>>) attributes {dimension_semantics = [#tpu.dimension_semantics<parallel>], iteration_bounds = array<i64: 1>, scalar_prefetch = 0 : i64, scratch_operands = 0 : i64, tpu.core_type = #tpu.core_type<tc>, window_params = [{transform_indices = @transform_0, window_bounds = array<i64: 16, 256>}, {pipeline_mode = #tpu.pipeline_mode<synchronous>, transform_indices = @transform_1, window_bounds = array<i64: 1, 256>}, {pipeline_mode = #tpu.pipeline_mode<synchronous>, transform_indices = @transform_2, window_bounds = array<i64: 1, 256>}, {transform_indices = @transform_3, window_bounds = array<i64: 16, 256>}]} {
    %c0 = arith.constant 0 : index
    %c0_0 = arith.constant 0 : index
    %0 = vector.load %arg1[%c0, %c0_0] : memref<16x256xbf16, #tpu.memory_space<vmem>>, vector<16x256xbf16>
    %1 = arith.extf %0 : vector<16x256xbf16> to vector<16x256xf32>
    %cst = arith.constant dense<0.000000e+00> : vector<16xf32>
    %2 = vector.multi_reduction <add>, %1, %cst [1] : vector<16x256xf32> to vector<16xf32>
    %3 = vector.shape_cast %2 : vector<16xf32> to vector<16x1xf32>
    %cst_1 = arith.constant 2.560000e+02 : f32
    %4 = vector.broadcast %cst_1 : f32 to vector<16x1xf32>
    %5 = arith.divf %3, %4 : vector<16x1xf32>
    %6 = vector.broadcast %5 : vector<16x1xf32> to vector<16x256xf32>
    %7 = arith.subf %1, %6 : vector<16x256xf32>
    %8 = arith.mulf %7, %7 : vector<16x256xf32>
    %cst_2 = arith.constant dense<0.000000e+00> : vector<16xf32>
    %9 = vector.multi_reduction <add>, %8, %cst_2 [1] : vector<16x256xf32> to vector<16xf32>
    %10 = vector.shape_cast %9 : vector<16xf32> to vector<16x1xf32>
    %cst_3 = arith.constant 2.560000e+02 : f32
    %11 = vector.broadcast %cst_3 : f32 to vector<16x1xf32>
    %12 = arith.divf %10, %11 : vector<16x1xf32>
    %13 = vector.broadcast %5 : vector<16x1xf32> to vector<16x256xf32>
    %14 = arith.subf %1, %13 : vector<16x256xf32>
    %cst_4 = arith.constant 9.99999997E-7 : f32
    %15 = vector.broadcast %cst_4 : f32 to vector<16x1xf32>
    %16 = arith.addf %12, %15 : vector<16x1xf32>
    %17 = math.rsqrt %16 : vector<16x1xf32>
    %18 = vector.broadcast %17 : vector<16x1xf32> to vector<16x256xf32>
    %19 = arith.mulf %14, %18 : vector<16x256xf32>
    %c0_5 = arith.constant 0 : index
    %c0_6 = arith.constant 0 : index
    %20 = vector.load %arg2[%c0_5, %c0_6] : memref<1x256xf32, #tpu.memory_space<vmem>>, vector<1x256xf32>
    %21 = vector.broadcast %20 : vector<1x256xf32> to vector<16x256xf32>
    %22 = arith.mulf %19, %21 : vector<16x256xf32>
    %c0_7 = arith.constant 0 : index
    %c0_8 = arith.constant 0 : index
    %23 = vector.load %arg3[%c0_7, %c0_8] : memref<1x256xf32, #tpu.memory_space<vmem>>, vector<1x256xf32>
    %24 = vector.broadcast %23 : vector<1x256xf32> to vector<16x256xf32>
    %25 = arith.addf %22, %24 : vector<16x256xf32>
    %26 = arith.truncf %25 : vector<16x256xf32> to vector<16x256xbf16>
    %c0_9 = arith.constant 0 : index
    %c0_10 = arith.constant 0 : index
    %27 = vector.load %arg4[%c0_9, %c0_10] : memref<16x256xbf16, #tpu.memory_space<vmem>>, vector<16x256xbf16>
    tpu.vector_store %arg4[%c0_9, %c0_10], %26 {strides = array<i32>} : memref<16x256xbf16, #tpu.memory_space<vmem>>, vector<16x256xbf16>,
    return
  }
  func.func @transform_0(%arg0: i32) -> (i32, i32) {
    %c0_i32 = arith.constant 0 : i32
    %c0_i32_0 = arith.constant 0 : i32
    return %arg0, %c0_i32 : i32, i32
  }
  func.func @transform_1(%arg0: i32) -> (i32, i32) {
    %c0_i32 = arith.constant 0 : i32
    %c0_i32_0 = arith.constant 0 : i32
    %c0_i32_1 = arith.constant 0 : i32
    return %c0_i32, %c0_i32_0 : i32, i32
  }
  func.func @transform_2(%arg0: i32) -> (i32, i32) {
    %c0_i32 = arith.constant 0 : i32
    %c0_i32_0 = arith.constant 0 : i32
    %c0_i32_1 = arith.constant 0 : i32
    return %c0_i32, %c0_i32_0 : i32, i32
  }
  func.func @transform_3(%arg0: i32) -> (i32, i32) {
    %c0_i32 = arith.constant 0 : i32
    %c0_i32_0 = arith.constant 0 : i32
    return %arg0, %c0_i32 : i32, i32
  }
}

module attributes {stable_mosaic.version = 11 : i64} {
  func.func @_dense_kernel(%arg0: i32, %arg1: i32, %arg2: i32, %arg3: memref<16x256xbf16, #tpu.memory_space<vmem>>, %arg4: memref<256x384xbf16, #tpu.memory_space<vmem>>, %arg5: memref<1x384xf32, #tpu.memory_space<vmem>>, %arg6: memref<16x384xbf16, #tpu.memory_space<vmem>>, %arg7: memref<16x384xf32, #tpu.memory_space<vmem>>) attributes {dimension_semantics = [#tpu.dimension_semantics<parallel>, #tpu.dimension_semantics<parallel>, #tpu.dimension_semantics<arbitrary>], iteration_bounds = array<i64: 1, 2, 1>, scalar_prefetch = 0 : i64, scratch_operands = 1 : i64, tpu.core_type = #tpu.core_type<tc>, window_params = [{transform_indices = @transform_0, window_bounds = array<i64: 16, 256>}, {transform_indices = @transform_1, window_bounds = array<i64: 256, 384>}, {transform_indices = @transform_2, window_bounds = array<i64: 1, 384>}, {transform_indices = @transform_3, window_bounds = array<i64: 16, 384>}]} {
    %c0_i32 = arith.constant 0 : i32
    %0 = arith.cmpi eq, %arg2, %c0_i32 : i32
    %1 = arith.extui %0 : i1 to i32
    %c0_i32_0 = arith.constant 0 : i32
    %2 = arith.cmpi ne, %1, %c0_i32_0 : i32
    scf.if %2 {
      %cst_10 = arith.constant 0.000000e+00 : f32
      %12 = vector.broadcast %cst_10 : f32 to vector<16x384xf32>
      %c0_11 = arith.constant 0 : index
      %c0_12 = arith.constant 0 : index
      %13 = vector.load %arg7[%c0_11, %c0_12] : memref<16x384xf32, #tpu.memory_space<vmem>>, vector<16x384xf32>
      tpu.vector_store %arg7[%c0_11, %c0_12], %12 {strides = array<i32>} : memref<16x384xf32, #tpu.memory_space<vmem>>, vector<16x384xf32>,
    } else {
    }
    %c0 = arith.constant 0 : index
    %c0_1 = arith.constant 0 : index
    %3 = vector.load %arg7[%c0, %c0_1] : memref<16x384xf32, #tpu.memory_space<vmem>>, vector<16x384xf32>
    %c0_2 = arith.constant 0 : index
    %c0_3 = arith.constant 0 : index
    %4 = vector.load %arg3[%c0_2, %c0_3] : memref<16x256xbf16, #tpu.memory_space<vmem>>, vector<16x256xbf16>
    %c0_4 = arith.constant 0 : index
    %c0_5 = arith.constant 0 : index
    %5 = vector.load %arg4[%c0_4, %c0_5] : memref<256x384xbf16, #tpu.memory_space<vmem>>, vector<256x384xbf16>
    %cst = arith.constant dense<0.000000e+00> : vector<16x384xf32>
    %6 = tpu.matmul %4, %5, %cst {dimension_numbers = #tpu.dot_dimension_numbers<[1], [0], [0], [1], [0, 0, 1, 1], [], []>} : vector<16x256xbf16>, vector<256x384xbf16>, vector<16x384xf32> -> vector<16x384xf32>
    %7 = arith.addf %3, %6 : vector<16x384xf32>
    %c0_6 = arith.constant 0 : index
    %c0_7 = arith.constant 0 : index
    %8 = vector.load %arg7[%c0_6, %c0_7] : memref<16x384xf32, #tpu.memory_space<vmem>>, vector<16x384xf32>
    tpu.vector_store %arg7[%c0_6, %c0_7], %7 {strides = array<i32>} : memref<16x384xf32, #tpu.memory_space<vmem>>, vector<16x384xf32>,
    %c0_i32_8 = arith.constant 0 : i32
    %9 = arith.cmpi eq, %arg2, %c0_i32_8 : i32
    %10 = arith.extui %9 : i1 to i32
    %c0_i32_9 = arith.constant 0 : i32
    %11 = arith.cmpi ne, %10, %c0_i32_9 : i32
    scf.if %11 {
      %c0_10 = arith.constant 0 : index
      %c0_11 = arith.constant 0 : index
      %12 = vector.load %arg7[%c0_10, %c0_11] : memref<16x384xf32, #tpu.memory_space<vmem>>, vector<16x384xf32>
      %c0_12 = arith.constant 0 : index
      %c0_13 = arith.constant 0 : index
      %13 = vector.load %arg5[%c0_12, %c0_13] : memref<1x384xf32, #tpu.memory_space<vmem>>, vector<1x384xf32>
      %14 = vector.broadcast %13 : vector<1x384xf32> to vector<16x384xf32>
      %15 = arith.addf %12, %14 : vector<16x384xf32>
      %16 = arith.truncf %15 : vector<16x384xf32> to vector<16x384xbf16>
      %c0_14 = arith.constant 0 : index
      %c0_15 = arith.constant 0 : index
      %17 = vector.load %arg6[%c0_14, %c0_15] : memref<16x384xbf16, #tpu.memory_space<vmem>>, vector<16x384xbf16>
      tpu.vector_store %arg6[%c0_14, %c0_15], %16 {strides = array<i32>} : memref<16x384xbf16, #tpu.memory_space<vmem>>, vector<16x384xbf16>,
    } else {
    }
    return
  }
  func.func @transform_0(%arg0: i32, %arg1: i32, %arg2: i32) -> (i32, i32) {
    %c0_i32 = arith.constant 0 : i32
    return %arg0, %arg2 : i32, i32
  }
  func.func @transform_1(%arg0: i32, %arg1: i32, %arg2: i32) -> (i32, i32) {
    %c0_i32 = arith.constant 0 : i32
    return %arg2, %arg1 : i32, i32
  }
  func.func @transform_2(%arg0: i32, %arg1: i32, %arg2: i32) -> (i32, i32) {
    %c0_i32 = arith.constant 0 : i32
    %c0_i32_0 = arith.constant 0 : i32
    return %c0_i32, %arg1 : i32, i32
  }
  func.func @transform_3(%arg0: i32, %arg1: i32, %arg2: i32) -> (i32, i32) {
    %c0_i32 = arith.constant 0 : i32
    return %arg0, %arg1 : i32, i32
  }
}

module attributes {stable_mosaic.version = 11 : i64} {
  func.func @_dense_kernel(%arg0: i32, %arg1: i32, %arg2: i32, %arg3: memref<16x256xbf16, #tpu.memory_space<vmem>>, %arg4: memref<256x256xbf16, #tpu.memory_space<vmem>>, %arg5: memref<1x256xf32, #tpu.memory_space<vmem>>, %arg6: memref<16x256xbf16, #tpu.memory_space<vmem>>, %arg7: memref<16x256xbf16, #tpu.memory_space<vmem>>, %arg8: memref<16x256xf32, #tpu.memory_space<vmem>>) attributes {dimension_semantics = [#tpu.dimension_semantics<parallel>, #tpu.dimension_semantics<parallel>, #tpu.dimension_semantics<arbitrary>], iteration_bounds = array<i64: 1, 1, 1>, scalar_prefetch = 0 : i64, scratch_operands = 1 : i64, tpu.core_type = #tpu.core_type<tc>, window_params = [{transform_indices = @transform_0, window_bounds = array<i64: 16, 256>}, {transform_indices = @transform_1, window_bounds = array<i64: 256, 256>}, {transform_indices = @transform_2, window_bounds = array<i64: 1, 256>}, {transform_indices = @transform_3, window_bounds = array<i64: 16, 256>}, {transform_indices = @transform_4, window_bounds = array<i64: 16, 256>}]} {
    %c0_i32 = arith.constant 0 : i32
    %0 = arith.cmpi eq, %arg2, %c0_i32 : i32
    %1 = arith.extui %0 : i1 to i32
    %c0_i32_0 = arith.constant 0 : i32
    %2 = arith.cmpi ne, %1, %c0_i32_0 : i32
    scf.if %2 {
      %cst_10 = arith.constant 0.000000e+00 : f32
      %12 = vector.broadcast %cst_10 : f32 to vector<16x256xf32>
      %c0_11 = arith.constant 0 : index
      %c0_12 = arith.constant 0 : index
      %13 = vector.load %arg8[%c0_11, %c0_12] : memref<16x256xf32, #tpu.memory_space<vmem>>, vector<16x256xf32>
      tpu.vector_store %arg8[%c0_11, %c0_12], %12 {strides = array<i32>} : memref<16x256xf32, #tpu.memory_space<vmem>>, vector<16x256xf32>,
    } else {
    }
    %c0 = arith.constant 0 : index
    %c0_1 = arith.constant 0 : index
    %3 = vector.load %arg8[%c0, %c0_1] : memref<16x256xf32, #tpu.memory_space<vmem>>, vector<16x256xf32>
    %c0_2 = arith.constant 0 : index
    %c0_3 = arith.constant 0 : index
    %4 = vector.load %arg3[%c0_2, %c0_3] : memref<16x256xbf16, #tpu.memory_space<vmem>>, vector<16x256xbf16>
    %c0_4 = arith.constant 0 : index
    %c0_5 = arith.constant 0 : index
    %5 = vector.load %arg4[%c0_4, %c0_5] : memref<256x256xbf16, #tpu.memory_space<vmem>>, vector<256x256xbf16>
    %cst = arith.constant dense<0.000000e+00> : vector<16x256xf32>
    %6 = tpu.matmul %4, %5, %cst {dimension_numbers = #tpu.dot_dimension_numbers<[1], [0], [0], [1], [0, 0, 1, 1], [], []>} : vector<16x256xbf16>, vector<256x256xbf16>, vector<16x256xf32> -> vector<16x256xf32>
    %7 = arith.addf %3, %6 : vector<16x256xf32>
    %c0_6 = arith.constant 0 : index
    %c0_7 = arith.constant 0 : index
    %8 = vector.load %arg8[%c0_6, %c0_7] : memref<16x256xf32, #tpu.memory_space<vmem>>, vector<16x256xf32>
    tpu.vector_store %arg8[%c0_6, %c0_7], %7 {strides = array<i32>} : memref<16x256xf32, #tpu.memory_space<vmem>>, vector<16x256xf32>,
    %c0_i32_8 = arith.constant 0 : i32
    %9 = arith.cmpi eq, %arg2, %c0_i32_8 : i32
    %10 = arith.extui %9 : i1 to i32
    %c0_i32_9 = arith.constant 0 : i32
    %11 = arith.cmpi ne, %10, %c0_i32_9 : i32
    scf.if %11 {
      %c0_10 = arith.constant 0 : index
      %c0_11 = arith.constant 0 : index
      %12 = vector.load %arg8[%c0_10, %c0_11] : memref<16x256xf32, #tpu.memory_space<vmem>>, vector<16x256xf32>
      %c0_12 = arith.constant 0 : index
      %c0_13 = arith.constant 0 : index
      %13 = vector.load %arg5[%c0_12, %c0_13] : memref<1x256xf32, #tpu.memory_space<vmem>>, vector<1x256xf32>
      %14 = vector.broadcast %13 : vector<1x256xf32> to vector<16x256xf32>
      %15 = arith.addf %12, %14 : vector<16x256xf32>
      %c0_14 = arith.constant 0 : index
      %c0_15 = arith.constant 0 : index
      %16 = vector.load %arg6[%c0_14, %c0_15] : memref<16x256xbf16, #tpu.memory_space<vmem>>, vector<16x256xbf16>
      %17 = arith.extf %16 : vector<16x256xbf16> to vector<16x256xf32>
      %18 = arith.addf %15, %17 : vector<16x256xf32>
      %19 = arith.truncf %18 : vector<16x256xf32> to vector<16x256xbf16>
      %c0_16 = arith.constant 0 : index
      %c0_17 = arith.constant 0 : index
      %20 = vector.load %arg7[%c0_16, %c0_17] : memref<16x256xbf16, #tpu.memory_space<vmem>>, vector<16x256xbf16>
      tpu.vector_store %arg7[%c0_16, %c0_17], %19 {strides = array<i32>} : memref<16x256xbf16, #tpu.memory_space<vmem>>, vector<16x256xbf16>,
    } else {
    }
    return
  }
  func.func @transform_0(%arg0: i32, %arg1: i32, %arg2: i32) -> (i32, i32) {
    %c0_i32 = arith.constant 0 : i32
    return %arg0, %arg2 : i32, i32
  }
  func.func @transform_1(%arg0: i32, %arg1: i32, %arg2: i32) -> (i32, i32) {
    %c0_i32 = arith.constant 0 : i32
    return %arg2, %arg1 : i32, i32
  }
  func.func @transform_2(%arg0: i32, %arg1: i32, %arg2: i32) -> (i32, i32) {
    %c0_i32 = arith.constant 0 : i32
    %c0_i32_0 = arith.constant 0 : i32
    return %c0_i32, %arg1 : i32, i32
  }
  func.func @transform_3(%arg0: i32, %arg1: i32, %arg2: i32) -> (i32, i32) {
    %c0_i32 = arith.constant 0 : i32
    return %arg0, %arg1 : i32, i32
  }
  func.func @transform_4(%arg0: i32, %arg1: i32, %arg2: i32) -> (i32, i32) {
    %c0_i32 = arith.constant 0 : i32
    return %arg0, %arg1 : i32, i32
  }
}

module attributes {stable_mosaic.version = 11 : i64} {
  func.func @_dense_kernel(%arg0: i32, %arg1: i32, %arg2: i32, %arg3: memref<16x256xbf16, #tpu.memory_space<vmem>>, %arg4: memref<256x512xbf16, #tpu.memory_space<vmem>>, %arg5: memref<1x512xf32, #tpu.memory_space<vmem>>, %arg6: memref<16x512xbf16, #tpu.memory_space<vmem>>, %arg7: memref<16x512xf32, #tpu.memory_space<vmem>>) attributes {dimension_semantics = [#tpu.dimension_semantics<parallel>, #tpu.dimension_semantics<parallel>, #tpu.dimension_semantics<arbitrary>], iteration_bounds = array<i64: 1, 2, 1>, scalar_prefetch = 0 : i64, scratch_operands = 1 : i64, tpu.core_type = #tpu.core_type<tc>, window_params = [{transform_indices = @transform_0, window_bounds = array<i64: 16, 256>}, {transform_indices = @transform_1, window_bounds = array<i64: 256, 512>}, {transform_indices = @transform_2, window_bounds = array<i64: 1, 512>}, {transform_indices = @transform_3, window_bounds = array<i64: 16, 512>}]} {
    %c0_i32 = arith.constant 0 : i32
    %0 = arith.cmpi eq, %arg2, %c0_i32 : i32
    %1 = arith.extui %0 : i1 to i32
    %c0_i32_0 = arith.constant 0 : i32
    %2 = arith.cmpi ne, %1, %c0_i32_0 : i32
    scf.if %2 {
      %cst_10 = arith.constant 0.000000e+00 : f32
      %12 = vector.broadcast %cst_10 : f32 to vector<16x512xf32>
      %c0_11 = arith.constant 0 : index
      %c0_12 = arith.constant 0 : index
      %13 = vector.load %arg7[%c0_11, %c0_12] : memref<16x512xf32, #tpu.memory_space<vmem>>, vector<16x512xf32>
      tpu.vector_store %arg7[%c0_11, %c0_12], %12 {strides = array<i32>} : memref<16x512xf32, #tpu.memory_space<vmem>>, vector<16x512xf32>,
    } else {
    }
    %c0 = arith.constant 0 : index
    %c0_1 = arith.constant 0 : index
    %3 = vector.load %arg7[%c0, %c0_1] : memref<16x512xf32, #tpu.memory_space<vmem>>, vector<16x512xf32>
    %c0_2 = arith.constant 0 : index
    %c0_3 = arith.constant 0 : index
    %4 = vector.load %arg3[%c0_2, %c0_3] : memref<16x256xbf16, #tpu.memory_space<vmem>>, vector<16x256xbf16>
    %c0_4 = arith.constant 0 : index
    %c0_5 = arith.constant 0 : index
    %5 = vector.load %arg4[%c0_4, %c0_5] : memref<256x512xbf16, #tpu.memory_space<vmem>>, vector<256x512xbf16>
    %cst = arith.constant dense<0.000000e+00> : vector<16x512xf32>
    %6 = tpu.matmul %4, %5, %cst {dimension_numbers = #tpu.dot_dimension_numbers<[1], [0], [0], [1], [0, 0, 1, 1], [], []>} : vector<16x256xbf16>, vector<256x512xbf16>, vector<16x512xf32> -> vector<16x512xf32>
    %7 = arith.addf %3, %6 : vector<16x512xf32>
    %c0_6 = arith.constant 0 : index
    %c0_7 = arith.constant 0 : index
    %8 = vector.load %arg7[%c0_6, %c0_7] : memref<16x512xf32, #tpu.memory_space<vmem>>, vector<16x512xf32>
    tpu.vector_store %arg7[%c0_6, %c0_7], %7 {strides = array<i32>} : memref<16x512xf32, #tpu.memory_space<vmem>>, vector<16x512xf32>,
    %c0_i32_8 = arith.constant 0 : i32
    %9 = arith.cmpi eq, %arg2, %c0_i32_8 : i32
    %10 = arith.extui %9 : i1 to i32
    %c0_i32_9 = arith.constant 0 : i32
    %11 = arith.cmpi ne, %10, %c0_i32_9 : i32
    scf.if %11 {
      %c0_10 = arith.constant 0 : index
      %c0_11 = arith.constant 0 : index
      %12 = vector.load %arg7[%c0_10, %c0_11] : memref<16x512xf32, #tpu.memory_space<vmem>>, vector<16x512xf32>
      %c0_12 = arith.constant 0 : index
      %c0_13 = arith.constant 0 : index
      %13 = vector.load %arg5[%c0_12, %c0_13] : memref<1x512xf32, #tpu.memory_space<vmem>>, vector<1x512xf32>
      %14 = vector.broadcast %13 : vector<1x512xf32> to vector<16x512xf32>
      %15 = arith.addf %12, %14 : vector<16x512xf32>
      %cst_14 = arith.constant 5.000000e-01 : f32
      %16 = vector.broadcast %cst_14 : f32 to vector<16x512xf32>
      %17 = arith.mulf %16, %15 : vector<16x512xf32>
      %cst_15 = arith.constant 0.707106769 : f32
      %18 = vector.broadcast %cst_15 : f32 to vector<16x512xf32>
      %19 = arith.mulf %15, %18 : vector<16x512xf32>
      %20 = math.erf %19 : vector<16x512xf32>
      %cst_16 = arith.constant 1.000000e+00 : f32
      %21 = vector.broadcast %cst_16 : f32 to vector<16x512xf32>
      %22 = arith.addf %21, %20 : vector<16x512xf32>
      %23 = arith.mulf %17, %22 : vector<16x512xf32>
      %24 = arith.truncf %23 : vector<16x512xf32> to vector<16x512xbf16>
      %c0_17 = arith.constant 0 : index
      %c0_18 = arith.constant 0 : index
      %25 = vector.load %arg6[%c0_17, %c0_18] : memref<16x512xbf16, #tpu.memory_space<vmem>>, vector<16x512xbf16>
      tpu.vector_store %arg6[%c0_17, %c0_18], %24 {strides = array<i32>} : memref<16x512xbf16, #tpu.memory_space<vmem>>, vector<16x512xbf16>,
    } else {
    }
    return
  }
  func.func @transform_0(%arg0: i32, %arg1: i32, %arg2: i32) -> (i32, i32) {
    %c0_i32 = arith.constant 0 : i32
    return %arg0, %arg2 : i32, i32
  }
  func.func @transform_1(%arg0: i32, %arg1: i32, %arg2: i32) -> (i32, i32) {
    %c0_i32 = arith.constant 0 : i32
    return %arg2, %arg1 : i32, i32
  }
  func.func @transform_2(%arg0: i32, %arg1: i32, %arg2: i32) -> (i32, i32) {
    %c0_i32 = arith.constant 0 : i32
    %c0_i32_0 = arith.constant 0 : i32
    return %c0_i32, %arg1 : i32, i32
  }
  func.func @transform_3(%arg0: i32, %arg1: i32, %arg2: i32) -> (i32, i32) {
    %c0_i32 = arith.constant 0 : i32
    return %arg0, %arg1 : i32, i32
  }
}

module attributes {stable_mosaic.version = 11 : i64} {
  func.func @_dense_kernel(%arg0: i32, %arg1: i32, %arg2: i32, %arg3: memref<16x512xbf16, #tpu.memory_space<vmem>>, %arg4: memref<512x256xbf16, #tpu.memory_space<vmem>>, %arg5: memref<1x256xf32, #tpu.memory_space<vmem>>, %arg6: memref<16x256xbf16, #tpu.memory_space<vmem>>, %arg7: memref<16x256xbf16, #tpu.memory_space<vmem>>, %arg8: memref<16x256xf32, #tpu.memory_space<vmem>>) attributes {dimension_semantics = [#tpu.dimension_semantics<parallel>, #tpu.dimension_semantics<parallel>, #tpu.dimension_semantics<arbitrary>], iteration_bounds = array<i64: 1, 1, 2>, scalar_prefetch = 0 : i64, scratch_operands = 1 : i64, tpu.core_type = #tpu.core_type<tc>, window_params = [{transform_indices = @transform_0, window_bounds = array<i64: 16, 512>}, {transform_indices = @transform_1, window_bounds = array<i64: 512, 256>}, {transform_indices = @transform_2, window_bounds = array<i64: 1, 256>}, {transform_indices = @transform_3, window_bounds = array<i64: 16, 256>}, {transform_indices = @transform_4, window_bounds = array<i64: 16, 256>}]} {
    %c0_i32 = arith.constant 0 : i32
    %0 = arith.cmpi eq, %arg2, %c0_i32 : i32
    %1 = arith.extui %0 : i1 to i32
    %c0_i32_0 = arith.constant 0 : i32
    %2 = arith.cmpi ne, %1, %c0_i32_0 : i32
    scf.if %2 {
      %cst_9 = arith.constant 0.000000e+00 : f32
      %12 = vector.broadcast %cst_9 : f32 to vector<16x256xf32>
      %c0_10 = arith.constant 0 : index
      %c0_11 = arith.constant 0 : index
      %13 = vector.load %arg8[%c0_10, %c0_11] : memref<16x256xf32, #tpu.memory_space<vmem>>, vector<16x256xf32>
      tpu.vector_store %arg8[%c0_10, %c0_11], %12 {strides = array<i32>} : memref<16x256xf32, #tpu.memory_space<vmem>>, vector<16x256xf32>,
    } else {
    }
    %c0 = arith.constant 0 : index
    %c0_1 = arith.constant 0 : index
    %3 = vector.load %arg8[%c0, %c0_1] : memref<16x256xf32, #tpu.memory_space<vmem>>, vector<16x256xf32>
    %c0_2 = arith.constant 0 : index
    %c0_3 = arith.constant 0 : index
    %4 = vector.load %arg3[%c0_2, %c0_3] : memref<16x512xbf16, #tpu.memory_space<vmem>>, vector<16x512xbf16>
    %c0_4 = arith.constant 0 : index
    %c0_5 = arith.constant 0 : index
    %5 = vector.load %arg4[%c0_4, %c0_5] : memref<512x256xbf16, #tpu.memory_space<vmem>>, vector<512x256xbf16>
    %cst = arith.constant dense<0.000000e+00> : vector<16x256xf32>
    %6 = tpu.matmul %4, %5, %cst {dimension_numbers = #tpu.dot_dimension_numbers<[1], [0], [0], [1], [0, 0, 1, 1], [], []>} : vector<16x512xbf16>, vector<512x256xbf16>, vector<16x256xf32> -> vector<16x256xf32>
    %7 = arith.addf %3, %6 : vector<16x256xf32>
    %c0_6 = arith.constant 0 : index
    %c0_7 = arith.constant 0 : index
    %8 = vector.load %arg8[%c0_6, %c0_7] : memref<16x256xf32, #tpu.memory_space<vmem>>, vector<16x256xf32>
    tpu.vector_store %arg8[%c0_6, %c0_7], %7 {strides = array<i32>} : memref<16x256xf32, #tpu.memory_space<vmem>>, vector<16x256xf32>,
    %c1_i32 = arith.constant 1 : i32
    %9 = arith.cmpi eq, %arg2, %c1_i32 : i32
    %10 = arith.extui %9 : i1 to i32
    %c0_i32_8 = arith.constant 0 : i32
    %11 = arith.cmpi ne, %10, %c0_i32_8 : i32
    scf.if %11 {
      %c0_9 = arith.constant 0 : index
      %c0_10 = arith.constant 0 : index
      %12 = vector.load %arg8[%c0_9, %c0_10] : memref<16x256xf32, #tpu.memory_space<vmem>>, vector<16x256xf32>
      %c0_11 = arith.constant 0 : index
      %c0_12 = arith.constant 0 : index
      %13 = vector.load %arg5[%c0_11, %c0_12] : memref<1x256xf32, #tpu.memory_space<vmem>>, vector<1x256xf32>
      %14 = vector.broadcast %13 : vector<1x256xf32> to vector<16x256xf32>
      %15 = arith.addf %12, %14 : vector<16x256xf32>
      %c0_13 = arith.constant 0 : index
      %c0_14 = arith.constant 0 : index
      %16 = vector.load %arg6[%c0_13, %c0_14] : memref<16x256xbf16, #tpu.memory_space<vmem>>, vector<16x256xbf16>
      %17 = arith.extf %16 : vector<16x256xbf16> to vector<16x256xf32>
      %18 = arith.addf %15, %17 : vector<16x256xf32>
      %19 = arith.truncf %18 : vector<16x256xf32> to vector<16x256xbf16>
      %c0_15 = arith.constant 0 : index
      %c0_16 = arith.constant 0 : index
      %20 = vector.load %arg7[%c0_15, %c0_16] : memref<16x256xbf16, #tpu.memory_space<vmem>>, vector<16x256xbf16>
      tpu.vector_store %arg7[%c0_15, %c0_16], %19 {strides = array<i32>} : memref<16x256xbf16, #tpu.memory_space<vmem>>, vector<16x256xbf16>,
    } else {
    }
    return
  }
  func.func @transform_0(%arg0: i32, %arg1: i32, %arg2: i32) -> (i32, i32) {
    %c0_i32 = arith.constant 0 : i32
    return %arg0, %arg2 : i32, i32
  }
  func.func @transform_1(%arg0: i32, %arg1: i32, %arg2: i32) -> (i32, i32) {
    %c0_i32 = arith.constant 0 : i32
    return %arg2, %arg1 : i32, i32
  }
  func.func @transform_2(%arg0: i32, %arg1: i32, %arg2: i32) -> (i32, i32) {
    %c0_i32 = arith.constant 0 : i32
    %c0_i32_0 = arith.constant 0 : i32
    return %c0_i32, %arg1 : i32, i32
  }
  func.func @transform_3(%arg0: i32, %arg1: i32, %arg2: i32) -> (i32, i32) {
    %c0_i32 = arith.constant 0 : i32
    return %arg0, %arg1 : i32, i32
  }
  func.func @transform_4(%arg0: i32, %arg1: i32, %arg2: i32) -> (i32, i32) {
    %c0_i32 = arith.constant 0 : i32
    return %arg0, %arg1 : i32, i32
  }
}

module attributes {stable_mosaic.version = 11 : i64} {
  func.func @_dense_kernel(%arg0: i32, %arg1: i32, %arg2: i32, %arg3: memref<16x256xbf16, #tpu.memory_space<vmem>>, %arg4: memref<256x512xbf16, #tpu.memory_space<vmem>>, %arg5: memref<1x512xf32, #tpu.memory_space<vmem>>, %arg6: memref<16x512xbf16, #tpu.memory_space<vmem>>, %arg7: memref<16x512xf32, #tpu.memory_space<vmem>>) attributes {dimension_semantics = [#tpu.dimension_semantics<parallel>, #tpu.dimension_semantics<parallel>, #tpu.dimension_semantics<arbitrary>], iteration_bounds = array<i64: 1, 2, 1>, scalar_prefetch = 0 : i64, scratch_operands = 1 : i64, tpu.core_type = #tpu.core_type<tc>, window_params = [{transform_indices = @transform_0, window_bounds = array<i64: 16, 256>}, {transform_indices = @transform_1, window_bounds = array<i64: 256, 512>}, {transform_indices = @transform_2, window_bounds = array<i64: 1, 512>}, {transform_indices = @transform_3, window_bounds = array<i64: 16, 512>}]} {
    %c0_i32 = arith.constant 0 : i32
    %0 = arith.cmpi eq, %arg2, %c0_i32 : i32
    %1 = arith.extui %0 : i1 to i32
    %c0_i32_0 = arith.constant 0 : i32
    %2 = arith.cmpi ne, %1, %c0_i32_0 : i32
    scf.if %2 {
      %cst_10 = arith.constant 0.000000e+00 : f32
      %12 = vector.broadcast %cst_10 : f32 to vector<16x512xf32>
      %c0_11 = arith.constant 0 : index
      %c0_12 = arith.constant 0 : index
      %13 = vector.load %arg7[%c0_11, %c0_12] : memref<16x512xf32, #tpu.memory_space<vmem>>, vector<16x512xf32>
      tpu.vector_store %arg7[%c0_11, %c0_12], %12 {strides = array<i32>} : memref<16x512xf32, #tpu.memory_space<vmem>>, vector<16x512xf32>,
    } else {
    }
    %c0 = arith.constant 0 : index
    %c0_1 = arith.constant 0 : index
    %3 = vector.load %arg7[%c0, %c0_1] : memref<16x512xf32, #tpu.memory_space<vmem>>, vector<16x512xf32>
    %c0_2 = arith.constant 0 : index
    %c0_3 = arith.constant 0 : index
    %4 = vector.load %arg3[%c0_2, %c0_3] : memref<16x256xbf16, #tpu.memory_space<vmem>>, vector<16x256xbf16>
    %c0_4 = arith.constant 0 : index
    %c0_5 = arith.constant 0 : index
    %5 = vector.load %arg4[%c0_4, %c0_5] : memref<256x512xbf16, #tpu.memory_space<vmem>>, vector<256x512xbf16>
    %cst = arith.constant dense<0.000000e+00> : vector<16x512xf32>
    %6 = tpu.matmul %4, %5, %cst {dimension_numbers = #tpu.dot_dimension_numbers<[1], [0], [0], [1], [0, 0, 1, 1], [], []>} : vector<16x256xbf16>, vector<256x512xbf16>, vector<16x512xf32> -> vector<16x512xf32>
    %7 = arith.addf %3, %6 : vector<16x512xf32>
    %c0_6 = arith.constant 0 : index
    %c0_7 = arith.constant 0 : index
    %8 = vector.load %arg7[%c0_6, %c0_7] : memref<16x512xf32, #tpu.memory_space<vmem>>, vector<16x512xf32>
    tpu.vector_store %arg7[%c0_6, %c0_7], %7 {strides = array<i32>} : memref<16x512xf32, #tpu.memory_space<vmem>>, vector<16x512xf32>,
    %c0_i32_8 = arith.constant 0 : i32
    %9 = arith.cmpi eq, %arg2, %c0_i32_8 : i32
    %10 = arith.extui %9 : i1 to i32
    %c0_i32_9 = arith.constant 0 : i32
    %11 = arith.cmpi ne, %10, %c0_i32_9 : i32
    scf.if %11 {
      %c0_10 = arith.constant 0 : index
      %c0_11 = arith.constant 0 : index
      %12 = vector.load %arg7[%c0_10, %c0_11] : memref<16x512xf32, #tpu.memory_space<vmem>>, vector<16x512xf32>
      %c0_12 = arith.constant 0 : index
      %c0_13 = arith.constant 0 : index
      %13 = vector.load %arg5[%c0_12, %c0_13] : memref<1x512xf32, #tpu.memory_space<vmem>>, vector<1x512xf32>
      %14 = vector.broadcast %13 : vector<1x512xf32> to vector<16x512xf32>
      %15 = arith.addf %12, %14 : vector<16x512xf32>
      %cst_14 = arith.constant 5.000000e-01 : f32
      %16 = vector.broadcast %cst_14 : f32 to vector<16x512xf32>
      %17 = arith.mulf %16, %15 : vector<16x512xf32>
      %cst_15 = arith.constant 0.707106769 : f32
      %18 = vector.broadcast %cst_15 : f32 to vector<16x512xf32>
      %19 = arith.mulf %15, %18 : vector<16x512xf32>
      %20 = math.erf %19 : vector<16x512xf32>
      %cst_16 = arith.constant 1.000000e+00 : f32
      %21 = vector.broadcast %cst_16 : f32 to vector<16x512xf32>
      %22 = arith.addf %21, %20 : vector<16x512xf32>
      %23 = arith.mulf %17, %22 : vector<16x512xf32>
      %24 = arith.truncf %23 : vector<16x512xf32> to vector<16x512xbf16>
      %c0_17 = arith.constant 0 : index
      %c0_18 = arith.constant 0 : index
      %25 = vector.load %arg6[%c0_17, %c0_18] : memref<16x512xbf16, #tpu.memory_space<vmem>>, vector<16x512xbf16>
      tpu.vector_store %arg6[%c0_17, %c0_18], %24 {strides = array<i32>} : memref<16x512xbf16, #tpu.memory_space<vmem>>, vector<16x512xbf16>,
    } else {
    }
    return
  }
  func.func @transform_0(%arg0: i32, %arg1: i32, %arg2: i32) -> (i32, i32) {
    %c0_i32 = arith.constant 0 : i32
    return %arg0, %arg2 : i32, i32
  }
  func.func @transform_1(%arg0: i32, %arg1: i32, %arg2: i32) -> (i32, i32) {
    %c0_i32 = arith.constant 0 : i32
    return %arg2, %arg1 : i32, i32
  }
  func.func @transform_2(%arg0: i32, %arg1: i32, %arg2: i32) -> (i32, i32) {
    %c0_i32 = arith.constant 0 : i32
    %c0_i32_0 = arith.constant 0 : i32
    return %c0_i32, %arg1 : i32, i32
  }
  func.func @transform_3(%arg0: i32, %arg1: i32, %arg2: i32) -> (i32, i32) {
    %c0_i32 = arith.constant 0 : i32
    return %arg0, %arg1 : i32, i32
  }
}

</mosaic_0001>

<bundles_post_ra>
// kernel: _lambda_.17
= control target key start
LH: loop header
LB: loop body
LE: loop exit
PB: predicated region body
PF: predicated region fallthrough
CT: control target
= control target key end

     0   :  { %v112_v8 = vmov 256.0   ;;  %s151_s0 = inlined_call_operand.vmem [shape: bf16[16,256], index: 0, kind: input, shape index: {}]   ;;  %s152_s1 = inlined_call_operand.vmem [shape: f32[1,256], index: 1, kind: input, shape index: {}]   ;;  %s153_s2 = inlined_call_operand.vmem [shape: f32[1,256], index: 2, kind: input, shape index: {}]   ;;  %s154_s3 = inlined_call_operand.vmem [shape: bf16[16,256], index: 3, kind: output, shape index: {}]  }
   0x1   :  { %v14_v0 = vld [vmem:[%s151_s0] sm:$0xff]  ;;  %v15_v3 = vld [vmem:[%s151_s0 + $0x8] sm:$0xff]  ;;  %106 = vrcp.f32 %v112_v8 }
   0x2   :  { %v16_v1 = vunpack.c.l.bf16 %v14_v0  ;;  %v17_v2 = vunpack.c.h.bf16 %v14_v0  ;;  %v18_v5 = vunpack.c.l.bf16 %v15_v3  ;;  %v19_v6 = vunpack.c.h.bf16 %v15_v3  ;;  %v77_v39 = vld [vmem:[%s152_s1] sm:$0x3] }
   0x3   :  { %v87_v42 = vld [vmem:[%s153_s2] sm:$0x3]  ;;  %v79_v45 = vperm.slane %v77_v39, 0  ;;  %v80_v46 = vperm.slane %v77_v39, 1 }
   0x4   :  { %v20_v4 = vadd.f32 %v17_v2, %v16_v1  ;;  %v23_v7 = vadd.f32 %v19_v6, %v18_v5  ;;  %v89_v49 = vperm.slane %v87_v42, 0  ;;  %v90_v50 = vperm.slane %v87_v42, 1 }
   0x6   :  { %21 = vadd.xlane.f32.xlu0 %v20_v4 }
   0x7   :  { %v107_v9 = vpop.eup %106 }
   0x8   :  { %v27_v10 = vmul.f32 256.0, %v107_v9  ;;  %vm31_vm0 = vweird.f32 %v107_v9 }
   0xa   :  { %v28_v11 = vsub.f32 1.0, %v27_v10 }
   0xc   :  { %v29_v12 = vmul.f32 %v107_v9, %v28_v11 }
   0xe   :  { %24 = vadd.xlane.f32.xlu0 %v23_v7  ;;  %v30_v13 = vadd.f32 %v107_v9, %v29_v12 }
  0x10   :  { %v32_v14 = vsel %vm31_vm0, %v107_v9, %v30_v13 }
  0x79   :  { %v22_v15 = vpop.xlane.xlu0 %21 }
  0x7a   :  { %v33_v16 = vmul.f32 %v32_v14, %v22_v15 }
  0x7c   :  { %v35_v17 = vsub.f32 %v16_v1, %v33_v16  ;;  %v36_v18 = vsub.f32 %v17_v2, %v33_v16 }
  0x7e   :  { %v39_v19 = vmul.f32 %v35_v17, %v35_v17  ;;  %v40_v20 = vmul.f32 %v36_v18, %v36_v18 }
  0x80   :  { %v43_v21 = vadd.f32 %v40_v20, %v39_v19 }
  0x81   :  { %v25_v22 = vpop.xlane.xlu0 %24 }
  0x82   :  { %v34_v23 = vmul.f32 %v32_v14, %v25_v22  ;;  %44 = vadd.xlane.f32.xlu1 %v43_v21 }
  0x84   :  { %v37_v24 = vsub.f32 %v18_v5, %v34_v23  ;;  %v38_v25 = vsub.f32 %v19_v6, %v34_v23 }
  0x86   :  { %v41_v26 = vmul.f32 %v37_v24, %v37_v24  ;;  %v42_v27 = vmul.f32 %v38_v25, %v38_v25 }
  0x88   :  { %v46_v28 = vadd.f32 %v42_v27, %v41_v26 }
  0x8a   :  { %47 = vadd.xlane.f32.xlu1 %v46_v28 }
  0xf5   :  { %v45_v29 = vpop.xlane.xlu1 %44 }
  0xf6   :  { %v49_v30 = vmul.f32 %v45_v29, %v32_v14 }
  0xf8   :  { %v51_v31 = vadd.f32 1e-06, %v49_v30 }
  0xfa   :  { %108 = vrsqrt.f32 %v51_v31  ;;  %vm59_vm2 = vweird.f32 %v51_v31 }
  0xfd   :  { %v48_v32 = vpop.xlane.xlu1 %47 }
  0xfe   :  { %v50_v33 = vmul.f32 %v48_v32, %v32_v14 }
 0x100   :  { %v109_v34 = vpop.eup %108  ;;  %v52_v35 = vadd.f32 1e-06, %v50_v33 }
 0x101   :  { %v54_v36 = vmul.f32 %v109_v34, %v51_v31  ;;  %vm60_vm1 = vweird.f32 %v109_v34 }
 0x102   :  { %110 = vrsqrt.f32 %v52_v35  ;;  %vm61_vm3 = vmor %vm59_vm2, %vm60_vm1  ;;  %vm69_vm5 = vweird.f32 %v52_v35 }
 0x103   :  { %v55_v37 = vmul.f32 %v109_v34, %v54_v36 }
 0x105   :  { %v56_v38 = vmul.f32 0.5, %v55_v37 }
 0x107   :  { %v57_v40 = vsub.f32 1.5, %v56_v38 }
 0x108   :  { %v111_v41 = vpop.eup %110 }
 0x109   :  { %v58_v43 = vmul.f32 %v109_v34, %v57_v40  ;;  %v64_v44 = vmul.f32 %v111_v41, %v52_v35  ;;  %vm70_vm4 = vweird.f32 %v111_v41 }
 0x10a   :  { %vm71_vm6 = vmor %vm69_vm5, %vm70_vm4 }
 0x10b   :  { %v62_v47 = vsel %vm61_vm3, %v109_v34, %v58_v43  ;;  %v65_v48 = vmul.f32 %v111_v41, %v64_v44 }
 0x10c   :  { %v73_v51 = vmul.f32 %v62_v47, %v35_v17  ;;  %v74_v52 = vmul.f32 %v62_v47, %v36_v18 }
 0x10d   :  { %v66_v53 = vmul.f32 0.5, %v65_v48 }
 0x10e   :  { %v83_v54 = vmul.f32 %v79_v45, %v73_v51  ;;  %v84_v55 = vmul.f32 %v80_v46, %v74_v52 }
 0x10f   :  { %v67_v56 = vsub.f32 1.5, %v66_v53 }
 0x110   :  { %v93_v57 = vadd.f32 %v89_v49, %v83_v54  ;;  %v94_v58 = vadd.f32 %v90_v50, %v84_v55 }
 0x111   :  { %v68_v59 = vmul.f32 %v111_v41, %v67_v56 }
 0x112   :  { %v97_v60 = vpack.c.bf16 %v94_v58, %v93_v57 }
 0x113   :  { %v72_v61 = vsel %vm71_vm6, %v111_v41, %v68_v59 }
 0x114   :  { %99 = vst [vmem:[%s154_s3] sm:$0xff] %v97_v60  ;;  %v75_v62 = vmul.f32 %v72_v61, %v37_v24  ;;  %v76_v63 = vmul.f32 %v72_v61, %v38_v25 }
 0x116   :  { %v85_v0 = vmul.f32 %v79_v45, %v75_v62  ;;  %v86_v1 = vmul.f32 %v80_v46, %v76_v63 }
 0x118   :  { %v95_v2 = vadd.f32 %v89_v49, %v85_v0  ;;  %v96_v3 = vadd.f32 %v90_v50, %v86_v1 }
 0x11a   :  { %v98_v4 = vpack.c.bf16 %v96_v3, %v95_v2 }
 0x11c   :  { %100 = vst [vmem:[%s154_s3 + $0x8] sm:$0xff] %v98_v4 }

// kernel: _lambda_.19
= control target key start
LH: loop header
LB: loop body
LE: loop exit
PB: predicated region body
PF: predicated region fallthrough
CT: control target
= control target key end

     0   :  { %s723_s15 = smov 0   ;;  %s725_s16 = smov 0   ;;  %s811_s0 = inlined_call_operand.vmem [shape: bf16[2,8,768], index: 0, kind: input, shape index: {}, may-alias: {0,1,2}]   ;;  %s812_s1 = inlined_call_operand.vmem [shape: bf16[2,8,768], index: 1, kind: input, shape index: {}, may-alias: {0,1,2}]   ;;  %s813_s2 = inlined_call_operand.vmem [shape: bf16[2,8,768], index: 2, kind: input, shape index: {}, may-alias: {0,1,2}]   ;;  %s814_s3 = inlined_call_operand.vmem [shape: f32[2,1,8], index: 3, kind: input, shape index: {}]   ;;  %s815_s4 = inlined_call_operand.vmem [shape: bf16[2,8,256], index: 4, kind: output, shape index: {}]  }
   0x1   :  { %s727_s17 = smov 0   ;;  %s729_s18 = smov 0  }
   0x2   :  { %s731_s19 = smov 0  }
   0x3 LB: > { %s23_s20 = sadd.s32 1, %s687_s17  ;;  %s26_s21 = sadd.s32 1, %s691_s18  ;;  %s695_s19 = sphi %s731_s19, %s14_s19   ;;  %s691_s18 = sphi %s729_s18, %s819_s18   ;;  %s687_s17 = sphi %s727_s17, %s818_s17   ;;  %s683_s16 = sphi %s725_s16, %s817_s16   ;;  %s679_s15 = sphi %s723_s15, %s816_s15  }
   0x4   : > { %p24_p0 = scmp.ge.s32.totalorder %s23_s20, 2  ;;  %p594_p1 = scmp.ge.s32.totalorder %s695_s19, 1 }
   0x5   : > { %p227_p2 = scmp.lt.s32.totalorder %s695_s19, 5 }
   0x6   : > { %s821_s20 = smov (%p24_p0, %s23_s20), 0  ;;  %s823_s21 = smov (!%p24_p0, %s26_s21), %s691_s18 }
   0x7   : > { %p228_p3 = pnand %p594_p1, %p227_p2  ;;  %p28_p4 = scmp.ge.s32.totalorder %s823_s21, 2 }
   0x8   : > { %p280_p5 = scmp.lt.s32.totalorder (!%p228_p3), %s683_s16, 1  ;;  %s288_s22 = sadd.s32 (!%p228_p3), 2, %s679_s15 }
   0x9   : > { %s825_s21 = smov (%p28_p4, %s823_s21), 0  ;;  %231 = sbr.rel (%p228_p3) target bundleno = 791 (0x317), region = 36 }
   0xa   : > { %p291_p6 = scmp.lt.s32.totalorder (!%p228_p3), %s288_s22, 5  ;;  %p282_p7 = scmp.lt.s32.totalorder (!%p228_p3), %s679_s15, 5 }
   0xb   : > { %s697_s9 = smov (!%p228_p3), 64   ;;  %s298_s13 = sadd.s32 (!%p228_p3), 4, %s679_s15 }
   0xc   : > { %p301_p8 = scmp.lt.s32.totalorder (!%p228_p3), %s298_s13, 5  ;;  %p313_p9 = scmp.lt.s32.totalorder (!%p228_p3), %s679_s15, 1 }
   0xe   : > { %s827_s16 = smov (!%p280_p5, %s683_s16), 1  ;;  %s829_s22 = smov (!%p291_p6, %s288_s22), 5  ;;  %vm327_vm0 = vcmask 523264   ;;  %vm349_vm1 = vcmask 64512   ;;  %vm365_vm2 = vcmask 1043456   ;;  %vm383_vm3 = vcmask 519168  }
   0xf   : > { %s759_s23 = smul.u32 6, %s827_s16  ;;  %s310_s12 = scalar_lea.vmem %s814_s3, %s827_s16  ;;  %vm457_vm4 = vcmask 1043968  }
  0x10   : > { %s283_s29 = scalar_select %p282_p7, %s679_s15, 5  ;;  %v648_v12 = vld [vmem:[%s310_s12] ss:$0 sm:$0xff] }
  0x11   : > { %s294_s24 = sadd.s32 %s759_s23, %s829_s22  ;;  %s831_s13 = smov (!%p301_p8, %s298_s13), 5 }
  0x12   : > { %s596_s25 = sshll.u32 %s294_s24, 2  ;;  %s285_s30 = sadd.s32 %s759_s23, %s283_s29 }
  0x13   : > { %s296_s28 = scalar_lea.vmem %s812_s1, %s596_s25  ;;  %s595_s5 = sshll.u32 %s285_s30, 2 }
  0x14   : > { %v321_v0 = vld [vmem:[%s296_s28] sm:$0xf]  ;;  %s287_s8 = scalar_lea.vmem %s811_s0, %s595_s5  ;;  %s304_s14 = sadd.s32 %s759_s23, %s831_s13 }
  0x15   : > { %v391_v1 = vunpack.c.l.b16 %v321_v0  ;;  %v320_v3 = vld [vmem:[%s287_s8] sm:$0xf]  ;;  %v332_v6 = vsel %vm327_vm0, %v321_v0, 0  ;;  %s597_s22 = sshll.u32 %s304_s14, 2  ;;  %s833_s15 = smov (!%p313_p9, %s679_s15), 1 }
  0x16   : > { %v386_v4 = vunpack.c.l.b16 %v320_v3  ;;  %341 = vmatpush.bf16.xpose.msra.mxu0 %v332_v6  ;;  %s306_s26 = scalar_lea.vmem %s813_s2, %s597_s22  ;;  %s598_s23 = sshll.u32 %s827_s16, 1 }
  0x17   : > { %v392_v2 = vpack.c.b16 %v391_v1, %v391_v1  ;;  %v322_v31 = vld [vmem:[%s306_s26] sm:$0xf]  ;;  %s316_s27 = sadd.s32 %s598_s23, %s833_s15 }
  0x18   : > { %v387_v5 = vpack.c.b16 %v386_v4, %v386_v4  ;;  %v429_v32 = vunpack.c.l.b16 %v322_v31  ;;  %v367_v34 = vsel %vm365_vm2, %v322_v31, 0  ;;  %s599_s28 = sshll.u32 %s316_s27, 2 }
  0x19   : > { %393 = vrot.lane.b32.xlu0 %v392_v2, %s697_s9  ;;  %376 = vmatpush.bf16.msra.mxu1 %v367_v34  ;;  %s318_s5 = scalar_lea.vmem %s815_s4, %s599_s28 }
  0x1a   : > { %v430_v33 = vpack.c.b16 %v429_v32, %v429_v32 }
  0x1d   : > { %600 = vmatmul.msk.bf16.vlgmr.msra.gmra.mxu0 %vm327_vm0, %v320_v3 }
  0x21   : > { %388 = vrot.lane.b32.xlu0 %v387_v5, %s697_s9 }
  0x8b   : > { %v394_v7 = vpop.permute.xlu0 %393 }
  0x8c   : > { %v399_v8 = vsel %vm327_vm0, %v394_v7, 0 }
  0x8d   : > { %408 = vmatpush.bf16.xpose.msra.mxu2 %v399_v8 }
  0x93   : > { %v389_v9 = vpop.permute.xlu0 %388 }
  0x94   : > { %602 = vmatmul.msk.bf16.vlgmr.msra.gmra.mxu2 %vm327_vm0, %v389_v9 }
  0x9a   : > { %v343_v10 = vpop.f32.mrf.mxu0 }
  0x9b   : > { %v347_v16 = vmul.f32 0.125, %v343_v10 }
  0x9d   : > { %v348_v18 = vadd.f32 %v648_v12, %v347_v16 }
  0x9f   : > { %v350_v20 = vsel %vm349_vm1, %v348_v18, -inf }
  0xa2   : > { %v345_v11 = vpop.f32.mrf.mxu0 }
 0x117   : > { %v410_v13 = vpop.f32.mrf.mxu2 }
 0x118   : > { %v414_v14 = vmul.f32 0.125, %v410_v13 }
 0x11a   : > { %v415_v15 = vadd.f32 %v648_v12, %v414_v14 }
 0x11c   : > { %v416_v17 = vsel %vm349_vm1, %v415_v15, -inf }
 0x11d   : > { %417 = vmax.xlane.f32.xlu1 %v416_v17 }
 0x11f   : > { %v412_v19 = vpop.f32.mrf.mxu2 }
 0x125   : > { %351 = vmax.xlane.f32.xlu1 %v350_v20 }
 0x190   : > { %v418_v21 = vpop.xlane.xlu1 %417 }
 0x191   : > { %v419_v22 = vsub.f32 %v415_v15, %v418_v21 }
 0x193   : > { %v420_v23 = vmul.f32 1.442695, %v419_v22 }
 0x195   : > { %649 = vpow2.f32 %v420_v23 }
 0x198   : > { %v352_v24 = vpop.xlane.xlu1 %351 }
 0x199   : > { %v353_v25 = vsub.f32 %v348_v18, %v352_v24 }
 0x19b   : > { %v650_v26 = vpop.eup %649  ;;  %v354_v27 = vmul.f32 1.442695, %v353_v25 }
 0x19c   : > { %v422_v28 = vsel %vm349_vm1, %v650_v26, 0.0 }
 0x19d   : > { %651 = vpow2.f32 %v354_v27  ;;  %423 = vadd.xlane.f32.xlu2 %v422_v28 }
 0x1a3   : > { %v652_v29 = vpop.eup %651 }
 0x1a4   : > { %v356_v30 = vsel %vm349_vm1, %v652_v29, 0.0 }
 0x1a5   : > { %357 = vadd.xlane.f32.xlu0 %v356_v30 }
 0x1b5   : > { %431 = vrot.lane.b32.xlu2 %v430_v33, %s697_s9 }
 0x210   : > { %v424_v35 = vpop.xlane.xlu2 %423 }
 0x211   : > { %653 = vrcp.f32 %v424_v35 }
 0x217   : > { %v654_v36 = vpop.eup %653 }
 0x218   : > { %v432_v37 = vpop.permute.xlu2 %431  ;;  %v358_v38 = vpop.xlane.xlu0 %357  ;;  %v426_v39 = vmul.f32 %v654_v36, %v650_v26 }
 0x219   : > { %655 = vrcp.f32 %v358_v38  ;;  %v437_v40 = vsel %vm365_vm2, %v432_v37, 0 }
 0x21a   : > { %446 = vmatpush.bf16.msra.mxu3 %v437_v40  ;;  %v427_v41 = vpack.c.bf16 %v426_v39, %v426_v39 }
 0x21d   : > { %603 = vmatmul.msk.bf16.vlgmr.msra.gmra.mxu3 %vm349_vm1, %v427_v41 }
 0x21f   : > { %v656_v42 = vpop.eup %655 }
 0x220   : > { %v360_v43 = vmul.f32 %v656_v42, %v652_v29 }
 0x222   : > { %v361_v44 = vpack.c.bf16 %v360_v43, %v360_v43 }
 0x224   : > { %601 = vmatmul.msk.bf16.vlgmr.msra.gmra.mxu1 %vm349_vm1, %v361_v44 }
 0x2a0   : > { %v448_v45 = vpop.f32.mrf.mxu3 }
 0x2a1   : > { %v452_v46 = vpack.c.bf16 %v448_v45, %v448_v45  ;;  %v378_v47 = vpop.f32.mrf.mxu1 }
 0x2a2   : > { %v382_v48 = vpack.c.bf16 %v378_v47, %v378_v47 }
 0x2a3   : > { %454 = vrot.lane.b32.xlu1 %v452_v46, %s697_s9 }
 0x2a4   : > { %384 = vst.msk [vmem:[%s318_s5] sm:$0xf] %vm383_vm3, %v382_v48 }
 0x2a8   : > { %v450_v49 = vpop.f32.mrf.mxu3 }
 0x2a9   : > { %v380_v50 = vpop.f32.mrf.mxu1 }
 0x315   : > { %v455_v51 = vpop.permute.xlu1 %454 }
 0x316   : > { %458 = vst.msk [vmem:[%s318_s5] sm:$0xf] %vm457_vm4, %v455_v51 }
 0x317 PF: > { %s14_s19 = sadd.s32 1, %s695_s19   ;;  %s816_s15 = smov %s687_s17 }
 0x318   : > { %p11_p10 = scmp.ge.s32.totalorder %s14_s19, 6   ;;  %s817_s16 = smov %s691_s18 }
 0x319   : > { %s818_s17 = smov %s821_s20  ;;  %s819_s18 = smov %s825_s21 }
 0x31a   :  { %13 = sbr.rel (!%p11_p10) target bundleno = 3 (0x3), region = 75 }

// kernel: _lambda_.16
= control target key start
LH: loop header
LB: loop body
LE: loop exit
PB: predicated region body
PF: predicated region fallthrough
CT: control target
= control target key end

     0   :  { %8 = vsyncpa [#allocation4], 0  ;;  %s1327_s15 = smov [#allocation3]   ;;  %s1328_s17 = smov 128   ;;  %s1392_s0 = inlined_call_operand.vmem [shape: bf16[8,768], index: 0, kind: input, shape index: {}]   ;;  %s1393_s1 = inlined_call_operand.hbm [shape: bf16[768,256], index: 1, kind: input, shape index: {}]   ;;  %s1394_s2 = inlined_call_operand.vmem [shape: f32[1,256], index: 2, kind: input, shape index: {}]   ;;  %s1395_s3 = inlined_call_operand.vmem [shape: bf16[8,256], index: 3, kind: output, shape index: {}]  }
   0x1   :  { %s15_s14 = sshll.u32 %s1393_s1, 4  ;;  %s17_s16 = sshll.u32 %s1327_s15, 4  ;;  %s16_s14 = int_to_ptr.hbm [resolvable:$true] %s15_s14  ;;  %s18_s16 = int_to_ptr.vmem [resolvable:$true] %s17_s16 }
   0x2   :  { %s1329_s18 = smov 8  }
   0x3   :  { %23 = dma.hbm_to_vmem [thread:$0]  %s16_s14, 12288, %s18_s16, [#allocation4], %s1328_s17, %s1328_s17, %s1329_s18  }
   0x4   :  { %1325 = dma.done.wait [#allocation4], 12288  }
   0x5   :  { %1326 = vsyncadd [#allocation4], 4294955008  ;;  %v876_v0 = vld [vmem:[#allocation3 + $0x70] sm:$0xf]  ;;  %v1217_v1 = vld [vmem:[#allocation3 + $0x74] sm:$0xf0] }
   0x6   :  { %v940_v2 = vld [vmem:[#allocation3 + $0xf0] sm:$0xf]  ;;  %v877_v3 = vor.u32 %v1217_v1, %v876_v0  ;;  %v1233_v4 = vld [vmem:[#allocation3 + $0xf4] sm:$0xf0]  ;;  %v868_v11 = vld [vmem:[#allocation3 + $0x60] sm:$0xf] }
   0x7   :  { %v1004_v5 = vld [vmem:[#allocation3 + $0x170] sm:$0xf]  ;;  %v1249_v6 = vld [vmem:[#allocation3 + $0x174] sm:$0xf0]  ;;  %v941_v7 = vor.u32 %v1233_v4, %v940_v2  ;;  %v1215_v13 = vld [vmem:[#allocation3 + $0x64] sm:$0xf0] }
   0x8   :  { %v1005_v8 = vor.u32 %v1249_v6, %v1004_v5  ;;  %v1068_v9 = vld [vmem:[#allocation3 + $0x1f0] sm:$0xf]  ;;  %v1265_v10 = vld [vmem:[#allocation3 + $0x1f4] sm:$0xf0]  ;;  %638 = vmatpush.bf16.msra.mxu0 %v877_v3  ;;  %v932_v14 = vld [vmem:[#allocation3 + $0xe0] sm:$0xf]  ;;  %v869_v16 = vor.u32 %v1215_v13, %v868_v11 }
   0x9   :  { %v1069_v12 = vor.u32 %v1265_v10, %v1068_v9  ;;  %v1231_v15 = vld [vmem:[#allocation3 + $0xe4] sm:$0xf0]  ;;  %651 = vmatpush.bf16.msra.mxu1 %v941_v7  ;;  %v996_v18 = vld [vmem:[#allocation3 + $0x160] sm:$0xf]  ;;  %v860_v23 = vld [vmem:[#allocation3 + $0x50] sm:$0xf] }
   0xa   :  { %664 = vmatpush.bf16.msra.mxu2 %v1005_v8  ;;  %v933_v17 = vor.u32 %v1231_v15, %v932_v14  ;;  %v1247_v19 = vld [vmem:[#allocation3 + $0x164] sm:$0xf0]  ;;  %v1060_v20 = vld [vmem:[#allocation3 + $0x1e0] sm:$0xf]  ;;  %v1213_v24 = vld [vmem:[#allocation3 + $0x54] sm:$0xf0] }
   0xb   :  { %677 = vmatpush.bf16.msra.mxu3 %v1069_v12  ;;  %v997_v21 = vor.u32 %v1247_v19, %v996_v18  ;;  %v1263_v22 = vld [vmem:[#allocation3 + $0x1e4] sm:$0xf0]  ;;  %v924_v26 = vld [vmem:[#allocation3 + $0xd0] sm:$0xf]  ;;  %v1229_v27 = vld [vmem:[#allocation3 + $0xd4] sm:$0xf0]  ;;  %v861_v29 = vor.u32 %v1213_v24, %v860_v23 }
   0xc   :  { %v1061_v25 = vor.u32 %v1263_v22, %v1060_v20  ;;  %v988_v28 = vld [vmem:[#allocation3 + $0x150] sm:$0xf]  ;;  %639 = vmatpush.bf16.msra.mxu0 %v869_v16  ;;  %v1245_v30 = vld [vmem:[#allocation3 + $0x154] sm:$0xf0]  ;;  %v925_v33 = vor.u32 %v1229_v27, %v924_v26  ;;  %v852_v35 = vld [vmem:[#allocation3 + $0x40] sm:$0xf] }
   0xd   :  { %v1052_v31 = vld [vmem:[#allocation3 + $0x1d0] sm:$0xf]  ;;  %v1261_v32 = vld [vmem:[#allocation3 + $0x1d4] sm:$0xf0]  ;;  %652 = vmatpush.bf16.msra.mxu1 %v933_v17  ;;  %v989_v34 = vor.u32 %v1245_v30, %v988_v28  ;;  %v1211_v36 = vld [vmem:[#allocation3 + $0x44] sm:$0xf0] }
   0xe   :  { %665 = vmatpush.bf16.msra.mxu2 %v997_v21  ;;  %v916_v37 = vld [vmem:[#allocation3 + $0xc0] sm:$0xf]  ;;  %v1053_v38 = vor.u32 %v1261_v32, %v1052_v31  ;;  %v1227_v39 = vld [vmem:[#allocation3 + $0xc4] sm:$0xf0]  ;;  %v853_v44 = vor.u32 %v1211_v36, %v852_v35  ;;  %v844_v47 = vld [vmem:[#allocation3 + $0x30] sm:$0xf] }
   0xf   :  { %678 = vmatpush.bf16.msra.mxu3 %v1061_v25  ;;  %v980_v40 = vld [vmem:[#allocation3 + $0x140] sm:$0xf]  ;;  %v1243_v41 = vld [vmem:[#allocation3 + $0x144] sm:$0xf0]  ;;  %v917_v45 = vor.u32 %v1227_v39, %v916_v37  ;;  %v1209_v48 = vld [vmem:[#allocation3 + $0x34] sm:$0xf0] }
  0x10   :  { %v1044_v42 = vld [vmem:[#allocation3 + $0x1c0] sm:$0xf]  ;;  %v1259_v43 = vld [vmem:[#allocation3 + $0x1c4] sm:$0xf0]  ;;  %640 = vmatpush.bf16.msra.mxu0 %v861_v29  ;;  %v981_v46 = vor.u32 %v1243_v41, %v980_v40  ;;  %v908_v49 = vld [vmem:[#allocation3 + $0xb0] sm:$0xf]  ;;  %v845_v56 = vor.u32 %v1209_v48, %v844_v47 }
  0x11   :  { %653 = vmatpush.bf16.msra.mxu1 %v925_v33  ;;  %v1045_v50 = vor.u32 %v1259_v43, %v1044_v42  ;;  %v1225_v51 = vld [vmem:[#allocation3 + $0xb4] sm:$0xf0]  ;;  %v972_v52 = vld [vmem:[#allocation3 + $0x130] sm:$0xf]  ;;  %v836_v59 = vld [vmem:[#allocation3 + $0x20] sm:$0xf] }
  0x12   :  { %666 = vmatpush.bf16.msra.mxu2 %v989_v34  ;;  %v1241_v53 = vld [vmem:[#allocation3 + $0x134] sm:$0xf0]  ;;  %v1036_v54 = vld [vmem:[#allocation3 + $0x1b0] sm:$0xf]  ;;  %v909_v57 = vor.u32 %v1225_v51, %v908_v49  ;;  %v1207_v60 = vld [vmem:[#allocation3 + $0x24] sm:$0xf0] }
  0x13   :  { %679 = vmatpush.bf16.msra.mxu3 %v1053_v38  ;;  %v1257_v55 = vld [vmem:[#allocation3 + $0x1b4] sm:$0xf0]  ;;  %v973_v58 = vor.u32 %v1241_v53, %v972_v52  ;;  %v900_v61 = vld [vmem:[#allocation3 + $0xa0] sm:$0xf]  ;;  %v1223_v63 = vld [vmem:[#allocation3 + $0xa4] sm:$0xf0]  ;;  %v837_v4 = vor.u32 %v1207_v60, %v836_v59 }
  0x14   :  { %641 = vmatpush.bf16.msra.mxu0 %v853_v44  ;;  %v1037_v62 = vor.u32 %v1257_v55, %v1036_v54  ;;  %v964_v0 = vld [vmem:[#allocation3 + $0x120] sm:$0xf]  ;;  %v1239_v1 = vld [vmem:[#allocation3 + $0x124] sm:$0xf0]  ;;  %v901_v5 = vor.u32 %v1223_v63, %v900_v61  ;;  %v828_v7 = vld [vmem:[#allocation3 + $0x10] sm:$0xf] }
  0x15   :  { %654 = vmatpush.bf16.msra.mxu1 %v917_v45  ;;  %v1028_v2 = vld [vmem:[#allocation3 + $0x1a0] sm:$0xf]  ;;  %v1255_v3 = vld [vmem:[#allocation3 + $0x1a4] sm:$0xf0]  ;;  %v965_v6 = vor.u32 %v1239_v1, %v964_v0  ;;  %v1205_v8 = vld [vmem:[#allocation3 + $0x14] sm:$0xf0] }
  0x16   :  { %667 = vmatpush.bf16.msra.mxu2 %v981_v46  ;;  %v892_v9 = vld [vmem:[#allocation3 + $0x90] sm:$0xf]  ;;  %v1029_v10 = vor.u32 %v1255_v3, %v1028_v2  ;;  %v1221_v11 = vld [vmem:[#allocation3 + $0x94] sm:$0xf0]  ;;  %v829_v16 = vor.u32 %v1205_v8, %v828_v7  ;;  %v820_v17 = vld [vmem:[#allocation3] sm:$0xf] }
  0x17   :  { %680 = vmatpush.bf16.msra.mxu3 %v1045_v50  ;;  %v956_v12 = vld [vmem:[#allocation3 + $0x110] sm:$0xf]  ;;  %v1237_v13 = vld [vmem:[#allocation3 + $0x114] sm:$0xf0]  ;;  %v1203_v18 = vld [vmem:[#allocation3 + $0x4] sm:$0xf0]  ;;  %v893_v19 = vor.u32 %v1221_v11, %v892_v9 }
  0x18   :  { %642 = vmatpush.bf16.msra.mxu0 %v845_v56  ;;  %v1020_v14 = vld [vmem:[#allocation3 + $0x190] sm:$0xf]  ;;  %v1253_v15 = vld [vmem:[#allocation3 + $0x194] sm:$0xf0]  ;;  %v957_v20 = vor.u32 %v1237_v13, %v956_v12  ;;  %v884_v21 = vld [vmem:[#allocation3 + $0x80] sm:$0xf]  ;;  %v821_v31 = vor.u32 %v1203_v18, %v820_v17 }
  0x19   :  { %655 = vmatpush.bf16.msra.mxu1 %v909_v57  ;;  %v1219_v22 = vld [vmem:[#allocation3 + $0x84] sm:$0xf0]  ;;  %v948_v23 = vld [vmem:[#allocation3 + $0x100] sm:$0xf]  ;;  %v1021_v24 = vor.u32 %v1253_v15, %v1020_v14  ;;  %v1132_v28 = vld [vmem:[#allocation3 + $0x270] sm:$0xf] }
  0x1a   :  { %668 = vmatpush.bf16.msra.mxu2 %v973_v58  ;;  %v1235_v25 = vld [vmem:[#allocation3 + $0x104] sm:$0xf0]  ;;  %v1012_v26 = vld [vmem:[#allocation3 + $0x180] sm:$0xf]  ;;  %v1281_v29 = vld [vmem:[#allocation3 + $0x274] sm:$0xf0]  ;;  %v885_v35 = vor.u32 %v1219_v22, %v884_v21 }
  0x1b   :  { %681 = vmatpush.bf16.msra.mxu3 %v1037_v62  ;;  %v1251_v27 = vld [vmem:[#allocation3 + $0x184] sm:$0xf0]  ;;  %v1196_v30 = vld [vmem:[#allocation3 + $0x2f0] sm:$0xf]  ;;  %v1297_v32 = vld [vmem:[#allocation3 + $0x2f4] sm:$0xf0]  ;;  %v949_v36 = vor.u32 %v1235_v25, %v948_v23  ;;  %v1133_v40 = vor.u32 %v1281_v29, %v1132_v28 }
  0x1c   :  { %643 = vmatpush.bf16.msra.mxu0 %v837_v4  ;;  %v1216_v33 = vld [vmem:[#allocation3 + $0x74] sm:$0xf]  ;;  %v878_v34 = vld [vmem:[#allocation3 + $0x78] sm:$0xf0]  ;;  %v1013_v39 = vor.u32 %v1251_v27, %v1012_v26  ;;  %v1197_v41 = vor.u32 %v1297_v32, %v1196_v30  ;;  %v1124_v43 = vld [vmem:[#allocation3 + $0x260] sm:$0xf] }
  0x1d   :  { %656 = vmatpush.bf16.msra.mxu1 %v901_v5  ;;  %v1232_v37 = vld [vmem:[#allocation3 + $0xf4] sm:$0xf]  ;;  %v942_v38 = vld [vmem:[#allocation3 + $0xf8] sm:$0xf0]  ;;  %v881_v42 = vor.u32 %v1216_v33, %v878_v34  ;;  %v1279_v44 = vld [vmem:[#allocation3 + $0x264] sm:$0xf0] }
  0x1e   :  { %669 = vmatpush.bf16.msra.mxu2 %v965_v6  ;;  %v1188_v45 = vld [vmem:[#allocation3 + $0x2e0] sm:$0xf]  ;;  %v945_v46 = vor.u32 %v1232_v37, %v942_v38  ;;  %v1295_v47 = vld [vmem:[#allocation3 + $0x2e4] sm:$0xf0]  ;;  %v1214_v48 = vld [vmem:[#allocation3 + $0x64] sm:$0xf]  ;;  %v1125_v52 = vor.u32 %v1279_v44, %v1124_v43 }
  0x1f   :  { %682 = vmatpush.bf16.msra.mxu3 %v1029_v10  ;;  %v870_v49 = vld [vmem:[#allocation3 + $0x68] sm:$0xf0]  ;;  %v1230_v50 = vld [vmem:[#allocation3 + $0xe4] sm:$0xf]  ;;  %v1116_v53 = vld [vmem:[#allocation3 + $0x250] sm:$0xf]  ;;  %v1189_v55 = vor.u32 %v1295_v47, %v1188_v45 }
  0x20   :  { %644 = vmatpush.bf16.msra.mxu0 %v829_v16  ;;  %v934_v51 = vld [vmem:[#allocation3 + $0xe8] sm:$0xf0]  ;;  %v1277_v54 = vld [vmem:[#allocation3 + $0x254] sm:$0xf0]  ;;  %v873_v56 = vor.u32 %v1214_v48, %v870_v49  ;;  %v1180_v57 = vld [vmem:[#allocation3 + $0x2d0] sm:$0xf] }
  0x21   :  { %657 = vmatpush.bf16.msra.mxu1 %v893_v19  ;;  %v1293_v58 = vld [vmem:[#allocation3 + $0x2d4] sm:$0xf0]  ;;  %v38_v59 = vld [vmem:[%s1392_s0] sm:$0xff]  ;;  %v937_v60 = vor.u32 %v1230_v50, %v934_v51  ;;  %v1212_v61 = vld [vmem:[#allocation3 + $0x54] sm:$0xf]  ;;  %v1117_v6 = vor.u32 %v1277_v54, %v1116_v53 }
  0x22   :  { %670 = vmatpush.bf16.msra.mxu2 %v957_v20  ;;  %v862_v62 = vld [vmem:[#allocation3 + $0x58] sm:$0xf0]  ;;  %v140_v63 = vunpack.c.l.b16 %v38_v59  ;;  %v39_v0 = vld [vmem:[%s1392_s0 + $0x8] sm:$0xff]  ;;  %v141_v1 = vunpack.c.h.b16 %v38_v59  ;;  %v1228_v2 = vld [vmem:[#allocation3 + $0xd4] sm:$0xf]  ;;  %v1181_v9 = vor.u32 %v1293_v58, %v1180_v57 }
  0x23   :  { %683 = vmatpush.bf16.msra.mxu3 %v1021_v24  ;;  %v926_v3 = vld [vmem:[#allocation3 + $0xd8] sm:$0xf0]  ;;  %v142_v4 = vunpack.c.l.b16 %v39_v0  ;;  %v143_v5 = vunpack.c.h.b16 %v39_v0  ;;  %v865_v10 = vor.u32 %v1212_v61, %v862_v62  ;;  %v1108_v11 = vld [vmem:[#allocation3 + $0x240] sm:$0xf]  ;;  %v1275_v12 = vld [vmem:[#allocation3 + $0x244] sm:$0xf0] }
  0x24   :  { %645 = vmatpush.bf16.msra.mxu0 %v821_v31  ;;  %v1359_v7 = vpack.c.b16 %v140_v63, %v140_v63  ;;  %v1361_v8 = vpack.c.b16 %v141_v1, %v141_v1  ;;  %v1172_v13 = vld [vmem:[#allocation3 + $0x2c0] sm:$0xf]  ;;  %v929_v15 = vor.u32 %v1228_v2, %v926_v3  ;;  %v1291_v16 = vld [vmem:[#allocation3 + $0x2c4] sm:$0xf0]  ;;  %v1210_v17 = vld [vmem:[#allocation3 + $0x44] sm:$0xf]  ;;  %v1109_v22 = vor.u32 %v1275_v12, %v1108_v11 }
  0x25   :  { %658 = vmatpush.bf16.msra.mxu1 %v885_v35  ;;  %v1363_v14 = vpack.c.b16 %v142_v4, %v142_v4  ;;  %v854_v18 = vld [vmem:[#allocation3 + $0x48] sm:$0xf0]  ;;  %v1366_v19 = vpack.c.b16 %v143_v5, %v143_v5  ;;  %v1226_v20 = vld [vmem:[#allocation3 + $0xc4] sm:$0xf]  ;;  %v1173_v23 = vor.u32 %v1291_v16, %v1172_v13  ;;  %v1100_v25 = vld [vmem:[#allocation3 + $0x230] sm:$0xf] }
  0x26   :  { %671 = vmatpush.bf16.msra.mxu2 %v949_v36  ;;  %v918_v21 = vld [vmem:[#allocation3 + $0xc8] sm:$0xf0]  ;;  %v857_v24 = vor.u32 %v1210_v17, %v854_v18  ;;  %v1273_v26 = vld [vmem:[#allocation3 + $0x234] sm:$0xf0]  ;;  %v1164_v27 = vld [vmem:[#allocation3 + $0x2b0] sm:$0xf] }
  0x27   :  { %684 = vmatpush.bf16.msra.mxu3 %v1013_v39  ;;  %646 = vmatmul.bf16.vlgmr.msra.gmra.mxu0 %v1359_v7  ;;  %v921_v28 = vor.u32 %v1226_v20, %v918_v21  ;;  %v1289_v29 = vld [vmem:[#allocation3 + $0x2b4] sm:$0xf0]  ;;  %v1208_v30 = vld [vmem:[#allocation3 + $0x34] sm:$0xf]  ;;  %v846_v31 = vld [vmem:[#allocation3 + $0x38] sm:$0xf0]  ;;  %v1101_v34 = vor.u32 %v1273_v26, %v1100_v25 }
  0x28   :  { %690 = vmatpush.bf16.msrb.mxu0 %v1133_v40  ;;  %659 = vmatmul.bf16.vlgmr.msra.gmra.mxu1 %v1361_v8  ;;  %v1224_v32 = vld [vmem:[#allocation3 + $0xb4] sm:$0xf]  ;;  %v910_v33 = vld [vmem:[#allocation3 + $0xb8] sm:$0xf0]  ;;  %v1165_v35 = vor.u32 %v1289_v29, %v1164_v27  ;;  %v849_v36 = vor.u32 %v1208_v30, %v846_v31  ;;  %v1092_v37 = vld [vmem:[#allocation3 + $0x220] sm:$0xf] }
  0x29   :  { %703 = vmatpush.bf16.msrb.mxu1 %v1197_v41  ;;  %672 = vmatmul.bf16.vlgmr.msra.gmra.mxu2 %v1363_v14  ;;  %v1271_v38 = vld [vmem:[#allocation3 + $0x224] sm:$0xf0]  ;;  %v1156_v39 = vld [vmem:[#allocation3 + $0x2a0] sm:$0xf]  ;;  %v913_v40 = vor.u32 %v1224_v32, %v910_v33  ;;  %v838_v43 = vld [vmem:[#allocation3 + $0x28] sm:$0xf0] }
  0x2a   :  { %716 = vmatpush.bf16.msrb.mxu2 %v881_v42  ;;  %685 = vmatmul.bf16.vlgmr.msra.gmra.mxu3 %v1366_v19  ;;  %v1287_v41 = vld [vmem:[#allocation3 + $0x2a4] sm:$0xf0]  ;;  %v1206_v42 = vld [vmem:[#allocation3 + $0x24] sm:$0xf]  ;;  %v902_v45 = vld [vmem:[#allocation3 + $0xa8] sm:$0xf0] }
  0x2b   :  { %729 = vmatpush.bf16.msrb.mxu3 %v945_v46  ;;  %v1222_v44 = vld [vmem:[#allocation3 + $0xa4] sm:$0xf]  ;;  %v1093_v46 = vor.u32 %v1271_v38, %v1092_v37  ;;  %v1157_v47 = vor.u32 %v1287_v41, %v1156_v39  ;;  %v841_v48 = vor.u32 %v1206_v42, %v838_v43  ;;  %v1084_v49 = vld [vmem:[#allocation3 + $0x210] sm:$0xf]  ;;  %v1269_v50 = vld [vmem:[#allocation3 + $0x214] sm:$0xf0] }
  0x2c   :  { %691 = vmatpush.bf16.msrb.mxu0 %v1125_v52  ;;  %v1148_v51 = vld [vmem:[#allocation3 + $0x290] sm:$0xf]  ;;  %v905_v52 = vor.u32 %v1222_v44, %v902_v45  ;;  %v1285_v53 = vld [vmem:[#allocation3 + $0x294] sm:$0xf0]  ;;  %v1204_v54 = vld [vmem:[#allocation3 + $0x14] sm:$0xf]  ;;  %v1085_v58 = vor.u32 %v1269_v50, %v1084_v49 }
  0x2d   :  { %704 = vmatpush.bf16.msrb.mxu1 %v1189_v55  ;;  %v830_v55 = vld [vmem:[#allocation3 + $0x18] sm:$0xf0]  ;;  %v1076_v59 = vld [vmem:[#allocation3 + $0x200] sm:$0xf]  ;;  %v1149_v62 = vor.u32 %v1285_v53, %v1148_v51  ;;  %v1283_v0 = vld [vmem:[#allocation3 + $0x284] sm:$0xf0] }
  0x2e   :  { %717 = vmatpush.bf16.msrb.mxu2 %v873_v56  ;;  %v1220_v56 = vld [vmem:[#allocation3 + $0x94] sm:$0xf]  ;;  %v894_v57 = vld [vmem:[#allocation3 + $0x98] sm:$0xf0]  ;;  %v1140_v61 = vld [vmem:[#allocation3 + $0x280] sm:$0xf]  ;;  %v833_v63 = vor.u32 %v1204_v54, %v830_v55 }
  0x2f   :  { %730 = vmatpush.bf16.msrb.mxu3 %v937_v60  ;;  %v1267_v60 = vld [vmem:[#allocation3 + $0x204] sm:$0xf0]  ;;  %v1202_v1 = vld [vmem:[#allocation3 + $0x4] sm:$0xf]  ;;  %v40_v2 = vld [vmem:[%s1392_s0 + $0x10] sm:$0xff]  ;;  %v897_v3 = vor.u32 %v1220_v56, %v894_v57  ;;  %v1141_v18 = vor.u32 %v1283_v0, %v1140_v61 }
  0x30   :  { %692 = vmatpush.bf16.msrb.mxu0 %v1117_v6  ;;  %v822_v4 = vld [vmem:[#allocation3 + $0x8] sm:$0xf0]  ;;  %v1218_v5 = vld [vmem:[#allocation3 + $0x84] sm:$0xf]  ;;  %v1264_v11 = vld [vmem:[#allocation3 + $0x1f4] sm:$0xf]  ;;  %v1077_v12 = vor.u32 %v1267_v60, %v1076_v59  ;;  %v144_v17 = vunpack.c.l.b16 %v40_v2  ;;  %v145_v25 = vunpack.c.h.b16 %v40_v2 }
  0x31   :  { %705 = vmatpush.bf16.msrb.mxu1 %v1181_v9  ;;  %v886_v6 = vld [vmem:[#allocation3 + $0x88] sm:$0xf0]  ;;  %v1248_v9 = vld [vmem:[#allocation3 + $0x174] sm:$0xf]  ;;  %v1070_v13 = vld [vmem:[#allocation3 + $0x1f8] sm:$0xf0]  ;;  %v825_v20 = vor.u32 %v1202_v1, %v822_v4 }
  0x32   :  { %718 = vmatpush.bf16.msrb.mxu2 %v865_v10  ;;  %v1006_v10 = vld [vmem:[#allocation3 + $0x178] sm:$0xf0]  ;;  %v1296_v21 = vld [vmem:[#allocation3 + $0x2f4] sm:$0xf]  ;;  %v1073_v26 = vor.u32 %v1264_v11, %v1070_v13  ;;  %v998_v29 = vld [vmem:[#allocation3 + $0x168] sm:$0xf0]  ;;  %v1376_v39 = vpack.c.b16 %v145_v25, %v145_v25 }
  0x33   :  { %731 = vmatpush.bf16.msrb.mxu3 %v929_v15  ;;  %v1280_v15 = vld [vmem:[#allocation3 + $0x274] sm:$0xf]  ;;  %v1134_v16 = vld [vmem:[#allocation3 + $0x278] sm:$0xf0]  ;;  %v1262_v30 = vld [vmem:[#allocation3 + $0x1e4] sm:$0xf] }
  0x34   :  { %693 = vmatpush.bf16.msrb.mxu0 %v1109_v22  ;;  %v1198_v22 = vld [vmem:[#allocation3 + $0x2f8] sm:$0xf0]  ;;  %v1137_v27 = vor.u32 %v1280_v15, %v1134_v16  ;;  %v1062_v32 = vld [vmem:[#allocation3 + $0x1e8] sm:$0xf0]  ;;  %v1278_v33 = vld [vmem:[#allocation3 + $0x264] sm:$0xf] }
  0x35   :  { %706 = vmatpush.bf16.msrb.mxu1 %v1173_v23  ;;  %v889_v23 = vor.u32 %v1218_v5, %v886_v6  ;;  %v1201_v31 = vor.u32 %v1296_v21, %v1198_v22  ;;  %v1190_v37 = vld [vmem:[#allocation3 + $0x2e8] sm:$0xf0]  ;;  %v1244_v42 = vld [vmem:[#allocation3 + $0x154] sm:$0xf]  ;;  %v990_v43 = vld [vmem:[#allocation3 + $0x158] sm:$0xf0] }
  0x36   :  { %719 = vmatpush.bf16.msrb.mxu2 %v857_v24  ;;  %v1009_v24 = vor.u32 %v1248_v9, %v1006_v10  ;;  %v1260_v44 = vld [vmem:[#allocation3 + $0x1d4] sm:$0xf]  ;;  %v1182_v50 = vld [vmem:[#allocation3 + $0x2d8] sm:$0xf0]  ;;  %v993_v51 = vor.u32 %v1244_v42, %v990_v43  ;;  %v1242_v54 = vld [vmem:[#allocation3 + $0x144] sm:$0xf] }
  0x37   :  { %732 = vmatpush.bf16.msrb.mxu3 %v921_v28  ;;  %v1246_v28 = vld [vmem:[#allocation3 + $0x164] sm:$0xf]  ;;  %v1292_v49 = vld [vmem:[#allocation3 + $0x2d4] sm:$0xf]  ;;  %v982_v55 = vld [vmem:[#allocation3 + $0x148] sm:$0xf0] }
  0x38   :  { %694 = vmatpush.bf16.msrb.mxu0 %v1101_v34  ;;  %v1126_v34 = vld [vmem:[#allocation3 + $0x268] sm:$0xf0]  ;;  %v1001_v38 = vor.u32 %v1246_v28, %v998_v29  ;;  %v1258_v56 = vld [vmem:[#allocation3 + $0x1c4] sm:$0xf]  ;;  %v1185_v57 = vor.u32 %v1292_v49, %v1182_v50  ;;  %v985_v61 = vor.u32 %v1242_v54, %v982_v55  ;;  %v1240_v0 = vld [vmem:[#allocation3 + $0x134] sm:$0xf] }
  0x39   :  { %707 = vmatpush.bf16.msrb.mxu1 %v1165_v35  ;;  %v1374_v35 = vpack.c.b16 %v144_v17, %v144_v17  ;;  %v1129_v41 = vor.u32 %v1278_v33, %v1126_v34  ;;  %v1274_v59 = vld [vmem:[#allocation3 + $0x244] sm:$0xf]  ;;  %v974_v1 = vld [vmem:[#allocation3 + $0x138] sm:$0xf0]  ;;  %v1256_v2 = vld [vmem:[#allocation3 + $0x1b4] sm:$0xf] }
  0x3a   :  { %720 = vmatpush.bf16.msrb.mxu2 %v849_v36  ;;  %v1294_v36 = vld [vmem:[#allocation3 + $0x2e4] sm:$0xf]  ;;  %v1038_v4 = vld [vmem:[#allocation3 + $0x1b8] sm:$0xf0]  ;;  %v1272_v5 = vld [vmem:[#allocation3 + $0x234] sm:$0xf]  ;;  %v977_v11 = vor.u32 %v1240_v0, %v974_v1 }
  0x3b   :  { %733 = vmatpush.bf16.msrb.mxu3 %v913_v40  ;;  %v1065_v40 = vor.u32 %v1262_v30, %v1062_v32  ;;  %v1193_v45 = vor.u32 %v1294_v36, %v1190_v37  ;;  %v1290_v60 = vld [vmem:[#allocation3 + $0x2c4] sm:$0xf]  ;;  %v1102_v6 = vld [vmem:[#allocation3 + $0x238] sm:$0xf0]  ;;  %v1288_v9 = vld [vmem:[#allocation3 + $0x2b4] sm:$0xf] }
  0x3c   :  { %695 = vmatpush.bf16.msrb.mxu0 %v1093_v46  ;;  %v1054_v46 = vld [vmem:[#allocation3 + $0x1d8] sm:$0xf0]  ;;  %v1105_v13 = vor.u32 %v1272_v5, %v1102_v6  ;;  %v1238_v15 = vld [vmem:[#allocation3 + $0x124] sm:$0xf]  ;;  %v966_v16 = vld [vmem:[#allocation3 + $0x128] sm:$0xf0] }
  0x3d   :  { %708 = vmatpush.bf16.msrb.mxu1 %v1157_v47  ;;  %v1276_v47 = vld [vmem:[#allocation3 + $0x254] sm:$0xf]  ;;  %v1166_v10 = vld [vmem:[#allocation3 + $0x2b8] sm:$0xf0]  ;;  %v1254_v17 = vld [vmem:[#allocation3 + $0x1a4] sm:$0xf]  ;;  %v969_v25 = vor.u32 %v1238_v15, %v966_v16 }
  0x3e   :  { %721 = vmatpush.bf16.msrb.mxu2 %v841_v48  ;;  %v1118_v48 = vld [vmem:[#allocation3 + $0x258] sm:$0xf0]  ;;  %v1270_v21 = vld [vmem:[#allocation3 + $0x224] sm:$0xf]  ;;  %v1094_v22 = vld [vmem:[#allocation3 + $0x228] sm:$0xf0] }
  0x3f   :  { %734 = vmatpush.bf16.msrb.mxu3 %v905_v52  ;;  %v1057_v52 = vor.u32 %v1260_v44, %v1054_v46  ;;  %v1121_v53 = vor.u32 %v1276_v47, %v1118_v48  ;;  %v1236_v28 = vld [vmem:[#allocation3 + $0x114] sm:$0xf]  ;;  %v958_v29 = vld [vmem:[#allocation3 + $0x118] sm:$0xf0]  ;;  %v1234_v42 = vld [vmem:[#allocation3 + $0x104] sm:$0xf] }
  0x40   :  { %696 = vmatpush.bf16.msrb.mxu0 %v1085_v58  ;;  %v1046_v58 = vld [vmem:[#allocation3 + $0x1c8] sm:$0xf0]  ;;  %v1252_v30 = vld [vmem:[#allocation3 + $0x194] sm:$0xf]  ;;  %v1022_v32 = vld [vmem:[#allocation3 + $0x198] sm:$0xf0] }
  0x41   :  { %709 = vmatpush.bf16.msrb.mxu1 %v1149_v62  ;;  %v1049_v62 = vor.u32 %v1258_v56, %v1046_v58  ;;  %v1268_v33 = vld [vmem:[#allocation3 + $0x214] sm:$0xf]  ;;  %v1086_v34 = vld [vmem:[#allocation3 + $0x218] sm:$0xf0]  ;;  %v950_v43 = vld [vmem:[#allocation3 + $0x108] sm:$0xf0] }
  0x42   :  { %722 = vmatpush.bf16.msrb.mxu2 %v833_v63  ;;  %v1284_v36 = vld [vmem:[#allocation3 + $0x294] sm:$0xf]  ;;  %v1150_v37 = vld [vmem:[#allocation3 + $0x298] sm:$0xf0]  ;;  %v1250_v44 = vld [vmem:[#allocation3 + $0x184] sm:$0xf] }
  0x43   :  { %735 = vmatpush.bf16.msrb.mxu3 %v897_v3  ;;  %v1014_v46 = vld [vmem:[#allocation3 + $0x188] sm:$0xf0]  ;;  %v1266_v47 = vld [vmem:[#allocation3 + $0x204] sm:$0xf] }
  0x44   :  { %697 = vmatpush.bf16.msrb.mxu0 %v1077_v12  ;;  %v1041_v12 = vor.u32 %v1256_v2, %v1038_v4  ;;  %v1078_v48 = vld [vmem:[#allocation3 + $0x208] sm:$0xf0]  ;;  %v1282_v49 = vld [vmem:[#allocation3 + $0x284] sm:$0xf] }
  0x45   :  { %710 = vmatpush.bf16.msrb.mxu1 %v1141_v18  ;;  %v1169_v18 = vor.u32 %v1288_v9, %v1166_v10  ;;  %v1142_v50 = vld [vmem:[#allocation3 + $0x288] sm:$0xf0] }
  0x46   :  { %723 = vmatpush.bf16.msrb.mxu2 %v825_v20  ;;  %v1030_v20 = vld [vmem:[#allocation3 + $0x1a8] sm:$0xf0]  ;;  %v1145_v54 = vor.u32 %v1282_v49, %v1142_v50 }
  0x47   :  { %736 = vmatpush.bf16.msrb.mxu3 %v889_v23  ;;  %698 = vmatmul.bf16.vlgmr.msrb.gmra.mxu0 %v1374_v35  ;;  %v1286_v23 = vld [vmem:[#allocation3 + $0x2a4] sm:$0xf] }
  0x48   :  { %742 = vmatpush.bf16.msra.mxu0 %v1009_v24  ;;  %711 = vmatmul.bf16.vlgmr.msrb.gmra.mxu1 %v1376_v39  ;;  %v1158_v24 = vld [vmem:[#allocation3 + $0x2a8] sm:$0xf0] }
  0x49   :  { %755 = vmatpush.bf16.msra.mxu1 %v1073_v26  ;;  %724 = vmatmul.bf16.vlgmr.msrb.gmra.mxu2 %v1359_v7  ;;  %v1110_v7 = vld [vmem:[#allocation3 + $0x248] sm:$0xf0]  ;;  %v1033_v26 = vor.u32 %v1254_v17, %v1030_v20 }
  0x4a   :  { %768 = vmatpush.bf16.msra.mxu2 %v1137_v27  ;;  %737 = vmatmul.bf16.vlgmr.msrb.gmra.mxu3 %v1361_v8  ;;  %v1174_v8 = vld [vmem:[#allocation3 + $0x2c8] sm:$0xf0]  ;;  %v1113_v63 = vor.u32 %v1274_v59, %v1110_v7  ;;  %v1097_v27 = vor.u32 %v1270_v21, %v1094_v22 }
  0x4b   :  { %781 = vmatpush.bf16.msra.mxu3 %v1201_v31  ;;  %v1177_v3 = vor.u32 %v1290_v60, %v1174_v8  ;;  %v1161_v31 = vor.u32 %v1286_v23, %v1158_v24 }
  0x4c   :  { %743 = vmatpush.bf16.msra.mxu0 %v1001_v38  ;;  %v961_v38 = vor.u32 %v1236_v28, %v958_v29 }
  0x4d   :  { %756 = vmatpush.bf16.msra.mxu1 %v1065_v40  ;;  %v1025_v40 = vor.u32 %v1252_v30, %v1022_v32 }
  0x4e   :  { %769 = vmatpush.bf16.msra.mxu2 %v1129_v41  ;;  %v1089_v41 = vor.u32 %v1268_v33, %v1086_v34 }
  0x4f   :  { %782 = vmatpush.bf16.msra.mxu3 %v1193_v45  ;;  %v1153_v45 = vor.u32 %v1284_v36, %v1150_v37 }
  0x50   :  { %744 = vmatpush.bf16.msra.mxu0 %v993_v51  ;;  %v953_v51 = vor.u32 %v1234_v42, %v950_v43 }
  0x51   :  { %757 = vmatpush.bf16.msra.mxu1 %v1057_v52  ;;  %v1017_v52 = vor.u32 %v1250_v44, %v1014_v46 }
  0x52   :  { %770 = vmatpush.bf16.msra.mxu2 %v1121_v53  ;;  %v1081_v53 = vor.u32 %v1266_v47, %v1078_v48 }
  0x53   :  { %783 = vmatpush.bf16.msra.mxu3 %v1185_v57 }
  0x54   :  { %745 = vmatpush.bf16.msra.mxu0 %v985_v61 }
  0x55   :  { %758 = vmatpush.bf16.msra.mxu1 %v1049_v62 }
  0x56   :  { %771 = vmatpush.bf16.msra.mxu2 %v1113_v63 }
  0x57   :  { %784 = vmatpush.bf16.msra.mxu3 %v1177_v3 }
  0x58   :  { %746 = vmatpush.bf16.msra.mxu0 %v977_v11  ;;  %v803_v11 = vld [vmem:[%s1394_s2] sm:$0x3] }
  0x59   :  { %759 = vmatpush.bf16.msra.mxu1 %v1041_v12  ;;  %v805_v16 = vperm.slane %v803_v11, 0  ;;  %v806_v20 = vperm.slane %v803_v11, 1 }
  0x5a   :  { %772 = vmatpush.bf16.msra.mxu2 %v1105_v13 }
  0x5b   :  { %785 = vmatpush.bf16.msra.mxu3 %v1169_v18 }
  0x5c   :  { %747 = vmatpush.bf16.msra.mxu0 %v969_v25 }
  0x5d   :  { %760 = vmatpush.bf16.msra.mxu1 %v1033_v26 }
  0x5e   :  { %773 = vmatpush.bf16.msra.mxu2 %v1097_v27 }
  0x5f   :  { %786 = vmatpush.bf16.msra.mxu3 %v1161_v31 }
  0x60   :  { %748 = vmatpush.bf16.msra.mxu0 %v961_v38 }
  0x61   :  { %761 = vmatpush.bf16.msra.mxu1 %v1025_v40 }
  0x62   :  { %774 = vmatpush.bf16.msra.mxu2 %v1089_v41 }
  0x63   :  { %787 = vmatpush.bf16.msra.mxu3 %v1153_v45 }
  0x64   :  { %749 = vmatpush.bf16.msra.mxu0 %v953_v51 }
  0x65   :  { %762 = vmatpush.bf16.msra.mxu1 %v1017_v52 }
  0x66   :  { %775 = vmatpush.bf16.msra.mxu2 %v1081_v53 }
  0x67   :  { %788 = vmatpush.bf16.msra.mxu3 %v1145_v54  ;;  %750 = vmatmul.bf16.vlgmr.msra.gmra.mxu0 %v1363_v14 }
  0x68   :  { %763 = vmatmul.bf16.vlgmr.msra.gmra.mxu1 %v1366_v19 }
  0x69   :  { %776 = vmatmul.bf16.vlgmr.msra.gmra.mxu2 %v1374_v35 }
  0x6a   :  { %789 = vmatmul.bf16.vlgmr.msra.gmra.mxu3 %v1376_v39 }
  0xa4   :  { %v647_v55 = vpop.f32.mrf.mxu0 }
  0xa5   :  { %v660_v56 = vpop.f32.mrf.mxu1 }
  0xa6   :  { %v661_v3 = vadd.f32 %v660_v56, %v647_v55 }
  0xac   :  { %v673_v57 = vpop.f32.mrf.mxu2  ;;  %v649_v59 = vpop.f32.mrf.mxu0 }
  0xad   :  { %v686_v58 = vpop.f32.mrf.mxu3  ;;  %v662_v7 = vpop.f32.mrf.mxu1  ;;  %v674_v35 = vadd.f32 %v673_v57, %v661_v3 }
  0xaf   :  { %v687_v4 = vadd.f32 %v686_v58, %v674_v35 }
  0xb4   :  { %v675_v60 = vpop.f32.mrf.mxu2 }
  0xb5   :  { %v688_v8 = vpop.f32.mrf.mxu3 }
  0xc4   :  { %v699_v61 = vpop.f32.mrf.mxu0 }
  0xc5   :  { %v712_v62 = vpop.f32.mrf.mxu1  ;;  %v700_v10 = vadd.f32 %v699_v61, %v687_v4 }
  0xc7   :  { %v713_v15 = vadd.f32 %v712_v62, %v700_v10 }
  0xc9   :  { %v809_v24 = vadd.f32 %v805_v16, %v713_v15 }
  0xcc   :  { %v725_v63 = vpop.f32.mrf.mxu2  ;;  %v701_v1 = vpop.f32.mrf.mxu0 }
  0xcd   :  { %v738_v0 = vpop.f32.mrf.mxu3  ;;  %v714_v14 = vpop.f32.mrf.mxu1 }
  0xce   :  { %v739_v39 = vadd.f32 %v738_v0, %v725_v63 }
  0xd4   :  { %v727_v2 = vpop.f32.mrf.mxu2 }
  0xd5   :  { %v740_v19 = vpop.f32.mrf.mxu3 }
  0xe4   :  { %v751_v5 = vpop.f32.mrf.mxu0 }
  0xe5   :  { %v764_v6 = vpop.f32.mrf.mxu1  ;;  %v752_v9 = vadd.f32 %v751_v5, %v739_v39 }
  0xe7   :  { %v765_v12 = vadd.f32 %v764_v6, %v752_v9 }
  0xec   :  { %v777_v13 = vpop.f32.mrf.mxu2  ;;  %v753_v21 = vpop.f32.mrf.mxu0 }
  0xed   :  { %v778_v17 = vadd.f32 %v777_v13, %v765_v12  ;;  %v790_v18 = vpop.f32.mrf.mxu3  ;;  %v766_v22 = vpop.f32.mrf.mxu1 }
  0xef   :  { %v791_v23 = vadd.f32 %v790_v18, %v778_v17 }
  0xf1   :  { %v810_v25 = vadd.f32 %v806_v20, %v791_v23 }
  0xf3   :  { %v811_v26 = vpack.c.bf16 %v810_v25, %v809_v24 }
  0xf4   :  { %v779_v27 = vpop.f32.mrf.mxu2 }
  0xf5   :  { %812 = vst [vmem:[%s1395_s3] sm:$0xff] %v811_v26  ;;  %v792_v28 = vpop.f32.mrf.mxu3 }
  0xf6   :  { %817 = vsyncpa [#allocation4], 1 }

// kernel: _lambda_.18
= control target key start
LH: loop header
LB: loop body
LE: loop exit
PB: predicated region body
PF: predicated region fallthrough
CT: control target
= control target key end

     0   :  { %8 = vsyncpa [#allocation4], 0  ;;  %s1560_s0 = inlined_call_operand.vmem [shape: bf16[16,256], index: 0, kind: input, shape index: {}]   ;;  %s1561_s1 = inlined_call_operand.hbm [shape: bf16[256,768], index: 1, kind: input, shape index: {}]   ;;  %s1562_s2 = inlined_call_operand.vmem [shape: f32[1,768], index: 2, kind: input, shape index: {}]   ;;  %s1563_s3 = inlined_call_operand.vmem [shape: bf16[16,768], index: 3, kind: output, shape index: {}]  }
   0x1   :  { %10 = vsyncpa [#allocation4 + $0x1], 0  ;;  %s1343_s12 = smov 0   ;;  %s1345_s13 = smov 0  }
   0x2   :  { %s1347_s14 = smov 0   ;;  %s1349_s15 = smov 0  }
   0x3   :  { %s1351_s16 = smov 0   ;;  %s1353_s17 = smov 0  }
   0x4 LB: > { %s911_s18 = sadd.s32 4294967295, %s1318_s17   ;;  %s31_s19 = sadd.s32 1, %s1314_s16  ;;  %s1318_s17 = sphi %s1353_s17, %s16_s17   ;;  %s1314_s16 = sphi %s1351_s16, %s1571_s16   ;;  %s1310_s15 = sphi %s1349_s15, %s1570_s15   ;;  %s1306_s14 = sphi %s1347_s14, %s1569_s14   ;;  %s1302_s13 = sphi %s1345_s13, %s1568_s13   ;;  %s1298_s12 = sphi %s1343_s12, %s1567_s12  }
   0x5   : > { %p33_p0 = scmp.ge.s32.totalorder %s31_s19, 2  ;;  %s72_s20 = sadd.s32 1, %s1306_s14 }
   0x6   : > { %p79_p1 = scmp.ne.s32.totalorder %s1306_s14, %s1302_s13  ;;  %p80_p2 = scmp.eq.s32.totalorder %s1318_s17, 0 }
   0x7   : > { %s1573_s19 = smov (%p33_p0, %s31_s19), 0  ;;  %p85_p4 = scmp.ne.s32.totalorder %s1302_s13, %s1298_s12 }
   0x8   : > { %p1379_p3 = por %p80_p2, %p79_p1  ;;  %s68_s22 = ssub.s32 %s1314_s16, %s1573_s19 }
   0x9   : > { %p86_p5 = scmp.eq.s32.totalorder %s911_s18, 0  ;;  %p70_p6 = scmp.eq.s32.totalorder %s68_s22, 0 }
   0xa   : > { %p137_p7 = scmp.eq.s32.totalorder %s911_s18, 1  ;;  %p1186_p10 = scmp.lt.s32.totalorder %s1318_s17, 2 }
   0xb   : > { %p1386_p8 = por %p86_p5, %p85_p4  ;;  %s178_s26 = sand.u32 1, %s1306_s14  }
   0xc   : > { %s1391_s24 = scalar_select %p70_p6, %s1306_s14, %s72_s20  }
   0xd   : > { %p1393_p9 = por %p137_p7, %p79_p1  ;;  %s1125_s27 = smul.u32 12, %s1314_s16 }
   0xe   : > { %s1177_s28 = smul.u32 384, %s178_s26  ;;  %p1183_p11 = pnand %p1186_p10, %p1379_p3 }
   0xf   : > { %s190_s4 = scalar_lea.hbm %s1561_s1, %s1125_s27  ;;  %p917_p12 = scmp.ge.s32.totalorder %s1318_s17, 1 }
  0x10   : > { %s191_s5 = sshll.u32 %s190_s4, 4  ;;  %s182_s6 = scalar_lea.vmem [#allocation3], %s1177_s28  ;;  %s192_s5 = int_to_ptr.hbm [resolvable:$true] %s191_s5 }
  0x11   : > { %s193_s7 = sshll.u32 %s182_s6, 4  ;;  %s179_s8 = scalar_lea.sflag [#allocation4], %s178_s26  ;;  %s194_s7 = int_to_ptr.vmem [resolvable:$true] %s193_s7 }
  0x12   : > { %s1320_s9 = smov 384   ;;  %s1321_s10 = smov 192  }
  0x13   : > { %s1322_s11 = smov 12   ;;  %p209_p13 = scmp.lt.s32.totalorder %s1318_s17, 3 }
  0x14   : > { %1185 = dma.hbm_to_vmem [thread:$0]  (!%p1183_p11), %s192_s5, 6144, %s194_s7, %s179_s8, %s1320_s9, %s1321_s10, %s1322_s11  }
  0x15   : > { %p210_p0 = pnand %p917_p12, %p209_p13 }
  0x16   : > { %s1408_s12 = sand.u32 (!%p210_p0), 1, %s1302_s13  }
  0x17   : > { %213 = sbr.rel (%p210_p0) target bundleno = 245 (0xf5), region = 32  ;;  %s216_s20 = scalar_lea.sflag (!%p210_p0), [#allocation4], %s1408_s12 }
  0x18   : > { %s1178_s18 = smul.u32 (!%p210_p0), 384, %s1408_s12 }
  0x1a   : > { %s1412_s21 = scalar_lea.vmem (!%p210_p0), [#allocation3], %s1178_s18 }
  0x1c   : > { %1293 = dma.done.wait (%p1386_p8), %s216_s20, 6144  }
  0x1d   : > { %1295 = vsyncadd (%p1386_p8), %s216_s20, 4294961152  ;;  %v1012_v0 = vld [vmem:[%s1412_s21 + $0xa8] sm:$0xf]  ;;  %v1150_v1 = vld [vmem:[%s1412_s21 + $0xb0] sm:$0xf0]  ;;  %s270_s5 = smul.u32 3, %s1310_s15 }
  0x1e   : > { %v1108_v2 = vld [vmem:[%s1412_s21 + $0x168] sm:$0xf]  ;;  %v1013_v3 = vor.u32 %v1150_v1, %v1012_v0  ;;  %v1174_v4 = vld [vmem:[%s1412_s21 + $0x170] sm:$0xf0]  ;;  %v1149_v5 = vld [vmem:[%s1412_s21 + $0xac] sm:$0xf] }
  0x1f   : > { %v1014_v6 = vld [vmem:[%s1412_s21 + $0xb4] sm:$0xf0]  ;;  %v1109_v7 = vor.u32 %v1174_v4, %v1108_v2  ;;  %v1173_v9 = vld [vmem:[%s1412_s21 + $0x16c] sm:$0xf]  ;;  %v1000_v11 = vld [vmem:[%s1412_s21 + $0x90] sm:$0xf] }
  0x20   : > { %v1017_v8 = vor.u32 %v1149_v5, %v1014_v6  ;;  %v1110_v10 = vld [vmem:[%s1412_s21 + $0x174] sm:$0xf0]  ;;  %625 = vmatpush.bf16.msra.mxu0 %v1013_v3  ;;  %v1147_v13 = vld [vmem:[%s1412_s21 + $0x98] sm:$0xf0]  ;;  %v1096_v14 = vld [vmem:[%s1412_s21 + $0x150] sm:$0xf] }
  0x21   : > { %v1113_v12 = vor.u32 %v1173_v9, %v1110_v10  ;;  %v1171_v15 = vld [vmem:[%s1412_s21 + $0x158] sm:$0xf0]  ;;  %639 = vmatpush.bf16.msra.mxu1 %v1109_v7  ;;  %v1001_v16 = vor.u32 %v1147_v13, %v1000_v11  ;;  %v1146_v18 = vld [vmem:[%s1412_s21 + $0x94] sm:$0xf]  ;;  %v1002_v19 = vld [vmem:[%s1412_s21 + $0x9c] sm:$0xf0] }
  0x22   : > { %653 = vmatpush.bf16.msra.mxu2 %v1017_v8  ;;  %v1097_v17 = vor.u32 %v1171_v15, %v1096_v14  ;;  %v1170_v20 = vld [vmem:[%s1412_s21 + $0x154] sm:$0xf]  ;;  %v1005_v21 = vor.u32 %v1146_v18, %v1002_v19  ;;  %v1098_v22 = vld [vmem:[%s1412_s21 + $0x15c] sm:$0xf0]  ;;  %v988_v23 = vld [vmem:[%s1412_s21 + $0x78] sm:$0xf] }
  0x23   : > { %667 = vmatpush.bf16.msra.mxu3 %v1113_v12  ;;  %v1144_v24 = vld [vmem:[%s1412_s21 + $0x80] sm:$0xf0]  ;;  %v1101_v25 = vor.u32 %v1170_v20, %v1098_v22  ;;  %v1084_v26 = vld [vmem:[%s1412_s21 + $0x138] sm:$0xf]  ;;  %v1143_v28 = vld [vmem:[%s1412_s21 + $0x7c] sm:$0xf] }
  0x24   : > { %v1168_v27 = vld [vmem:[%s1412_s21 + $0x140] sm:$0xf0]  ;;  %626 = vmatpush.bf16.msra.mxu0 %v1001_v16  ;;  %v989_v29 = vor.u32 %v1144_v24, %v988_v23  ;;  %v990_v30 = vld [vmem:[%s1412_s21 + $0x84] sm:$0xf0]  ;;  %v1167_v31 = vld [vmem:[%s1412_s21 + $0x13c] sm:$0xf] }
  0x25   : > { %v1086_v32 = vld [vmem:[%s1412_s21 + $0x144] sm:$0xf0]  ;;  %640 = vmatpush.bf16.msra.mxu1 %v1097_v17  ;;  %v1085_v33 = vor.u32 %v1168_v27, %v1084_v26  ;;  %v993_v34 = vor.u32 %v1143_v28, %v990_v30  ;;  %v976_v35 = vld [vmem:[%s1412_s21 + $0x60] sm:$0xf]  ;;  %v1141_v36 = vld [vmem:[%s1412_s21 + $0x68] sm:$0xf0] }
  0x26   : > { %654 = vmatpush.bf16.msra.mxu2 %v1005_v21  ;;  %v1072_v37 = vld [vmem:[%s1412_s21 + $0x120] sm:$0xf]  ;;  %v1089_v38 = vor.u32 %v1167_v31, %v1086_v32  ;;  %v1165_v39 = vld [vmem:[%s1412_s21 + $0x128] sm:$0xf0]  ;;  %v1140_v40 = vld [vmem:[%s1412_s21 + $0x64] sm:$0xf]  ;;  %v977_v44 = vor.u32 %v1141_v36, %v976_v35 }
  0x27   : > { %668 = vmatpush.bf16.msra.mxu3 %v1101_v25  ;;  %v978_v41 = vld [vmem:[%s1412_s21 + $0x6c] sm:$0xf0]  ;;  %v1164_v42 = vld [vmem:[%s1412_s21 + $0x124] sm:$0xf]  ;;  %v1073_v45 = vor.u32 %v1165_v39, %v1072_v37  ;;  %v964_v47 = vld [vmem:[%s1412_s21 + $0x48] sm:$0xf] }
  0x28   : > { %v1074_v43 = vld [vmem:[%s1412_s21 + $0x12c] sm:$0xf0]  ;;  %627 = vmatpush.bf16.msra.mxu0 %v989_v29  ;;  %v981_v46 = vor.u32 %v1140_v40, %v978_v41  ;;  %v1138_v48 = vld [vmem:[%s1412_s21 + $0x50] sm:$0xf0]  ;;  %v1060_v49 = vld [vmem:[%s1412_s21 + $0x108] sm:$0xf] }
  0x29   : > { %641 = vmatpush.bf16.msra.mxu1 %v1085_v33  ;;  %v1077_v50 = vor.u32 %v1164_v42, %v1074_v43  ;;  %v1162_v51 = vld [vmem:[%s1412_s21 + $0x110] sm:$0xf0]  ;;  %v1137_v52 = vld [vmem:[%s1412_s21 + $0x4c] sm:$0xf]  ;;  %v966_v53 = vld [vmem:[%s1412_s21 + $0x54] sm:$0xf0]  ;;  %v965_v56 = vor.u32 %v1138_v48, %v964_v47 }
  0x2a   : > { %655 = vmatpush.bf16.msra.mxu2 %v993_v34  ;;  %v1161_v54 = vld [vmem:[%s1412_s21 + $0x10c] sm:$0xf]  ;;  %v1062_v55 = vld [vmem:[%s1412_s21 + $0x114] sm:$0xf0]  ;;  %v1061_v57 = vor.u32 %v1162_v51, %v1060_v49  ;;  %v969_v58 = vor.u32 %v1137_v52, %v966_v53  ;;  %v952_v59 = vld [vmem:[%s1412_s21 + $0x30] sm:$0xf] }
  0x2b   : > { %669 = vmatpush.bf16.msra.mxu3 %v1089_v38  ;;  %v1135_v60 = vld [vmem:[%s1412_s21 + $0x38] sm:$0xf0]  ;;  %v1048_v61 = vld [vmem:[%s1412_s21 + $0xf0] sm:$0xf]  ;;  %v1065_v62 = vor.u32 %v1161_v54, %v1062_v55  ;;  %v1134_v0 = vld [vmem:[%s1412_s21 + $0x34] sm:$0xf] }
  0x2c   : > { %628 = vmatpush.bf16.msra.mxu0 %v977_v44  ;;  %v1159_v63 = vld [vmem:[%s1412_s21 + $0xf8] sm:$0xf0]  ;;  %v954_v1 = vld [vmem:[%s1412_s21 + $0x3c] sm:$0xf0]  ;;  %v1158_v2 = vld [vmem:[%s1412_s21 + $0xf4] sm:$0xf]  ;;  %v953_v4 = vor.u32 %v1135_v60, %v952_v59 }
  0x2d   : > { %642 = vmatpush.bf16.msra.mxu1 %v1073_v45  ;;  %v1050_v3 = vld [vmem:[%s1412_s21 + $0xfc] sm:$0xf0]  ;;  %v1049_v5 = vor.u32 %v1159_v63, %v1048_v61  ;;  %v957_v6 = vor.u32 %v1134_v0, %v954_v1  ;;  %v940_v7 = vld [vmem:[%s1412_s21 + $0x18] sm:$0xf]  ;;  %v1132_v8 = vld [vmem:[%s1412_s21 + $0x20] sm:$0xf0] }
  0x2e   : > { %656 = vmatpush.bf16.msra.mxu2 %v981_v46  ;;  %v1036_v9 = vld [vmem:[%s1412_s21 + $0xd8] sm:$0xf]  ;;  %v1053_v10 = vor.u32 %v1158_v2, %v1050_v3  ;;  %v1156_v11 = vld [vmem:[%s1412_s21 + $0xe0] sm:$0xf0]  ;;  %v1131_v12 = vld [vmem:[%s1412_s21 + $0x1c] sm:$0xf]  ;;  %v941_v16 = vor.u32 %v1132_v8, %v940_v7 }
  0x2f   : > { %670 = vmatpush.bf16.msra.mxu3 %v1077_v50  ;;  %v942_v13 = vld [vmem:[%s1412_s21 + $0x24] sm:$0xf0]  ;;  %v1155_v14 = vld [vmem:[%s1412_s21 + $0xdc] sm:$0xf]  ;;  %v928_v17 = vld [vmem:[%s1412_s21] sm:$0xf]  ;;  %v1037_v18 = vor.u32 %v1156_v11, %v1036_v9 }
  0x30   : > { %629 = vmatpush.bf16.msra.mxu0 %v965_v56  ;;  %v1038_v15 = vld [vmem:[%s1412_s21 + $0xe4] sm:$0xf0]  ;;  %v945_v19 = vor.u32 %v1131_v12, %v942_v13  ;;  %v1129_v20 = vld [vmem:[%s1412_s21 + $0x8] sm:$0xf0]  ;;  %v1024_v21 = vld [vmem:[%s1412_s21 + $0xc0] sm:$0xf] }
  0x31   : > { %643 = vmatpush.bf16.msra.mxu1 %v1061_v57  ;;  %v1153_v22 = vld [vmem:[%s1412_s21 + $0xc8] sm:$0xf0]  ;;  %v1041_v23 = vor.u32 %v1155_v14, %v1038_v15  ;;  %v1128_v24 = vld [vmem:[%s1412_s21 + $0x4] sm:$0xf]  ;;  %v930_v25 = vld [vmem:[%s1412_s21 + $0xc] sm:$0xf0]  ;;  %v929_v30 = vor.u32 %v1129_v20, %v928_v17 }
  0x32   : > { %657 = vmatpush.bf16.msra.mxu2 %v969_v58  ;;  %v1152_v26 = vld [vmem:[%s1412_s21 + $0xc4] sm:$0xf]  ;;  %v1026_v27 = vld [vmem:[%s1412_s21 + $0xcc] sm:$0xf0]  ;;  %v1151_v29 = vld [vmem:[%s1412_s21 + $0xb8] sm:$0xf0]  ;;  %v1025_v33 = vor.u32 %v1153_v22, %v1024_v21  ;;  %v933_v34 = vor.u32 %v1128_v24, %v930_v25 }
  0x33   : > { %671 = vmatpush.bf16.msra.mxu3 %v1065_v62  ;;  %v1020_v28 = vld [vmem:[%s1412_s21 + $0xb0] sm:$0xf]  ;;  %v1175_v32 = vld [vmem:[%s1412_s21 + $0x178] sm:$0xf0]  ;;  %v920_v35 = vld [vmem:[%s1560_s0] sm:$0xf]  ;;  %v1029_v37 = vor.u32 %v1152_v26, %v1026_v27 }
  0x34   : > { %630 = vmatpush.bf16.msra.mxu0 %v953_v4  ;;  %v1116_v31 = vld [vmem:[%s1412_s21 + $0x170] sm:$0xf]  ;;  %v1127_v36 = vld [vmem:[%s1560_s0 + $0x4] sm:$0xf0]  ;;  %v1021_v38 = vor.u32 %v1151_v29, %v1020_v28  ;;  %v1126_v39 = vld [vmem:[%s1560_s0 + $0x4] sm:$0xf] }
  0x35   : > { %644 = vmatpush.bf16.msra.mxu1 %v1049_v5  ;;  %v922_v40 = vld [vmem:[%s1560_s0 + $0x8] sm:$0xf0]  ;;  %v1117_v41 = vor.u32 %v1175_v32, %v1116_v31  ;;  %v1008_v42 = vld [vmem:[%s1412_s21 + $0x98] sm:$0xf]  ;;  %v1148_v43 = vld [vmem:[%s1412_s21 + $0xa0] sm:$0xf0]  ;;  %v1500_v44 = vor.u32 %v1127_v36, %v920_v35 }
  0x36   : > { %658 = vmatpush.bf16.msra.mxu2 %v957_v6  ;;  %v1104_v45 = vld [vmem:[%s1412_s21 + $0x158] sm:$0xf]  ;;  %v1172_v46 = vld [vmem:[%s1412_s21 + $0x160] sm:$0xf0]  ;;  %v925_v47 = vor.u32 %v1126_v39, %v922_v40  ;;  %v1009_v48 = vor.u32 %v1148_v43, %v1008_v42  ;;  %v996_v50 = vld [vmem:[%s1412_s21 + $0x80] sm:$0xf] }
  0x37   : > { %672 = vmatpush.bf16.msra.mxu3 %v1053_v10  ;;  %v1105_v49 = vor.u32 %v1172_v46, %v1104_v45  ;;  %v1145_v51 = vld [vmem:[%s1412_s21 + $0x88] sm:$0xf0]  ;;  %v1092_v52 = vld [vmem:[%s1412_s21 + $0x140] sm:$0xf]  ;;  %v984_v56 = vld [vmem:[%s1412_s21 + $0x68] sm:$0xf] }
  0x38   : > { %631 = vmatpush.bf16.msra.mxu0 %v941_v16  ;;  %v1169_v53 = vld [vmem:[%s1412_s21 + $0x148] sm:$0xf0]  ;;  %v997_v54 = vor.u32 %v1145_v51, %v996_v50  ;;  %v1142_v57 = vld [vmem:[%s1412_s21 + $0x70] sm:$0xf0]  ;;  %v1080_v58 = vld [vmem:[%s1412_s21 + $0x128] sm:$0xf] }
  0x39   : > { %645 = vmatpush.bf16.msra.mxu1 %v1037_v18  ;;  %v1093_v55 = vor.u32 %v1169_v53, %v1092_v52  ;;  %v1166_v59 = vld [vmem:[%s1412_s21 + $0x130] sm:$0xf0]  ;;  %v985_v60 = vor.u32 %v1142_v57, %v984_v56  ;;  %v972_v62 = vld [vmem:[%s1412_s21 + $0x50] sm:$0xf]  ;;  %v1139_v63 = vld [vmem:[%s1412_s21 + $0x58] sm:$0xf0] }
  0x3a   : > { %659 = vmatpush.bf16.msra.mxu2 %v945_v19  ;;  %v1081_v61 = vor.u32 %v1166_v59, %v1080_v58  ;;  %v1068_v0 = vld [vmem:[%s1412_s21 + $0x110] sm:$0xf]  ;;  %v1163_v1 = vld [vmem:[%s1412_s21 + $0x118] sm:$0xf0]  ;;  %v973_v2 = vor.u32 %v1139_v63, %v972_v62  ;;  %v960_v4 = vld [vmem:[%s1412_s21 + $0x38] sm:$0xf] }
  0x3b   : > { %673 = vmatpush.bf16.msra.mxu3 %v1041_v23  ;;  %v1069_v3 = vor.u32 %v1163_v1, %v1068_v0  ;;  %v1136_v5 = vld [vmem:[%s1412_s21 + $0x40] sm:$0xf0]  ;;  %v1056_v6 = vld [vmem:[%s1412_s21 + $0xf8] sm:$0xf]  ;;  %v948_v10 = vld [vmem:[%s1412_s21 + $0x20] sm:$0xf] }
  0x3c   : > { %632 = vmatpush.bf16.msra.mxu0 %v929_v30  ;;  %v1160_v7 = vld [vmem:[%s1412_s21 + $0x100] sm:$0xf0]  ;;  %v961_v8 = vor.u32 %v1136_v5, %v960_v4  ;;  %v1133_v11 = vld [vmem:[%s1412_s21 + $0x28] sm:$0xf0]  ;;  %v1044_v12 = vld [vmem:[%s1412_s21 + $0xe0] sm:$0xf] }
  0x3d   : > { %646 = vmatpush.bf16.msra.mxu1 %v1025_v33  ;;  %v1057_v9 = vor.u32 %v1160_v7, %v1056_v6  ;;  %v1157_v13 = vld [vmem:[%s1412_s21 + $0xe8] sm:$0xf0]  ;;  %v949_v14 = vor.u32 %v1133_v11, %v948_v10  ;;  %v936_v16 = vld [vmem:[%s1412_s21 + $0x8] sm:$0xf]  ;;  %v1130_v17 = vld [vmem:[%s1412_s21 + $0x10] sm:$0xf0] }
  0x3e   : > { %660 = vmatpush.bf16.msra.mxu2 %v933_v34  ;;  %v1045_v15 = vor.u32 %v1157_v13, %v1044_v12  ;;  %v1032_v18 = vld [vmem:[%s1412_s21 + $0xc8] sm:$0xf]  ;;  %v1154_v19 = vld [vmem:[%s1412_s21 + $0xd0] sm:$0xf0]  ;;  %v937_v20 = vor.u32 %v1130_v17, %v936_v16  ;;  %p271_p1 = scmp.lt.s32.totalorder %s270_s5, 5  ;;  %s1179_s9 = smul.u32 24, %s1408_s12 }
  0x3f   : > { %674 = vmatpush.bf16.msra.mxu3 %v1029_v37  ;;  %633 = vmatmul.bf16.vlgmr.msra.gmra.mxu0 %v1500_v44  ;;  %v1033_v21 = vor.u32 %v1154_v19, %v1032_v18  ;;  %s1176_s11 = smul.u32 (%p1393_p9), 12, %s1310_s15 }
  0x40   : > { %681 = vmatpush.bf16.msrb.mxu0 %v1021_v38  ;;  %647 = vmatmul.bf16.vlgmr.msra.gmra.mxu1 %v925_v47  ;;  %s1575_s5 = smov (!%p271_p1, %s270_s5), 5  ;;  %s255_s10 = scalar_lea.vmem [#allocation5], %s1179_s9 }
  0x41   : > { %695 = vmatpush.bf16.msrb.mxu1 %v1117_v41  ;;  %661 = vmatmul.bf16.vlgmr.msra.gmra.mxu2 %v1500_v44  ;;  %s273_s8 = scalar_lea.vmem %s1562_s2, %s1575_s5  ;;  %s764_s20 = scalar_lea.vmem (%p1393_p9), %s1563_s3, %s1176_s11 }
  0x42   : > { %675 = vmatmul.bf16.vlgmr.msra.gmra.mxu3 %v925_v47  ;;  %v730_v24 = vld [vmem:[%s273_s8] sm:$0x7] }
  0x43   : > { %v732_v26 = vperm.slane %v730_v24, 0  ;;  %v733_v28 = vperm.slane %v730_v24, 1 }
  0x44   : > { %682 = vmatpush.bf16.msrb.mxu0 %v1009_v48 }
  0x45   : > { %696 = vmatpush.bf16.msrb.mxu1 %v1105_v49 }
  0x48   : > { %683 = vmatpush.bf16.msrb.mxu0 %v997_v54 }
  0x49   : > { %697 = vmatpush.bf16.msrb.mxu1 %v1093_v55 }
  0x4c   : > { %684 = vmatpush.bf16.msrb.mxu0 %v985_v60 }
  0x4d   : > { %698 = vmatpush.bf16.msrb.mxu1 %v1081_v61 }
  0x50   : > { %685 = vmatpush.bf16.msrb.mxu0 %v973_v2 }
  0x51   : > { %699 = vmatpush.bf16.msrb.mxu1 %v1069_v3 }
  0x54   : > { %686 = vmatpush.bf16.msrb.mxu0 %v961_v8 }
  0x55   : > { %700 = vmatpush.bf16.msrb.mxu1 %v1057_v9 }
  0x58   : > { %687 = vmatpush.bf16.msrb.mxu0 %v949_v14 }
  0x59   : > { %701 = vmatpush.bf16.msrb.mxu1 %v1045_v15 }
  0x5c   : > { %688 = vmatpush.bf16.msrb.mxu0 %v937_v20 }
  0x5d   : > { %702 = vmatpush.bf16.msrb.mxu1 %v1033_v21 }
  0x5f   : > { %689 = vmatmul.bf16.vlgmr.msrb.gmra.mxu0 %v1500_v44  ;;  %v734_v44 = vperm.slane %v730_v24, 2 }
  0x60   : > { %703 = vmatmul.bf16.vlgmr.msrb.gmra.mxu1 %v925_v47 }
  0xbc   : > { %v634_v22 = vpop.f32.mrf.mxu0 }
  0xbd   : > { %v648_v23 = vpop.f32.mrf.mxu1 }
  0xbe   : > { %v649_v25 = vadd.f32 %v648_v23, %v634_v22 }
  0xc0   : > { %v738_v30 = vadd.f32 %v732_v26, %v649_v25 }
  0xc4   : > { %v662_v27 = vpop.f32.mrf.mxu2  ;;  %v636_v32 = vpop.f32.mrf.mxu0 }
  0xc5   : > { %v676_v29 = vpop.f32.mrf.mxu3  ;;  %v650_v33 = vpop.f32.mrf.mxu1 }
  0xc6   : > { %v677_v31 = vadd.f32 %v676_v29, %v662_v27  ;;  %v651_v36 = vadd.f32 %v650_v33, %v636_v32 }
  0xc8   : > { %v739_v34 = vadd.f32 %v733_v28, %v677_v31  ;;  %v741_v39 = vadd.f32 %v732_v26, %v651_v36 }
  0xca   : > { %v744_v35 = vpack.c.bf16 %v739_v34, %v738_v30 }
  0xcc   : > { %748 = vst [vmem:[%s255_s10] sm:$0xff] %v744_v35  ;;  %v664_v37 = vpop.f32.mrf.mxu2 }
  0xcd   : > { %v678_v38 = vpop.f32.mrf.mxu3 }
  0xce   : > { %v679_v40 = vadd.f32 %v678_v38, %v664_v37 }
  0xd0   : > { %v742_v41 = vadd.f32 %v733_v28, %v679_v40 }
  0xd2   : > { %v746_v42 = vpack.c.bf16 %v742_v41, %v741_v39 }
  0xd3   : > { %v779_v54 = vld [vmem:[%s255_s10] sm:$0xff] (%p1393_p9) }
  0xd4   : > { %750 = vst [vmem:[%s255_s10 + $0xc] sm:$0xff] %v746_v42 }
  0xd5   : > { %780 = vst [vmem:[%s764_s20] sm:$0xff] (%p1393_p9), %v779_v54 }
  0xdb   : > { %v781_v55 = vld [vmem:[%s255_s10 + $0xc] sm:$0xff] (%p1393_p9) }
  0xdc   : > { %v690_v43 = vpop.f32.mrf.mxu0  ;;  %782 = vst [vmem:[%s764_s20 + $0x18] sm:$0xff] (%p1393_p9), %v781_v55 }
  0xdd   : > { %v704_v45 = vpop.f32.mrf.mxu1 }
  0xde   : > { %v705_v46 = vadd.f32 %v704_v45, %v690_v43 }
  0xe0   : > { %v740_v47 = vadd.f32 %v734_v44, %v705_v46 }
  0xe2   : > { %v745_v48 = vpack.c.bf16 %v740_v47, %v740_v47 }
  0xe4   : > { %749 = vst [vmem:[%s255_s10 + $0x8] sm:$0xf] %v745_v48  ;;  %v692_v49 = vpop.f32.mrf.mxu0 }
  0xe5   : > { %v706_v50 = vpop.f32.mrf.mxu1 }
  0xe6   : > { %v707_v51 = vadd.f32 %v706_v50, %v692_v49 }
  0xe8   : > { %v743_v52 = vadd.f32 %v734_v44, %v707_v51  ;;  %758 = sbr.rel (!%p1393_p9) target bundleno = 245 (0xf5), region = 48 }
  0xea   : > { %v747_v53 = vpack.c.bf16 %v743_v52, %v743_v52 }
  0xeb   : > { %v1119_v56 = vld [vmem:[%s255_s10 + $0x8] sm:$0xf] (%p1393_p9) }
  0xec   : > { %751 = vst [vmem:[%s255_s10 + $0x14] sm:$0xf] %v747_v53 }
  0xed   : > { %1120 = vst [vmem:[%s764_s20 + $0x8] sm:$0xf] %v1119_v56 }
  0xf3   : > { %v1121_v57 = vld [vmem:[%s255_s10 + $0x14] sm:$0xf] }
  0xf4   : > { %1122 = vst [vmem:[%s764_s20 + $0x20] sm:$0xf] %v1121_v57 }
  0xf5 PF: > { %s16_s17 = sadd.s32 1, %s1318_s17   ;;  %s1567_s12 = smov %s1302_s13 }
  0xf6   : > { %p13_p2 = scmp.ge.s32.totalorder %s16_s17, 4   ;;  %s1568_s13 = smov %s1306_s14 }
  0xf7   : > { %s1569_s14 = smov %s1391_s24  ;;  %s1570_s15 = smov %s1314_s16 }
  0xf8   : > { %s1571_s16 = smov %s1573_s19  ;;  %15 = sbr.rel (!%p13_p2) target bundleno = 4 (0x4), region = 118 }
  0xfd   :  { %810 = vsyncpa [#allocation4], 1 }
  0xfe   :  { %812 = vsyncpa [#allocation4 + $0x1], 1 }

// kernel: _lambda_.20
= control target key start
LH: loop header
LB: loop body
LE: loop exit
PB: predicated region body
PF: predicated region fallthrough
CT: control target
= control target key end

     0   :  { %9 = vsyncpa [#allocation4], 0  ;;  %s548_s18 = smov [#allocation3]   ;;  %s549_s20 = smov 128   ;;  %s606_s0 = inlined_call_operand.vmem [shape: bf16[16,256], index: 0, kind: input, shape index: {}]   ;;  %s607_s1 = inlined_call_operand.hbm [shape: bf16[256,256], index: 1, kind: input, shape index: {}]   ;;  %s608_s2 = inlined_call_operand.vmem [shape: f32[1,256], index: 2, kind: input, shape index: {}]   ;;  %s609_s3 = inlined_call_operand.vmem [shape: bf16[16,256], index: 3, kind: input, shape index: {}]   ;;  %s610_s4 = inlined_call_operand.vmem [shape: bf16[16,256], index: 4, kind: output, shape index: {}]  }
   0x1   :  { %s16_s17 = sshll.u32 %s607_s1, 4  ;;  %s18_s19 = sshll.u32 %s548_s18, 4  ;;  %s17_s17 = int_to_ptr.hbm [resolvable:$true] %s16_s17  ;;  %s19_s19 = int_to_ptr.vmem [resolvable:$true] %s18_s19 }
   0x2   :  { %s550_s21 = smov 8  }
   0x3   :  { %24 = dma.hbm_to_vmem [thread:$0]  %s17_s17, 4096, %s19_s19, [#allocation4], %s549_s20, %s549_s20, %s550_s21  }
   0x4   :  { %546 = dma.done.wait [#allocation4], 4096  }
   0x5   :  { %547 = vsyncadd [#allocation4], 4294963200  ;;  %v415_v0 = vld [vmem:[#allocation3 + $0x70] sm:$0xf]  ;;  %v502_v1 = vld [vmem:[#allocation3 + $0x74] sm:$0xf0] }
   0x6   :  { %v479_v2 = vld [vmem:[#allocation3 + $0xf0] sm:$0xf]  ;;  %v416_v3 = vor.u32 %v502_v1, %v415_v0  ;;  %v518_v4 = vld [vmem:[#allocation3 + $0xf4] sm:$0xf0]  ;;  %v501_v5 = vld [vmem:[#allocation3 + $0x74] sm:$0xf] }
   0x7   :  { %v417_v6 = vld [vmem:[#allocation3 + $0x78] sm:$0xf0]  ;;  %v480_v7 = vor.u32 %v518_v4, %v479_v2  ;;  %v517_v9 = vld [vmem:[#allocation3 + $0xf4] sm:$0xf]  ;;  %v407_v11 = vld [vmem:[#allocation3 + $0x60] sm:$0xf] }
   0x8   :  { %v420_v8 = vor.u32 %v501_v5, %v417_v6  ;;  %v481_v10 = vld [vmem:[#allocation3 + $0xf8] sm:$0xf0]  ;;  %249 = vmatpush.bf16.msra.mxu0 %v416_v3  ;;  %v500_v13 = vld [vmem:[#allocation3 + $0x64] sm:$0xf0]  ;;  %v471_v14 = vld [vmem:[#allocation3 + $0xe0] sm:$0xf] }
   0x9   :  { %v484_v12 = vor.u32 %v517_v9, %v481_v10  ;;  %v516_v15 = vld [vmem:[#allocation3 + $0xe4] sm:$0xf0]  ;;  %263 = vmatpush.bf16.msra.mxu1 %v480_v7  ;;  %v408_v16 = vor.u32 %v500_v13, %v407_v11  ;;  %v499_v18 = vld [vmem:[#allocation3 + $0x64] sm:$0xf]  ;;  %v409_v19 = vld [vmem:[#allocation3 + $0x68] sm:$0xf0] }
   0xa   :  { %277 = vmatpush.bf16.msra.mxu2 %v420_v8  ;;  %v472_v17 = vor.u32 %v516_v15, %v471_v14  ;;  %v515_v20 = vld [vmem:[#allocation3 + $0xe4] sm:$0xf]  ;;  %v412_v21 = vor.u32 %v499_v18, %v409_v19  ;;  %v473_v22 = vld [vmem:[#allocation3 + $0xe8] sm:$0xf0]  ;;  %v399_v23 = vld [vmem:[#allocation3 + $0x50] sm:$0xf] }
   0xb   :  { %291 = vmatpush.bf16.msra.mxu3 %v484_v12  ;;  %v498_v24 = vld [vmem:[#allocation3 + $0x54] sm:$0xf0]  ;;  %v476_v25 = vor.u32 %v515_v20, %v473_v22  ;;  %v463_v26 = vld [vmem:[#allocation3 + $0xd0] sm:$0xf]  ;;  %v497_v28 = vld [vmem:[#allocation3 + $0x54] sm:$0xf] }
   0xc   :  { %v514_v27 = vld [vmem:[#allocation3 + $0xd4] sm:$0xf0]  ;;  %250 = vmatpush.bf16.msra.mxu0 %v408_v16  ;;  %v400_v29 = vor.u32 %v498_v24, %v399_v23  ;;  %v401_v30 = vld [vmem:[#allocation3 + $0x58] sm:$0xf0]  ;;  %v513_v31 = vld [vmem:[#allocation3 + $0xd4] sm:$0xf] }
   0xd   :  { %v465_v32 = vld [vmem:[#allocation3 + $0xd8] sm:$0xf0]  ;;  %264 = vmatpush.bf16.msra.mxu1 %v472_v17  ;;  %v464_v33 = vor.u32 %v514_v27, %v463_v26  ;;  %v404_v34 = vor.u32 %v497_v28, %v401_v30  ;;  %v391_v35 = vld [vmem:[#allocation3 + $0x40] sm:$0xf]  ;;  %v496_v36 = vld [vmem:[#allocation3 + $0x44] sm:$0xf0] }
   0xe   :  { %278 = vmatpush.bf16.msra.mxu2 %v412_v21  ;;  %v455_v37 = vld [vmem:[#allocation3 + $0xc0] sm:$0xf]  ;;  %v468_v38 = vor.u32 %v513_v31, %v465_v32  ;;  %v512_v39 = vld [vmem:[#allocation3 + $0xc4] sm:$0xf0]  ;;  %v495_v40 = vld [vmem:[#allocation3 + $0x44] sm:$0xf]  ;;  %v392_v44 = vor.u32 %v496_v36, %v391_v35 }
   0xf   :  { %292 = vmatpush.bf16.msra.mxu3 %v476_v25  ;;  %v393_v41 = vld [vmem:[#allocation3 + $0x48] sm:$0xf0]  ;;  %v511_v42 = vld [vmem:[#allocation3 + $0xc4] sm:$0xf]  ;;  %v456_v45 = vor.u32 %v512_v39, %v455_v37  ;;  %v383_v47 = vld [vmem:[#allocation3 + $0x30] sm:$0xf] }
  0x10   :  { %v457_v43 = vld [vmem:[#allocation3 + $0xc8] sm:$0xf0]  ;;  %251 = vmatpush.bf16.msra.mxu0 %v400_v29  ;;  %v396_v46 = vor.u32 %v495_v40, %v393_v41  ;;  %v494_v48 = vld [vmem:[#allocation3 + $0x34] sm:$0xf0]  ;;  %v447_v49 = vld [vmem:[#allocation3 + $0xb0] sm:$0xf] }
  0x11   :  { %265 = vmatpush.bf16.msra.mxu1 %v464_v33  ;;  %v460_v50 = vor.u32 %v511_v42, %v457_v43  ;;  %v510_v51 = vld [vmem:[#allocation3 + $0xb4] sm:$0xf0]  ;;  %v493_v52 = vld [vmem:[#allocation3 + $0x34] sm:$0xf]  ;;  %v385_v53 = vld [vmem:[#allocation3 + $0x38] sm:$0xf0]  ;;  %v384_v56 = vor.u32 %v494_v48, %v383_v47 }
  0x12   :  { %279 = vmatpush.bf16.msra.mxu2 %v404_v34  ;;  %v509_v54 = vld [vmem:[#allocation3 + $0xb4] sm:$0xf]  ;;  %v449_v55 = vld [vmem:[#allocation3 + $0xb8] sm:$0xf0]  ;;  %v448_v57 = vor.u32 %v510_v51, %v447_v49  ;;  %v388_v58 = vor.u32 %v493_v52, %v385_v53  ;;  %v375_v59 = vld [vmem:[#allocation3 + $0x20] sm:$0xf] }
  0x13   :  { %293 = vmatpush.bf16.msra.mxu3 %v468_v38  ;;  %v492_v60 = vld [vmem:[#allocation3 + $0x24] sm:$0xf0]  ;;  %v439_v61 = vld [vmem:[#allocation3 + $0xa0] sm:$0xf]  ;;  %v452_v62 = vor.u32 %v509_v54, %v449_v55  ;;  %v491_v0 = vld [vmem:[#allocation3 + $0x24] sm:$0xf] }
  0x14   :  { %252 = vmatpush.bf16.msra.mxu0 %v392_v44  ;;  %v508_v63 = vld [vmem:[#allocation3 + $0xa4] sm:$0xf0]  ;;  %v377_v1 = vld [vmem:[#allocation3 + $0x28] sm:$0xf0]  ;;  %v507_v2 = vld [vmem:[#allocation3 + $0xa4] sm:$0xf]  ;;  %v376_v4 = vor.u32 %v492_v60, %v375_v59 }
  0x15   :  { %266 = vmatpush.bf16.msra.mxu1 %v456_v45  ;;  %v441_v3 = vld [vmem:[#allocation3 + $0xa8] sm:$0xf0]  ;;  %v440_v5 = vor.u32 %v508_v63, %v439_v61  ;;  %v380_v6 = vor.u32 %v491_v0, %v377_v1  ;;  %v367_v7 = vld [vmem:[#allocation3 + $0x10] sm:$0xf]  ;;  %v490_v8 = vld [vmem:[#allocation3 + $0x14] sm:$0xf0] }
  0x16   :  { %280 = vmatpush.bf16.msra.mxu2 %v396_v46  ;;  %v431_v9 = vld [vmem:[#allocation3 + $0x90] sm:$0xf]  ;;  %v444_v10 = vor.u32 %v507_v2, %v441_v3  ;;  %v506_v11 = vld [vmem:[#allocation3 + $0x94] sm:$0xf0]  ;;  %v489_v12 = vld [vmem:[#allocation3 + $0x14] sm:$0xf]  ;;  %v368_v16 = vor.u32 %v490_v8, %v367_v7 }
  0x17   :  { %294 = vmatpush.bf16.msra.mxu3 %v460_v50  ;;  %v369_v13 = vld [vmem:[#allocation3 + $0x18] sm:$0xf0]  ;;  %v505_v14 = vld [vmem:[#allocation3 + $0x94] sm:$0xf]  ;;  %v432_v17 = vor.u32 %v506_v11, %v431_v9  ;;  %v359_v19 = vld [vmem:[#allocation3] sm:$0xf] }
  0x18   :  { %253 = vmatpush.bf16.msra.mxu0 %v384_v56  ;;  %v433_v15 = vld [vmem:[#allocation3 + $0x98] sm:$0xf0]  ;;  %v372_v18 = vor.u32 %v489_v12, %v369_v13  ;;  %v488_v20 = vld [vmem:[#allocation3 + $0x4] sm:$0xf0]  ;;  %v423_v21 = vld [vmem:[#allocation3 + $0x80] sm:$0xf] }
  0x19   :  { %267 = vmatpush.bf16.msra.mxu1 %v448_v57  ;;  %v436_v22 = vor.u32 %v505_v14, %v433_v15  ;;  %v504_v23 = vld [vmem:[#allocation3 + $0x84] sm:$0xf0]  ;;  %v487_v24 = vld [vmem:[#allocation3 + $0x4] sm:$0xf]  ;;  %v361_v25 = vld [vmem:[#allocation3 + $0x8] sm:$0xf0]  ;;  %v360_v28 = vor.u32 %v488_v20, %v359_v19 }
  0x1a   :  { %281 = vmatpush.bf16.msra.mxu2 %v388_v58  ;;  %v503_v26 = vld [vmem:[#allocation3 + $0x84] sm:$0xf]  ;;  %v425_v27 = vld [vmem:[#allocation3 + $0x88] sm:$0xf0]  ;;  %v351_v29 = vld [vmem:[%s606_s0] sm:$0xf]  ;;  %v424_v31 = vor.u32 %v504_v23, %v423_v21  ;;  %v364_v32 = vor.u32 %v487_v24, %v361_v25 }
  0x1b   :  { %295 = vmatpush.bf16.msra.mxu3 %v452_v62  ;;  %v486_v30 = vld [vmem:[%s606_s0 + $0x4] sm:$0xf0]  ;;  %v485_v33 = vld [vmem:[%s606_s0 + $0x4] sm:$0xf]  ;;  %v353_v34 = vld [vmem:[%s606_s0 + $0x8] sm:$0xf0]  ;;  %v428_v35 = vor.u32 %v503_v26, %v425_v27 }
  0x1c   :  { %254 = vmatpush.bf16.msra.mxu0 %v376_v4  ;;  %v352_v36 = vor.u32 %v486_v30, %v351_v29  ;;  %v356_v37 = vor.u32 %v485_v33, %v353_v34  ;;  %v320_v39 = vld [vmem:[%s608_s2] sm:$0x3]  ;;  %v331_v57 = vld [vmem:[%s609_s3 + $0x8] sm:$0xff] }
  0x1d   :  { %268 = vmatpush.bf16.msra.mxu1 %v440_v5  ;;  %v322_v42 = vperm.slane %v320_v39, 0  ;;  %v330_v43 = vld [vmem:[%s609_s3] sm:$0xff]  ;;  %v323_v47 = vperm.slane %v320_v39, 1  ;;  %v334_v62 = vunpack.c.l.bf16 %v331_v57  ;;  %v335_v0 = vunpack.c.h.bf16 %v331_v57 }
  0x1e   :  { %282 = vmatpush.bf16.msra.mxu2 %v380_v6  ;;  %v332_v45 = vunpack.c.l.bf16 %v330_v43  ;;  %v333_v50 = vunpack.c.h.bf16 %v330_v43 }
  0x1f   :  { %296 = vmatpush.bf16.msra.mxu3 %v444_v10 }
  0x20   :  { %255 = vmatpush.bf16.msra.mxu0 %v368_v16 }
  0x21   :  { %269 = vmatpush.bf16.msra.mxu1 %v432_v17 }
  0x22   :  { %283 = vmatpush.bf16.msra.mxu2 %v372_v18 }
  0x23   :  { %297 = vmatpush.bf16.msra.mxu3 %v436_v22 }
  0x24   :  { %256 = vmatpush.bf16.msra.mxu0 %v360_v28 }
  0x25   :  { %270 = vmatpush.bf16.msra.mxu1 %v424_v31 }
  0x26   :  { %284 = vmatpush.bf16.msra.mxu2 %v364_v32 }
  0x27   :  { %298 = vmatpush.bf16.msra.mxu3 %v428_v35  ;;  %257 = vmatmul.bf16.vlgmr.msra.gmra.mxu0 %v352_v36 }
  0x28   :  { %271 = vmatmul.bf16.vlgmr.msra.gmra.mxu1 %v356_v37 }
  0x29   :  { %285 = vmatmul.bf16.vlgmr.msra.gmra.mxu2 %v352_v36 }
  0x2a   :  { %299 = vmatmul.bf16.vlgmr.msra.gmra.mxu3 %v356_v37 }
  0xa4   :  { %v258_v38 = vpop.f32.mrf.mxu0 }
  0xa5   :  { %v272_v40 = vpop.f32.mrf.mxu1 }
  0xa6   :  { %v273_v41 = vadd.f32 %v272_v40, %v258_v38 }
  0xa8   :  { %v326_v44 = vadd.f32 %v322_v42, %v273_v41 }
  0xaa   :  { %v336_v53 = vadd.f32 %v332_v45, %v326_v44 }
  0xac   :  { %v286_v46 = vpop.f32.mrf.mxu2  ;;  %v260_v51 = vpop.f32.mrf.mxu0 }
  0xad   :  { %v300_v48 = vpop.f32.mrf.mxu3  ;;  %v274_v52 = vpop.f32.mrf.mxu1 }
  0xae   :  { %v301_v49 = vadd.f32 %v300_v48, %v286_v46  ;;  %v275_v56 = vadd.f32 %v274_v52, %v260_v51 }
  0xb0   :  { %v327_v54 = vadd.f32 %v323_v47, %v301_v49  ;;  %v328_v61 = vadd.f32 %v322_v42, %v275_v56 }
  0xb2   :  { %v337_v55 = vadd.f32 %v333_v50, %v327_v54  ;;  %v338_v2 = vadd.f32 %v334_v62, %v328_v61 }
  0xb4   :  { %v340_v58 = vpack.c.bf16 %v337_v55, %v336_v53  ;;  %v288_v59 = vpop.f32.mrf.mxu2 }
  0xb5   :  { %v302_v60 = vpop.f32.mrf.mxu3 }
  0xb6   :  { %342 = vst [vmem:[%s610_s4] sm:$0xff] %v340_v58  ;;  %v303_v63 = vadd.f32 %v302_v60, %v288_v59 }
  0xb8   :  { %v329_v1 = vadd.f32 %v323_v47, %v303_v63 }
  0xba   :  { %v339_v3 = vadd.f32 %v335_v0, %v329_v1 }
  0xbc   :  { %v341_v4 = vpack.c.bf16 %v339_v3, %v338_v2 }
  0xbe   :  { %343 = vst [vmem:[%s610_s4 + $0x8] sm:$0xff] %v341_v4 }
  0xbf   :  { %348 = vsyncpa [#allocation4], 1 }

// kernel: _lambda_.22
= control target key start
LH: loop header
LB: loop body
LE: loop exit
PB: predicated region body
PF: predicated region fallthrough
CT: control target
= control target key end

     0   :  { %s1947_s12 = smov 0   ;;  %s1949_s13 = smov 0   ;;  %s2555_s0 = inlined_call_operand.vmem [shape: bf16[16,256], index: 0, kind: input, shape index: {}]   ;;  %s2556_s1 = inlined_call_operand.vmem [shape: bf16[256,1024], index: 1, kind: input, shape index: {}]   ;;  %s2557_s2 = inlined_call_operand.vmem [shape: f32[1,1024], index: 2, kind: input, shape index: {}]   ;;  %s2558_s3 = inlined_call_operand.vmem [shape: bf16[16,1024], index: 3, kind: output, shape index: {}]  }
   0x1   :  { %s1951_s14 = smov 0   ;;  %s1953_s15 = smov 0  }
   0x2   :  { %s1955_s16 = smov 0  }
   0x3 LB: > { %s28_s17 = sadd.s32 1, %s1921_s15  ;;  %s1474_s18 = sadd.s32 4294967295, %s1925_s16   ;;  %s1925_s16 = sphi %s1955_s16, %s13_s16   ;;  %s1921_s15 = sphi %s1953_s15, %s2569_s15   ;;  %s1917_s14 = sphi %s1951_s14, %s2568_s14   ;;  %s1913_s13 = sphi %s1949_s13, %s2567_s13   ;;  %s1909_s12 = sphi %s1947_s12, %s2566_s12  }
   0x4   : > { %p30_p0 = scmp.ge.s32.totalorder %s28_s17, 2  ;;  %p76_p1 = scmp.ne.s32.totalorder %s1913_s13, %s1909_s12 }
   0x5   : > { %p77_p2 = scmp.eq.s32.totalorder %s1925_s16, 0  ;;  %p134_p4 = scmp.eq.s32.totalorder %s1474_s18, 1 }
   0x6   : > { %s2571_s17 = smov (%p30_p0, %s28_s17), 0  ;;  %s69_s20 = sadd.s32 1, %s1913_s13 }
   0x7   : > { %p78_p3 = por %p77_p2, %p76_p1  ;;  %s65_s19 = ssub.s32 %s1921_s15, %s2571_s17 }
   0x8   : > { %p67_p5 = scmp.eq.s32.totalorder %s65_s19, 0  ;;  %p1982_p6 = por %p134_p4, %p76_p1 }
   0x9   : > { %p1478_p7 = scmp.ge.s32.totalorder %s1925_s16, 2 }
   0xa   : > { %s1987_s22 = scalar_select %p67_p5, %s1913_s13, %s69_s20  }
   0xb   : > { %171 = sbr.rel (%p1478_p7) target bundleno = 84 (0x54), region = 20 }
  0x10   : > { %174 = sbr.rel (!%p78_p3) target bundleno = 84 (0x54), region = 24  ;;  %s176_s23 = sand.u32 (%p78_p3), 1, %s1913_s13  }
  0x11   : > { %s1763_s24 = sshll.u32 (%p78_p3), %s1921_s15, 4  ;;  %s1479_s25 = sshll.u32 (%p78_p3), %s176_s23, 9 }
  0x12   : > { %s1995_s28 = scalar_lea.vmem (%p78_p3), %s2556_s1, %s1763_s24  ;;  %s2000_s29 = scalar_lea.vmem (%p78_p3), [#allocation3], %s1479_s25 }
  0x13   : > { %v197_v0 = vld [vmem:[%s1995_s28] sm:$0xff] (%p78_p3)  ;;  %v199_v1 = vld [vmem:[%s1995_s28 + $0x8] sm:$0xff] (%p78_p3) }
  0x14   : > { %v201_v2 = vld [vmem:[%s1995_s28 + $0x20] sm:$0xff] (%p78_p3)  ;;  %198 = vst [vmem:[%s2000_s29] sm:$0xff] (%p78_p3), %v197_v0  ;;  %v203_v3 = vld [vmem:[%s1995_s28 + $0x28] sm:$0xff] (%p78_p3) }
  0x15   : > { %200 = vst [vmem:[%s2000_s29 + $0x8] sm:$0xff] %v199_v1  ;;  %v205_v4 = vld [vmem:[%s1995_s28 + $0x40] sm:$0xff]  ;;  %v207_v5 = vld [vmem:[%s1995_s28 + $0x48] sm:$0xff] }
  0x16   : > { %202 = vst [vmem:[%s2000_s29 + $0x10] sm:$0xff] %v201_v2  ;;  %v209_v6 = vld [vmem:[%s1995_s28 + $0x60] sm:$0xff]  ;;  %v211_v7 = vld [vmem:[%s1995_s28 + $0x68] sm:$0xff] }
  0x17   : > { %204 = vst [vmem:[%s2000_s29 + $0x18] sm:$0xff] %v203_v3  ;;  %v213_v8 = vld [vmem:[%s1995_s28 + $0x80] sm:$0xff]  ;;  %v215_v9 = vld [vmem:[%s1995_s28 + $0x88] sm:$0xff] }
  0x18   : > { %206 = vst [vmem:[%s2000_s29 + $0x20] sm:$0xff] %v205_v4  ;;  %v217_v10 = vld [vmem:[%s1995_s28 + $0xa0] sm:$0xff]  ;;  %v219_v11 = vld [vmem:[%s1995_s28 + $0xa8] sm:$0xff] }
  0x19   : > { %208 = vst [vmem:[%s2000_s29 + $0x28] sm:$0xff] %v207_v5  ;;  %v221_v12 = vld [vmem:[%s1995_s28 + $0xc0] sm:$0xff]  ;;  %v223_v13 = vld [vmem:[%s1995_s28 + $0xc8] sm:$0xff] }
  0x1a   : > { %210 = vst [vmem:[%s2000_s29 + $0x30] sm:$0xff] %v209_v6  ;;  %v225_v14 = vld [vmem:[%s1995_s28 + $0xe0] sm:$0xff]  ;;  %v227_v15 = vld [vmem:[%s1995_s28 + $0xe8] sm:$0xff] }
  0x1b   : > { %212 = vst [vmem:[%s2000_s29 + $0x38] sm:$0xff] %v211_v7  ;;  %v229_v16 = vld [vmem:[%s1995_s28 + $0x100] sm:$0xff]  ;;  %v231_v17 = vld [vmem:[%s1995_s28 + $0x108] sm:$0xff] }
  0x1c   : > { %214 = vst [vmem:[%s2000_s29 + $0x40] sm:$0xff] %v213_v8  ;;  %v233_v18 = vld [vmem:[%s1995_s28 + $0x120] sm:$0xff]  ;;  %v235_v19 = vld [vmem:[%s1995_s28 + $0x128] sm:$0xff] }
  0x1d   : > { %216 = vst [vmem:[%s2000_s29 + $0x48] sm:$0xff] %v215_v9  ;;  %v237_v20 = vld [vmem:[%s1995_s28 + $0x140] sm:$0xff]  ;;  %v239_v21 = vld [vmem:[%s1995_s28 + $0x148] sm:$0xff] }
  0x1e   : > { %218 = vst [vmem:[%s2000_s29 + $0x50] sm:$0xff] %v217_v10  ;;  %v241_v22 = vld [vmem:[%s1995_s28 + $0x160] sm:$0xff]  ;;  %v243_v23 = vld [vmem:[%s1995_s28 + $0x168] sm:$0xff] }
  0x1f   : > { %220 = vst [vmem:[%s2000_s29 + $0x58] sm:$0xff] %v219_v11  ;;  %v245_v24 = vld [vmem:[%s1995_s28 + $0x180] sm:$0xff]  ;;  %v247_v25 = vld [vmem:[%s1995_s28 + $0x188] sm:$0xff] }
  0x20   : > { %222 = vst [vmem:[%s2000_s29 + $0x60] sm:$0xff] %v221_v12  ;;  %v249_v26 = vld [vmem:[%s1995_s28 + $0x1a0] sm:$0xff]  ;;  %v251_v27 = vld [vmem:[%s1995_s28 + $0x1a8] sm:$0xff] }
  0x21   : > { %224 = vst [vmem:[%s2000_s29 + $0x68] sm:$0xff] %v223_v13  ;;  %v253_v28 = vld [vmem:[%s1995_s28 + $0x1c0] sm:$0xff]  ;;  %v255_v29 = vld [vmem:[%s1995_s28 + $0x1c8] sm:$0xff] }
  0x22   : > { %226 = vst [vmem:[%s2000_s29 + $0x70] sm:$0xff] %v225_v14  ;;  %v257_v30 = vld [vmem:[%s1995_s28 + $0x1e0] sm:$0xff]  ;;  %v259_v31 = vld [vmem:[%s1995_s28 + $0x1e8] sm:$0xff] }
  0x23   : > { %228 = vst [vmem:[%s2000_s29 + $0x78] sm:$0xff] %v227_v15  ;;  %v261_v32 = vld [vmem:[%s1995_s28 + $0x200] sm:$0xff]  ;;  %v263_v33 = vld [vmem:[%s1995_s28 + $0x208] sm:$0xff] }
  0x24   : > { %230 = vst [vmem:[%s2000_s29 + $0x80] sm:$0xff] %v229_v16  ;;  %v265_v34 = vld [vmem:[%s1995_s28 + $0x220] sm:$0xff]  ;;  %v267_v35 = vld [vmem:[%s1995_s28 + $0x228] sm:$0xff] }
  0x25   : > { %232 = vst [vmem:[%s2000_s29 + $0x88] sm:$0xff] %v231_v17  ;;  %v269_v36 = vld [vmem:[%s1995_s28 + $0x240] sm:$0xff]  ;;  %v271_v37 = vld [vmem:[%s1995_s28 + $0x248] sm:$0xff] }
  0x26   : > { %234 = vst [vmem:[%s2000_s29 + $0x90] sm:$0xff] %v233_v18  ;;  %v273_v38 = vld [vmem:[%s1995_s28 + $0x260] sm:$0xff]  ;;  %v275_v39 = vld [vmem:[%s1995_s28 + $0x268] sm:$0xff] }
  0x27   : > { %236 = vst [vmem:[%s2000_s29 + $0x98] sm:$0xff] %v235_v19  ;;  %v277_v40 = vld [vmem:[%s1995_s28 + $0x280] sm:$0xff]  ;;  %v279_v41 = vld [vmem:[%s1995_s28 + $0x288] sm:$0xff] }
  0x28   : > { %238 = vst [vmem:[%s2000_s29 + $0xa0] sm:$0xff] %v237_v20  ;;  %v281_v42 = vld [vmem:[%s1995_s28 + $0x2a0] sm:$0xff]  ;;  %v283_v43 = vld [vmem:[%s1995_s28 + $0x2a8] sm:$0xff] }
  0x29   : > { %240 = vst [vmem:[%s2000_s29 + $0xa8] sm:$0xff] %v239_v21  ;;  %v285_v44 = vld [vmem:[%s1995_s28 + $0x2c0] sm:$0xff]  ;;  %v287_v45 = vld [vmem:[%s1995_s28 + $0x2c8] sm:$0xff] }
  0x2a   : > { %242 = vst [vmem:[%s2000_s29 + $0xb0] sm:$0xff] %v241_v22  ;;  %v289_v46 = vld [vmem:[%s1995_s28 + $0x2e0] sm:$0xff]  ;;  %v291_v47 = vld [vmem:[%s1995_s28 + $0x2e8] sm:$0xff] }
  0x2b   : > { %244 = vst [vmem:[%s2000_s29 + $0xb8] sm:$0xff] %v243_v23  ;;  %v293_v48 = vld [vmem:[%s1995_s28 + $0x300] sm:$0xff]  ;;  %v295_v49 = vld [vmem:[%s1995_s28 + $0x308] sm:$0xff] }
  0x2c   : > { %246 = vst [vmem:[%s2000_s29 + $0xc0] sm:$0xff] %v245_v24  ;;  %v297_v50 = vld [vmem:[%s1995_s28 + $0x320] sm:$0xff]  ;;  %v299_v51 = vld [vmem:[%s1995_s28 + $0x328] sm:$0xff] }
  0x2d   : > { %248 = vst [vmem:[%s2000_s29 + $0xc8] sm:$0xff] %v247_v25  ;;  %v301_v52 = vld [vmem:[%s1995_s28 + $0x340] sm:$0xff]  ;;  %v303_v53 = vld [vmem:[%s1995_s28 + $0x348] sm:$0xff] }
  0x2e   : > { %250 = vst [vmem:[%s2000_s29 + $0xd0] sm:$0xff] %v249_v26  ;;  %v305_v54 = vld [vmem:[%s1995_s28 + $0x360] sm:$0xff]  ;;  %v307_v55 = vld [vmem:[%s1995_s28 + $0x368] sm:$0xff] }
  0x2f   : > { %252 = vst [vmem:[%s2000_s29 + $0xd8] sm:$0xff] %v251_v27  ;;  %v309_v56 = vld [vmem:[%s1995_s28 + $0x380] sm:$0xff]  ;;  %v311_v57 = vld [vmem:[%s1995_s28 + $0x388] sm:$0xff] }
  0x30   : > { %254 = vst [vmem:[%s2000_s29 + $0xe0] sm:$0xff] %v253_v28  ;;  %v313_v58 = vld [vmem:[%s1995_s28 + $0x3a0] sm:$0xff]  ;;  %v315_v59 = vld [vmem:[%s1995_s28 + $0x3a8] sm:$0xff] }
  0x31   : > { %256 = vst [vmem:[%s2000_s29 + $0xe8] sm:$0xff] %v255_v29  ;;  %v317_v60 = vld [vmem:[%s1995_s28 + $0x3c0] sm:$0xff]  ;;  %v319_v61 = vld [vmem:[%s1995_s28 + $0x3c8] sm:$0xff] }
  0x32   : > { %258 = vst [vmem:[%s2000_s29 + $0xf0] sm:$0xff] %v257_v30  ;;  %v321_v62 = vld [vmem:[%s1995_s28 + $0x3e0] sm:$0xff]  ;;  %v323_v63 = vld [vmem:[%s1995_s28 + $0x3e8] sm:$0xff] }
  0x33   : > { %260 = vst [vmem:[%s2000_s29 + $0xf8] sm:$0xff] %v259_v31 }
  0x34   : > { %262 = vst [vmem:[%s2000_s29 + $0x100] sm:$0xff] %v261_v32 }
  0x35   : > { %264 = vst [vmem:[%s2000_s29 + $0x108] sm:$0xff] %v263_v33 }
  0x36   : > { %266 = vst [vmem:[%s2000_s29 + $0x110] sm:$0xff] %v265_v34 }
  0x37   : > { %268 = vst [vmem:[%s2000_s29 + $0x118] sm:$0xff] %v267_v35 }
  0x38   : > { %270 = vst [vmem:[%s2000_s29 + $0x120] sm:$0xff] %v269_v36 }
  0x39   : > { %272 = vst [vmem:[%s2000_s29 + $0x128] sm:$0xff] %v271_v37 }
  0x3a   : > { %274 = vst [vmem:[%s2000_s29 + $0x130] sm:$0xff] %v273_v38 }
  0x3b   : > { %276 = vst [vmem:[%s2000_s29 + $0x138] sm:$0xff] %v275_v39 }
  0x3c   : > { %278 = vst [vmem:[%s2000_s29 + $0x140] sm:$0xff] %v277_v40 }
  0x3d   : > { %280 = vst [vmem:[%s2000_s29 + $0x148] sm:$0xff] %v279_v41 }
  0x3e   : > { %282 = vst [vmem:[%s2000_s29 + $0x150] sm:$0xff] %v281_v42 }
  0x3f   : > { %284 = vst [vmem:[%s2000_s29 + $0x158] sm:$0xff] %v283_v43 }
  0x40   : > { %286 = vst [vmem:[%s2000_s29 + $0x160] sm:$0xff] %v285_v44 }
  0x41   : > { %288 = vst [vmem:[%s2000_s29 + $0x168] sm:$0xff] %v287_v45 }
  0x42   : > { %290 = vst [vmem:[%s2000_s29 + $0x170] sm:$0xff] %v289_v46 }
  0x43   : > { %292 = vst [vmem:[%s2000_s29 + $0x178] sm:$0xff] %v291_v47 }
  0x44   : > { %294 = vst [vmem:[%s2000_s29 + $0x180] sm:$0xff] %v293_v48 }
  0x45   : > { %296 = vst [vmem:[%s2000_s29 + $0x188] sm:$0xff] %v295_v49 }
  0x46   : > { %298 = vst [vmem:[%s2000_s29 + $0x190] sm:$0xff] %v297_v50 }
  0x47   : > { %300 = vst [vmem:[%s2000_s29 + $0x198] sm:$0xff] %v299_v51 }
  0x48   : > { %302 = vst [vmem:[%s2000_s29 + $0x1a0] sm:$0xff] %v301_v52 }
  0x49   : > { %304 = vst [vmem:[%s2000_s29 + $0x1a8] sm:$0xff] %v303_v53 }
  0x4a   : > { %306 = vst [vmem:[%s2000_s29 + $0x1b0] sm:$0xff] %v305_v54 }
  0x4b   : > { %308 = vst [vmem:[%s2000_s29 + $0x1b8] sm:$0xff] %v307_v55 }
  0x4c   : > { %310 = vst [vmem:[%s2000_s29 + $0x1c0] sm:$0xff] %v309_v56 }
  0x4d   : > { %312 = vst [vmem:[%s2000_s29 + $0x1c8] sm:$0xff] %v311_v57 }
  0x4e   : > { %314 = vst [vmem:[%s2000_s29 + $0x1d0] sm:$0xff] %v313_v58 }
  0x4f   : > { %316 = vst [vmem:[%s2000_s29 + $0x1d8] sm:$0xff] %v315_v59 }
  0x50   : > { %318 = vst [vmem:[%s2000_s29 + $0x1e0] sm:$0xff] %v317_v60 }
  0x51   : > { %320 = vst [vmem:[%s2000_s29 + $0x1e8] sm:$0xff] %v319_v61 }
  0x52   : > { %322 = vst [vmem:[%s2000_s29 + $0x1f0] sm:$0xff] %v321_v62 }
  0x53   : > { %324 = vst [vmem:[%s2000_s29 + $0x1f8] sm:$0xff] %v323_v63 }
  0x54 PF: > { %p1482_p8 = scmp.ge.s32.totalorder %s1925_s16, 1  ;;  %p337_p9 = scmp.lt.s32.totalorder %s1925_s16, 3 }
  0x56   : > { %p338_p10 = pnand %p1482_p8, %p337_p9 }
  0x57   : > { %s344_s30 = sand.u32 (!%p338_p10), 1, %s1909_s12   ;;  %s1485_s20 = sshll.u32 (!%p338_p10), %s1917_s14, 2 }
  0x58   : > { %341 = sbr.rel (%p338_p10) target bundleno = 382 (0x17e), region = 51  ;;  %s1483_s4 = sshll.u32 (!%p338_p10), %s344_s30, 9 }
  0x59   : > { %s2132_s5 = scalar_lea.vmem (!%p338_p10), [#allocation3], %s1483_s4  ;;  %p395_p11 = scmp.lt.s32.totalorder (!%p338_p10), %s1485_s20, 7 }
  0x5a   : > { %s1484_s26 = sshll.u32 (!%p338_p10), %s344_s30, 5 }
  0x5b   : > { %s2458_s12 = scalar_lea.vmem (!%p338_p10), [#allocation4], %s1484_s26 }
  0x5d   : > { %v1608_v0 = vld [vmem:[%s2132_s5 + $0xe0] sm:$0xf]  ;;  %v1796_v1 = vld [vmem:[%s2132_s5 + $0xec] sm:$0xf0]  ;;  %v1794_v5 = vld [vmem:[%s2132_s5 + $0xe4] sm:$0xf] }
  0x5e   : > { %v1736_v2 = vld [vmem:[%s2132_s5 + $0x1e0] sm:$0xf]  ;;  %v1609_v3 = vor.u32 %v1796_v1, %v1608_v0  ;;  %v1828_v4 = vld [vmem:[%s2132_s5 + $0x1ec] sm:$0xf0]  ;;  %v1610_v6 = vld [vmem:[%s2132_s5 + $0xf0] sm:$0xf0] }
  0x5f   : > { %v1737_v7 = vor.u32 %v1828_v4, %v1736_v2  ;;  %v1613_v8 = vor.u32 %v1794_v5, %v1610_v6  ;;  %v1826_v9 = vld [vmem:[%s2132_s5 + $0x1e4] sm:$0xf]  ;;  %v1738_v10 = vld [vmem:[%s2132_s5 + $0x1f0] sm:$0xf0]  ;;  %v1592_v11 = vld [vmem:[%s2132_s5 + $0xc0] sm:$0xf] }
  0x60   : > { %817 = vmatpush.bf16.msra.mxu0 %v1609_v3  ;;  %v1741_v12 = vor.u32 %v1826_v9, %v1738_v10  ;;  %v1792_v13 = vld [vmem:[%s2132_s5 + $0xcc] sm:$0xf0]  ;;  %v1720_v14 = vld [vmem:[%s2132_s5 + $0x1c0] sm:$0xf]  ;;  %v1790_v18 = vld [vmem:[%s2132_s5 + $0xc4] sm:$0xf] }
  0x61   : > { %v1824_v15 = vld [vmem:[%s2132_s5 + $0x1cc] sm:$0xf0]  ;;  %831 = vmatpush.bf16.msra.mxu1 %v1737_v7  ;;  %845 = vmatpush.bf16.msra.mxu2 %v1613_v8  ;;  %v1593_v16 = vor.u32 %v1792_v13, %v1592_v11  ;;  %v1594_v19 = vld [vmem:[%s2132_s5 + $0xd0] sm:$0xf0]  ;;  %v1822_v20 = vld [vmem:[%s2132_s5 + $0x1c4] sm:$0xf] }
  0x62   : > { %v1721_v17 = vor.u32 %v1824_v15, %v1720_v14  ;;  %859 = vmatpush.bf16.msra.mxu3 %v1741_v12  ;;  %v1597_v21 = vor.u32 %v1790_v18, %v1594_v19  ;;  %v1722_v22 = vld [vmem:[%s2132_s5 + $0x1d0] sm:$0xf0]  ;;  %v1576_v23 = vld [vmem:[%s2132_s5 + $0xa0] sm:$0xf]  ;;  %v1788_v24 = vld [vmem:[%s2132_s5 + $0xac] sm:$0xf0] }
  0x63   : > { %v1725_v25 = vor.u32 %v1822_v20, %v1722_v22  ;;  %v1704_v26 = vld [vmem:[%s2132_s5 + $0x1a0] sm:$0xf]  ;;  %v1820_v27 = vld [vmem:[%s2132_s5 + $0x1ac] sm:$0xf0]  ;;  %v1786_v28 = vld [vmem:[%s2132_s5 + $0xa4] sm:$0xf]  ;;  %v1577_v29 = vor.u32 %v1788_v24, %v1576_v23 }
  0x64   : > { %818 = vmatpush.bf16.msra.mxu0 %v1593_v16  ;;  %v1578_v30 = vld [vmem:[%s2132_s5 + $0xb0] sm:$0xf0]  ;;  %v1818_v31 = vld [vmem:[%s2132_s5 + $0x1a4] sm:$0xf]  ;;  %v1705_v33 = vor.u32 %v1820_v27, %v1704_v26  ;;  %v1560_v35 = vld [vmem:[%s2132_s5 + $0x80] sm:$0xf] }
  0x65   : > { %v1706_v32 = vld [vmem:[%s2132_s5 + $0x1b0] sm:$0xf0]  ;;  %832 = vmatpush.bf16.msra.mxu1 %v1721_v17  ;;  %846 = vmatpush.bf16.msra.mxu2 %v1597_v21  ;;  %v1581_v34 = vor.u32 %v1786_v28, %v1578_v30  ;;  %v1784_v36 = vld [vmem:[%s2132_s5 + $0x8c] sm:$0xf0]  ;;  %v1688_v37 = vld [vmem:[%s2132_s5 + $0x180] sm:$0xf] }
  0x66   : > { %860 = vmatpush.bf16.msra.mxu3 %v1725_v25  ;;  %v1709_v38 = vor.u32 %v1818_v31, %v1706_v32  ;;  %v1816_v39 = vld [vmem:[%s2132_s5 + $0x18c] sm:$0xf0]  ;;  %v1782_v40 = vld [vmem:[%s2132_s5 + $0x84] sm:$0xf]  ;;  %v1562_v41 = vld [vmem:[%s2132_s5 + $0x90] sm:$0xf0]  ;;  %v1561_v44 = vor.u32 %v1784_v36, %v1560_v35 }
  0x67   : > { %v1814_v42 = vld [vmem:[%s2132_s5 + $0x184] sm:$0xf]  ;;  %v1690_v43 = vld [vmem:[%s2132_s5 + $0x190] sm:$0xf0]  ;;  %v1689_v45 = vor.u32 %v1816_v39, %v1688_v37  ;;  %v1565_v46 = vor.u32 %v1782_v40, %v1562_v41  ;;  %v1544_v47 = vld [vmem:[%s2132_s5 + $0x60] sm:$0xf] }
  0x68   : > { %819 = vmatpush.bf16.msra.mxu0 %v1577_v29  ;;  %v1780_v48 = vld [vmem:[%s2132_s5 + $0x6c] sm:$0xf0]  ;;  %v1672_v49 = vld [vmem:[%s2132_s5 + $0x160] sm:$0xf]  ;;  %v1693_v50 = vor.u32 %v1814_v42, %v1690_v43  ;;  %v1778_v52 = vld [vmem:[%s2132_s5 + $0x64] sm:$0xf] }
  0x69   : > { %833 = vmatpush.bf16.msra.mxu1 %v1705_v33  ;;  %847 = vmatpush.bf16.msra.mxu2 %v1581_v34  ;;  %v1812_v51 = vld [vmem:[%s2132_s5 + $0x16c] sm:$0xf0]  ;;  %v1546_v53 = vld [vmem:[%s2132_s5 + $0x70] sm:$0xf0]  ;;  %v1810_v54 = vld [vmem:[%s2132_s5 + $0x164] sm:$0xf]  ;;  %v1545_v56 = vor.u32 %v1780_v48, %v1544_v47 }
  0x6a   : > { %861 = vmatpush.bf16.msra.mxu3 %v1709_v38  ;;  %v1674_v55 = vld [vmem:[%s2132_s5 + $0x170] sm:$0xf0]  ;;  %v1673_v57 = vor.u32 %v1812_v51, %v1672_v49  ;;  %v1549_v58 = vor.u32 %v1778_v52, %v1546_v53  ;;  %v1528_v59 = vld [vmem:[%s2132_s5 + $0x40] sm:$0xf]  ;;  %v1776_v60 = vld [vmem:[%s2132_s5 + $0x4c] sm:$0xf0] }
  0x6b   : > { %v1656_v61 = vld [vmem:[%s2132_s5 + $0x140] sm:$0xf]  ;;  %v1677_v62 = vor.u32 %v1810_v54, %v1674_v55  ;;  %v1808_v63 = vld [vmem:[%s2132_s5 + $0x14c] sm:$0xf0]  ;;  %v1774_v0 = vld [vmem:[%s2132_s5 + $0x44] sm:$0xf]  ;;  %v1529_v4 = vor.u32 %v1776_v60, %v1528_v59 }
  0x6c   : > { %820 = vmatpush.bf16.msra.mxu0 %v1561_v44  ;;  %v1530_v1 = vld [vmem:[%s2132_s5 + $0x50] sm:$0xf0]  ;;  %v1806_v2 = vld [vmem:[%s2132_s5 + $0x144] sm:$0xf]  ;;  %v1657_v5 = vor.u32 %v1808_v63, %v1656_v61  ;;  %v1512_v7 = vld [vmem:[%s2132_s5 + $0x20] sm:$0xf] }
  0x6d   : > { %834 = vmatpush.bf16.msra.mxu1 %v1689_v45  ;;  %848 = vmatpush.bf16.msra.mxu2 %v1565_v46  ;;  %v1658_v3 = vld [vmem:[%s2132_s5 + $0x150] sm:$0xf0]  ;;  %v1533_v6 = vor.u32 %v1774_v0, %v1530_v1  ;;  %v1772_v8 = vld [vmem:[%s2132_s5 + $0x2c] sm:$0xf0]  ;;  %v1640_v9 = vld [vmem:[%s2132_s5 + $0x120] sm:$0xf] }
  0x6e   : > { %862 = vmatpush.bf16.msra.mxu3 %v1693_v50  ;;  %v1661_v10 = vor.u32 %v1806_v2, %v1658_v3  ;;  %v1804_v11 = vld [vmem:[%s2132_s5 + $0x12c] sm:$0xf0]  ;;  %v1770_v12 = vld [vmem:[%s2132_s5 + $0x24] sm:$0xf]  ;;  %v1514_v13 = vld [vmem:[%s2132_s5 + $0x30] sm:$0xf0]  ;;  %v1513_v16 = vor.u32 %v1772_v8, %v1512_v7 }
  0x6f   : > { %v1802_v14 = vld [vmem:[%s2132_s5 + $0x124] sm:$0xf]  ;;  %v1642_v15 = vld [vmem:[%s2132_s5 + $0x130] sm:$0xf0]  ;;  %v1496_v17 = vld [vmem:[%s2132_s5] sm:$0xf]  ;;  %v1641_v20 = vor.u32 %v1804_v11, %v1640_v9  ;;  %v1517_v21 = vor.u32 %v1770_v12, %v1514_v13 }
  0x70   : > { %821 = vmatpush.bf16.msra.mxu0 %v1545_v56  ;;  %v1768_v18 = vld [vmem:[%s2132_s5 + $0xc] sm:$0xf0]  ;;  %v1624_v19 = vld [vmem:[%s2132_s5 + $0x100] sm:$0xf]  ;;  %v1766_v23 = vld [vmem:[%s2132_s5 + $0x4] sm:$0xf]  ;;  %v1645_v25 = vor.u32 %v1802_v14, %v1642_v15 }
  0x71   : > { %835 = vmatpush.bf16.msra.mxu1 %v1673_v57  ;;  %849 = vmatpush.bf16.msra.mxu2 %v1549_v58  ;;  %v1800_v22 = vld [vmem:[%s2132_s5 + $0x10c] sm:$0xf0]  ;;  %v1498_v24 = vld [vmem:[%s2132_s5 + $0x10] sm:$0xf0]  ;;  %v1798_v26 = vld [vmem:[%s2132_s5 + $0x104] sm:$0xf]  ;;  %v1497_v32 = vor.u32 %v1768_v18, %v1496_v17 }
  0x72   : > { %863 = vmatpush.bf16.msra.mxu3 %v1677_v62  ;;  %v1626_v27 = vld [vmem:[%s2132_s5 + $0x110] sm:$0xf0]  ;;  %v1616_v28 = vld [vmem:[%s2132_s5 + $0xe8] sm:$0xf]  ;;  %v1797_v29 = vld [vmem:[%s2132_s5 + $0xf4] sm:$0xf0]  ;;  %v1625_v36 = vor.u32 %v1800_v22, %v1624_v19  ;;  %v1501_v37 = vor.u32 %v1766_v23, %v1498_v24 }
  0x73   : > { %v1744_v30 = vld [vmem:[%s2132_s5 + $0x1e8] sm:$0xf]  ;;  %v1829_v31 = vld [vmem:[%s2132_s5 + $0x1f4] sm:$0xf0]  ;;  %v1795_v33 = vld [vmem:[%s2132_s5 + $0xec] sm:$0xf]  ;;  %v1629_v41 = vor.u32 %v1798_v26, %v1626_v27  ;;  %v1617_v42 = vor.u32 %v1797_v29, %v1616_v28 }
  0x74   : > { %822 = vmatpush.bf16.msra.mxu0 %v1529_v4  ;;  %v1618_v34 = vld [vmem:[%s2132_s5 + $0xf8] sm:$0xf0]  ;;  %v1827_v35 = vld [vmem:[%s2132_s5 + $0x1ec] sm:$0xf]  ;;  %v1488_v39 = vld [vmem:[%s2555_s0] sm:$0xf]  ;;  %v1745_v45 = vor.u32 %v1829_v31, %v1744_v30 }
  0x75   : > { %836 = vmatpush.bf16.msra.mxu1 %v1657_v5  ;;  %850 = vmatpush.bf16.msra.mxu2 %v1533_v6  ;;  %v1746_v38 = vld [vmem:[%s2132_s5 + $0x1f8] sm:$0xf0]  ;;  %v1765_v40 = vld [vmem:[%s2555_s0 + $0x4] sm:$0xf0]  ;;  %v1764_v43 = vld [vmem:[%s2555_s0 + $0x4] sm:$0xf]  ;;  %v1621_v46 = vor.u32 %v1795_v33, %v1618_v34 }
  0x76   : > { %864 = vmatpush.bf16.msra.mxu3 %v1661_v10  ;;  %v1490_v44 = vld [vmem:[%s2555_s0 + $0x8] sm:$0xf0]  ;;  %v1600_v47 = vld [vmem:[%s2132_s5 + $0xc8] sm:$0xf]  ;;  %v1793_v48 = vld [vmem:[%s2132_s5 + $0xd4] sm:$0xf0]  ;;  %v1749_v50 = vor.u32 %v1827_v35, %v1746_v38  ;;  %v2221_v51 = vor.u32 %v1765_v40, %v1488_v39 }
  0x77   : > { %v1728_v49 = vld [vmem:[%s2132_s5 + $0x1c8] sm:$0xf]  ;;  %v1825_v52 = vld [vmem:[%s2132_s5 + $0x1d4] sm:$0xf0]  ;;  %v1791_v53 = vld [vmem:[%s2132_s5 + $0xcc] sm:$0xf]  ;;  %v2226_v55 = vor.u32 %v1764_v43, %v1490_v44  ;;  %v1601_v58 = vor.u32 %v1793_v48, %v1600_v47 }
  0x78   : > { %823 = vmatpush.bf16.msra.mxu0 %v1513_v16  ;;  %v1602_v54 = vld [vmem:[%s2132_s5 + $0xd8] sm:$0xf0]  ;;  %v1823_v56 = vld [vmem:[%s2132_s5 + $0x1cc] sm:$0xf]  ;;  %v1729_v59 = vor.u32 %v1825_v52, %v1728_v49  ;;  %v1584_v61 = vld [vmem:[%s2132_s5 + $0xa8] sm:$0xf] }
  0x79   : > { %837 = vmatpush.bf16.msra.mxu1 %v1641_v20  ;;  %851 = vmatpush.bf16.msra.mxu2 %v1517_v21  ;;  %v1730_v57 = vld [vmem:[%s2132_s5 + $0x1d8] sm:$0xf0]  ;;  %v1605_v60 = vor.u32 %v1791_v53, %v1602_v54  ;;  %v1789_v62 = vld [vmem:[%s2132_s5 + $0xb4] sm:$0xf0]  ;;  %v1712_v63 = vld [vmem:[%s2132_s5 + $0x1a8] sm:$0xf] }
  0x7a   : > { %865 = vmatpush.bf16.msra.mxu3 %v1645_v25  ;;  %v1733_v0 = vor.u32 %v1823_v56, %v1730_v57  ;;  %v1821_v1 = vld [vmem:[%s2132_s5 + $0x1b4] sm:$0xf0]  ;;  %v1787_v2 = vld [vmem:[%s2132_s5 + $0xac] sm:$0xf]  ;;  %v1586_v3 = vld [vmem:[%s2132_s5 + $0xb8] sm:$0xf0]  ;;  %v1585_v6 = vor.u32 %v1789_v62, %v1584_v61 }
  0x7b   : > { %v1819_v4 = vld [vmem:[%s2132_s5 + $0x1ac] sm:$0xf]  ;;  %v1714_v5 = vld [vmem:[%s2132_s5 + $0x1b8] sm:$0xf0]  ;;  %v1713_v7 = vor.u32 %v1821_v1, %v1712_v63  ;;  %v1589_v8 = vor.u32 %v1787_v2, %v1586_v3  ;;  %v1568_v9 = vld [vmem:[%s2132_s5 + $0x88] sm:$0xf] }
  0x7c   : > { %824 = vmatpush.bf16.msra.mxu0 %v1497_v32  ;;  %v1785_v10 = vld [vmem:[%s2132_s5 + $0x94] sm:$0xf0]  ;;  %v1696_v11 = vld [vmem:[%s2132_s5 + $0x188] sm:$0xf]  ;;  %v1717_v12 = vor.u32 %v1819_v4, %v1714_v5  ;;  %v1783_v14 = vld [vmem:[%s2132_s5 + $0x8c] sm:$0xf] }
  0x7d   : > { %838 = vmatpush.bf16.msra.mxu1 %v1625_v36  ;;  %852 = vmatpush.bf16.msra.mxu2 %v1501_v37  ;;  %v1817_v13 = vld [vmem:[%s2132_s5 + $0x194] sm:$0xf0]  ;;  %v1570_v15 = vld [vmem:[%s2132_s5 + $0x98] sm:$0xf0]  ;;  %v1815_v16 = vld [vmem:[%s2132_s5 + $0x18c] sm:$0xf]  ;;  %v1569_v18 = vor.u32 %v1785_v10, %v1568_v9 }
  0x7e   : > { %866 = vmatpush.bf16.msra.mxu3 %v1629_v41  ;;  %v1698_v17 = vld [vmem:[%s2132_s5 + $0x198] sm:$0xf0]  ;;  %v1697_v19 = vor.u32 %v1817_v13, %v1696_v11  ;;  %v1573_v20 = vor.u32 %v1783_v14, %v1570_v15  ;;  %v1552_v21 = vld [vmem:[%s2132_s5 + $0x68] sm:$0xf]  ;;  %v1781_v22 = vld [vmem:[%s2132_s5 + $0x74] sm:$0xf0] }
  0x7f   : > { %825 = vmatmul.bf16.vlgmr.msra.gmra.mxu0 %v2221_v51  ;;  %v1680_v23 = vld [vmem:[%s2132_s5 + $0x168] sm:$0xf]  ;;  %v1701_v24 = vor.u32 %v1815_v16, %v1698_v17  ;;  %v1813_v25 = vld [vmem:[%s2132_s5 + $0x174] sm:$0xf0]  ;;  %v1779_v26 = vld [vmem:[%s2132_s5 + $0x6c] sm:$0xf]  ;;  %v1553_v30 = vor.u32 %v1781_v22, %v1552_v21 }
  0x80   : > { %873 = vmatpush.bf16.msrb.mxu0 %v1617_v42  ;;  %839 = vmatmul.bf16.vlgmr.msra.gmra.mxu1 %v2226_v55  ;;  %v1554_v27 = vld [vmem:[%s2132_s5 + $0x78] sm:$0xf0]  ;;  %v1811_v28 = vld [vmem:[%s2132_s5 + $0x16c] sm:$0xf]  ;;  %v1681_v31 = vor.u32 %v1813_v25, %v1680_v23  ;;  %v1536_v33 = vld [vmem:[%s2132_s5 + $0x48] sm:$0xf] }
  0x81   : > { %887 = vmatpush.bf16.msrb.mxu1 %v1745_v45  ;;  %901 = vmatpush.bf16.msrb.mxu2 %v1621_v46  ;;  %v1682_v29 = vld [vmem:[%s2132_s5 + $0x178] sm:$0xf0]  ;;  %v1557_v32 = vor.u32 %v1779_v26, %v1554_v27  ;;  %v1777_v34 = vld [vmem:[%s2132_s5 + $0x54] sm:$0xf0]  ;;  %v1664_v35 = vld [vmem:[%s2132_s5 + $0x148] sm:$0xf] }
  0x82   : > { %915 = vmatpush.bf16.msrb.mxu3 %v1749_v50  ;;  %853 = vmatmul.bf16.vlgmr.msra.gmra.mxu2 %v2221_v51  ;;  %v1685_v36 = vor.u32 %v1811_v28, %v1682_v29  ;;  %v1809_v37 = vld [vmem:[%s2132_s5 + $0x154] sm:$0xf0]  ;;  %v1775_v38 = vld [vmem:[%s2132_s5 + $0x4c] sm:$0xf]  ;;  %v1538_v39 = vld [vmem:[%s2132_s5 + $0x58] sm:$0xf0]  ;;  %v1537_v42 = vor.u32 %v1777_v34, %v1536_v33 }
  0x83   : > { %867 = vmatmul.bf16.vlgmr.msra.gmra.mxu3 %v2226_v55  ;;  %v1807_v40 = vld [vmem:[%s2132_s5 + $0x14c] sm:$0xf]  ;;  %v1666_v41 = vld [vmem:[%s2132_s5 + $0x158] sm:$0xf0]  ;;  %v1665_v43 = vor.u32 %v1809_v37, %v1664_v35  ;;  %v1541_v44 = vor.u32 %v1775_v38, %v1538_v39  ;;  %v1520_v45 = vld [vmem:[%s2132_s5 + $0x28] sm:$0xf] }
  0x84   : > { %874 = vmatpush.bf16.msrb.mxu0 %v1601_v58  ;;  %v1773_v46 = vld [vmem:[%s2132_s5 + $0x34] sm:$0xf0]  ;;  %v1648_v47 = vld [vmem:[%s2132_s5 + $0x128] sm:$0xf]  ;;  %v1669_v48 = vor.u32 %v1807_v40, %v1666_v41  ;;  %v1771_v50 = vld [vmem:[%s2132_s5 + $0x2c] sm:$0xf] }
  0x85   : > { %888 = vmatpush.bf16.msrb.mxu1 %v1729_v59  ;;  %902 = vmatpush.bf16.msrb.mxu2 %v1605_v60  ;;  %v1805_v49 = vld [vmem:[%s2132_s5 + $0x134] sm:$0xf0]  ;;  %v1522_v52 = vld [vmem:[%s2132_s5 + $0x38] sm:$0xf0]  ;;  %v1803_v53 = vld [vmem:[%s2132_s5 + $0x12c] sm:$0xf]  ;;  %v1521_v56 = vor.u32 %v1773_v46, %v1520_v45 }
  0x86   : > { %916 = vmatpush.bf16.msrb.mxu3 %v1733_v0  ;;  %v1650_v54 = vld [vmem:[%s2132_s5 + $0x138] sm:$0xf0]  ;;  %v1649_v57 = vor.u32 %v1805_v49, %v1648_v47  ;;  %v1525_v58 = vor.u32 %v1771_v50, %v1522_v52  ;;  %v1504_v59 = vld [vmem:[%s2132_s5 + $0x8] sm:$0xf]  ;;  %v1769_v60 = vld [vmem:[%s2132_s5 + $0x14] sm:$0xf0] }
  0x87   : > { %v1632_v61 = vld [vmem:[%s2132_s5 + $0x108] sm:$0xf]  ;;  %v1653_v62 = vor.u32 %v1803_v53, %v1650_v54  ;;  %v1801_v63 = vld [vmem:[%s2132_s5 + $0x114] sm:$0xf0]  ;;  %v1767_v0 = vld [vmem:[%s2132_s5 + $0xc] sm:$0xf]  ;;  %v1505_v4 = vor.u32 %v1769_v60, %v1504_v59 }
  0x88   : > { %875 = vmatpush.bf16.msrb.mxu0 %v1585_v6  ;;  %v1506_v1 = vld [vmem:[%s2132_s5 + $0x18] sm:$0xf0]  ;;  %v1799_v2 = vld [vmem:[%s2132_s5 + $0x10c] sm:$0xf]  ;;  %v1633_v5 = vor.u32 %v1801_v63, %v1632_v61  ;;  %s2573_s20 = smov (!%p395_p11, %s1485_s20), 7  ;;  %s1830_s27 = sshll.u32 (%p1982_p6), %s1917_s14, 4 }
  0x89   : > { %889 = vmatpush.bf16.msrb.mxu1 %v1713_v7  ;;  %903 = vmatpush.bf16.msrb.mxu2 %v1589_v8  ;;  %v1634_v3 = vld [vmem:[%s2132_s5 + $0x118] sm:$0xf0]  ;;  %v1509_v6 = vor.u32 %v1767_v0, %v1506_v1  ;;  %s397_s25 = scalar_lea.vmem %s2557_s2, %s2573_s20  ;;  %s1346_s30 = scalar_lea.vmem (%p1982_p6), %s2558_s3, %s1830_s27 }
  0x8a   : > { %917 = vmatpush.bf16.msrb.mxu3 %v1717_v12  ;;  %v1637_v7 = vor.u32 %v1799_v2, %v1634_v3  ;;  %v2290_v8 = vld [vmem:[%s397_s25] sm:$0xf] }
  0x8b   : > { %v958_v10 = vperm.slane %v2290_v8, 0  ;;  %v959_v14 = vperm.slane %v2290_v8, 1 }
  0x8c   : > { %876 = vmatpush.bf16.msrb.mxu0 %v1569_v18 }
  0x8d   : > { %890 = vmatpush.bf16.msrb.mxu1 %v1697_v19  ;;  %904 = vmatpush.bf16.msrb.mxu2 %v1573_v20 }
  0x8e   : > { %918 = vmatpush.bf16.msrb.mxu3 %v1701_v24 }
  0x90   : > { %877 = vmatpush.bf16.msrb.mxu0 %v1553_v30 }
  0x91   : > { %891 = vmatpush.bf16.msrb.mxu1 %v1681_v31  ;;  %905 = vmatpush.bf16.msrb.mxu2 %v1557_v32 }
  0x92   : > { %919 = vmatpush.bf16.msrb.mxu3 %v1685_v36 }
  0x94   : > { %878 = vmatpush.bf16.msrb.mxu0 %v1537_v42 }
  0x95   : > { %892 = vmatpush.bf16.msrb.mxu1 %v1665_v43  ;;  %906 = vmatpush.bf16.msrb.mxu2 %v1541_v44 }
  0x96   : > { %920 = vmatpush.bf16.msrb.mxu3 %v1669_v48 }
  0x98   : > { %879 = vmatpush.bf16.msrb.mxu0 %v1521_v56 }
  0x99   : > { %893 = vmatpush.bf16.msrb.mxu1 %v1649_v57  ;;  %907 = vmatpush.bf16.msrb.mxu2 %v1525_v58 }
  0x9a   : > { %921 = vmatpush.bf16.msrb.mxu3 %v1653_v62 }
  0x9c   : > { %880 = vmatpush.bf16.msrb.mxu0 %v1505_v4 }
  0x9d   : > { %894 = vmatpush.bf16.msrb.mxu1 %v1633_v5  ;;  %908 = vmatpush.bf16.msrb.mxu2 %v1509_v6 }
  0x9e   : > { %922 = vmatpush.bf16.msrb.mxu3 %v1637_v7 }
  0x9f   : > { %881 = vmatmul.bf16.vlgmr.msrb.gmra.mxu0 %v2221_v51 }
  0xa0   : > { %895 = vmatmul.bf16.vlgmr.msrb.gmra.mxu1 %v2226_v55  ;;  %909 = vmatmul.bf16.vlgmr.msrb.gmra.mxu2 %v2221_v51 }
  0xa1   : > { %923 = vmatmul.bf16.vlgmr.msrb.gmra.mxu3 %v2226_v55 }
  0xfc   : > { %v826_v9 = vpop.f32.mrf.mxu0 }
  0xfd   : > { %v840_v11 = vpop.f32.mrf.mxu1 }
  0xfe   : > { %v841_v12 = vadd.f32 %v840_v11, %v826_v9 }
 0x100   : > { %v2293_v13 = vadd.f32 %v958_v10, %v841_v12 }
 0x102   : > { %v2296_v51 = vmul.f32 0.70710677, %v2293_v13 }
 0x104   : > { %v990_v15 = vmul.f32 %v2296_v51, %v2296_v51  ;;  %v828_v17 = vpop.f32.mrf.mxu0 }
 0x105   : > { %v854_v55 = vpop.f32.mrf.mxu2  ;;  %v842_v19 = vpop.f32.mrf.mxu1 }
 0x106   : > { %v868_v16 = vpop.f32.mrf.mxu3  ;;  %v2301_v20 = vmin.f32 %v990_v15, 16.0  ;;  %v843_v21 = vadd.f32 %v842_v19, %v828_v17 }
 0x107   : > { %v869_v18 = vadd.f32 %v868_v16, %v854_v55 }
 0x108   : > { %v992_v23 = vmul.f32 2.1237322e-06, %v2301_v20  ;;  %v1003_v24 = vmul.f32 3.8918573e-05, %v2301_v20  ;;  %v2307_v25 = vadd.f32 %v958_v10, %v843_v21 }
 0x109   : > { %v2303_v22 = vadd.f32 %v959_v14, %v869_v18 }
 0x10a   : > { %v993_v27 = vadd.f32 0.00028619796, %v992_v23  ;;  %v1004_v28 = vadd.f32 0.001143296, %v1003_v24  ;;  %v2315_v30 = vmul.f32 0.70710677, %v2307_v25 }
 0x10b   : > { %v2310_v26 = vmul.f32 0.70710677, %v2303_v22 }
 0x10c   : > { %v994_v32 = vmul.f32 %v993_v27, %v2301_v20  ;;  %v1005_v33 = vmul.f32 %v1004_v28, %v2301_v20  ;;  %v1150_v36 = vmul.f32 %v2315_v30, %v2315_v30 }
 0x10d   : > { %v1030_v29 = vmul.f32 %v2310_v26, %v2310_v26  ;;  %v856_v31 = vpop.f32.mrf.mxu2 }
 0x10e   : > { %v870_v34 = vpop.f32.mrf.mxu3  ;;  %v995_v38 = vadd.f32 0.0036580483, %v994_v32  ;;  %v1006_v39 = vadd.f32 0.014752088, %v1005_v33  ;;  %v2321_v42 = vmin.f32 %v1150_v36, 16.0  ;;  %v960_v33 = vperm.slane %v2290_v8, 2 }
 0x10f   : > { %v1031_v35 = vmin.f32 %v1030_v29, 16.0  ;;  %v871_v37 = vadd.f32 %v870_v34, %v856_v31 }
 0x110   : > { %v996_v43 = vmul.f32 %v995_v38, %v2301_v20  ;;  %v1007_v44 = vmul.f32 %v1006_v39, %v2301_v20  ;;  %v1152_v48 = vmul.f32 2.1237322e-06, %v2321_v42  ;;  %v1163_v50 = vmul.f32 3.8918573e-05, %v2321_v42 }
 0x111   : > { %v1032_v40 = vmul.f32 2.1237322e-06, %v1031_v35  ;;  %v1043_v41 = vmul.f32 3.8918573e-05, %v1031_v35  ;;  %v2325_v45 = vadd.f32 %v959_v14, %v871_v37 }
 0x112   : > { %v1008_v49 = vadd.f32 0.112945676, %v1007_v44  ;;  %v1153_v54 = vadd.f32 0.00028619796, %v1152_v48  ;;  %v997_v56 = vadd.f32 0.05243302, %v996_v43 }
 0x113   : > { %v1033_v46 = vadd.f32 0.00028619796, %v1032_v40  ;;  %v1044_v47 = vadd.f32 0.001143296, %v1043_v41  ;;  %v1164_v58 = vadd.f32 0.001143296, %v1163_v50 }
 0x114   : > { %v1009_v57 = vmul.f32 %v1008_v49, %v2301_v20  ;;  %v2331_v59 = vmul.f32 0.70710677, %v2325_v45  ;;  %v1154_v62 = vmul.f32 %v1153_v54, %v2321_v42  ;;  %v998_v5 = vmul.f32 %v997_v56, %v2301_v20 }
 0x115   : > { %v1034_v52 = vmul.f32 %v1033_v46, %v1031_v35  ;;  %v1045_v53 = vmul.f32 %v1044_v47, %v1031_v35  ;;  %v1165_v0 = vmul.f32 %v1164_v58, %v2321_v42  ;;  %v2362_v54 = vmul.f32 0.5, %v2303_v22 }
 0x116   : > { %v1010_v63 = vadd.f32 0.4994258, %v1009_v57  ;;  %v1190_v1 = vmul.f32 %v2331_v59, %v2331_v59  ;;  %v1155_v4 = vadd.f32 0.0036580483, %v1154_v62  ;;  %v999_v21 = vadd.f32 0.18741608, %v998_v5 }
 0x117   : > { %v1035_v60 = vadd.f32 0.0036580483, %v1034_v52  ;;  %v1046_v61 = vadd.f32 0.014752088, %v1045_v53  ;;  %v1166_v7 = vadd.f32 0.014752088, %v1165_v0 }
 0x118   : > { %v1011_v6 = vmul.f32 %v1010_v63, %v2301_v20  ;;  %v2339_v9 = vmin.f32 %v1190_v1, 16.0  ;;  %v1156_v12 = vmul.f32 %v1155_v4, %v2321_v42  ;;  %v1000_v36 = vmul.f32 %v999_v21, %v2301_v20 }
 0x119   : > { %v1036_v2 = vmul.f32 %v1035_v60, %v1031_v35  ;;  %v1047_v3 = vmul.f32 %v1046_v61, %v1031_v35  ;;  %v1167_v14 = vmul.f32 %v1166_v7, %v2321_v42  ;;  %v2358_v20 = vmul.f32 0.5, %v2293_v13 }
 0x11a   : > { %v1012_v55 = vadd.f32 1.0, %v1011_v6  ;;  %v1192_v15 = vmul.f32 2.1237322e-06, %v2339_v9  ;;  %v1203_v23 = vmul.f32 3.8918573e-05, %v2339_v9  ;;  %v961_v6 = vperm.slane %v2290_v8, 3 }
 0x11b   : > { %v1037_v10 = vadd.f32 0.05243302, %v1036_v2  ;;  %v1048_v11 = vadd.f32 0.112945676, %v1047_v3  ;;  %v1157_v28 = vadd.f32 0.05243302, %v1156_v12 }
 0x11c   : > { %v882_v18 = vpop.f32.mrf.mxu0  ;;  %1871 = vrcp.f32 %v1012_v55  ;;  %v1168_v29 = vadd.f32 0.112945676, %v1167_v14  ;;  %v1193_v31 = vadd.f32 0.00028619796, %v1192_v15  ;;  %v1204_v39 = vadd.f32 0.001143296, %v1203_v23 }
 0x11d   : > { %v1038_v16 = vmul.f32 %v1037_v10, %v1031_v35  ;;  %v1049_v17 = vmul.f32 %v1048_v11, %v1031_v35  ;;  %v896_v19 = vpop.f32.mrf.mxu1  ;;  %v1158_v43 = vmul.f32 %v1157_v28, %v2321_v42  ;;  %v1022_v52 = vand.u32 2147483647, %v1012_v55 }
 0x11e   : > { %v897_v32 = vadd.f32 %v896_v19, %v882_v18  ;;  %v1169_v37 = vmul.f32 %v1168_v29, %v2321_v42  ;;  %v1194_v38 = vmul.f32 %v1193_v31, %v2339_v9  ;;  %v1205_v48 = vmul.f32 %v1204_v39, %v2339_v9 }
 0x11f   : > { %v1039_v24 = vadd.f32 0.18741608, %v1038_v16  ;;  %v1050_v27 = vadd.f32 0.4994258, %v1049_v17  ;;  %v1024_v53 = vand.u32 2147483648, %v1012_v55  ;;  %vm1018_vm1 = vweird.f32 %v1012_v55 }
 0x120   : > { %v1170_v46 = vadd.f32 0.4994258, %v1169_v37  ;;  %v1195_v47 = vadd.f32 0.0036580483, %v1194_v38  ;;  %v2355_v49 = vadd.f32 %v960_v33, %v897_v32  ;;  %v1206_v60 = vadd.f32 0.014752088, %v1205_v48 }
 0x121   : > { %v1051_v34 = vmul.f32 %v1050_v27, %v1031_v35  ;;  %v1040_v40 = vmul.f32 %v1039_v24, %v1031_v35  ;;  %v1001_v35 = vadd.f32 1.1283791, %v1000_v36  ;;  %v1159_v62 = vadd.f32 0.18741608, %v1158_v43 }
 0x122   : > { %v1872_v44 = vpop.eup %1871  ;;  %v1171_v57 = vmul.f32 %v1170_v46, %v2321_v42  ;;  %v1196_v58 = vmul.f32 %v1195_v47, %v2339_v9  ;;  %v2367_v13 = vmul.f32 0.70710677, %v2355_v49  ;;  %v1207_v2 = vmul.f32 %v1206_v60, %v2339_v9 }
 0x123   : > { %v2349_v41 = vadd.f32 1.0, %v1051_v34  ;;  %v1014_v50 = vmul.f32 %v1872_v44, %v1012_v55  ;;  %vm1019_vm0 = vweird.f32 %v1872_v44  ;;  %v1041_v61 = vadd.f32 1.1283791, %v1040_v40  ;;  %v910_v4 = vpop.f32.mrf.mxu2 }
 0x124   : > { %v2369_v0 = vadd.f32 1.0, %v1171_v57  ;;  %v1197_v1 = vadd.f32 0.05243302, %v1196_v58  ;;  %v1002_v22 = vmul.f32 %v1001_v35, %v2296_v51  ;;  %v1070_v3 = vmul.f32 %v2367_v13, %v2367_v13  ;;  %v924_v5 = vpop.f32.mrf.mxu3  ;;  %vm1020_vm3 = vmor %vm1018_vm1, %vm1019_vm0  ;;  %v884_v27 = vpop.f32.mrf.mxu0 }
 0x125   : > { %1873 = vrcp.f32 %v2349_v41  ;;  %v1015_v56 = vsub.f32 1.0, %v1014_v50  ;;  %vm1023_vm2 = vcmp.eq.f32.partialorder %v1022_v52, 8.507059e+37  ;;  %v1025_v11 = vor.u32 1.1754944e-38, %v1024_v53  ;;  %v898_v28 = vpop.f32.mrf.mxu1 }
 0x126   : > { %1875 = vrcp.f32 %v2369_v0  ;;  %v1042_v12 = vmul.f32 %v1041_v61, %v2310_v26  ;;  %v1062_v55 = vand.u32 2147483647, %v2349_v41  ;;  %v1160_v14 = vmul.f32 %v1159_v62, %v2321_v42 }
 0x127   : > { %v1016_v63 = vmul.f32 %v1872_v44, %v1015_v56  ;;  %v1198_v16 = vmul.f32 %v1197_v1, %v2339_v9  ;;  %v1208_v17 = vadd.f32 0.112945676, %v1207_v2  ;;  %v2383_v18 = vmin.f32 %v1070_v3, 16.0 }
 0x128   : > { %v1064_v23 = vand.u32 2147483648, %v2349_v41  ;;  %v925_v24 = vadd.f32 %v924_v5, %v910_v4  ;;  %vm1058_vm4 = vweird.f32 %v2349_v41  ;;  %v1161_v32 = vadd.f32 1.1283791, %v1160_v14 }
 0x129   : > { %v1017_v10 = vadd.f32 %v1872_v44, %v1016_v63  ;;  %v1209_v29 = vmul.f32 %v1208_v17, %v2339_v9  ;;  %v1083_v42 = vmul.f32 3.8918573e-05, %v2383_v18  ;;  %v1072_v34 = vmul.f32 2.1237322e-06, %v2383_v18 }
 0x12a   : > { %vm2390_vm6 = vcmp.eq.f32.partialorder %v1062_v55, 8.507059e+37  ;;  %v1199_v38 = vadd.f32 0.18741608, %v1198_v16  ;;  %v899_v40 = vadd.f32 %v898_v28, %v884_v27  ;;  %v2397_v47 = vadd.f32 %v961_v6, %v925_v24 }
 0x12b   : > { %v1874_v7 = vpop.eup %1873  ;;  %v1021_v15 = vsel %vm1020_vm3, %v1872_v44, %v1017_v10  ;;  %v1210_v39 = vadd.f32 0.4994258, %v1209_v29  ;;  %v1065_v44 = vor.u32 1.1754944e-38, %v1064_v23  ;;  %v1182_v50 = vand.u32 2147483647, %v2369_v0  ;;  %v912_v60 = vpop.f32.mrf.mxu2 }
 0x12c   : > { %v1054_v51 = vmul.f32 %v1874_v7, %v2349_v41  ;;  %v1026_v19 = vsel %vm1023_vm2, %v1025_v11, %v1021_v15  ;;  %vm1059_vm5 = vweird.f32 %v1874_v7  ;;  %v1876_v36 = vpop.eup %1875  ;;  %v1084_v52 = vadd.f32 0.001143296, %v1083_v42  ;;  %v926_v61 = vpop.f32.mrf.mxu3 }
 0x12d   : > { %v1027_v26 = vmul.f32 %v1026_v19, %v1002_v22  ;;  %v1174_v46 = vmul.f32 %v1876_v36, %v2369_v0  ;;  %vm1060_vm7 = vmor %vm1058_vm4, %vm1059_vm5  ;;  %v1211_v35 = vmul.f32 %v1210_v39, %v2339_v9  ;;  %v1184_v57 = vand.u32 2147483648, %v2369_v0 }
 0x12e   : > { %v1055_v21 = vsub.f32 1.0, %v1054_v51  ;;  %v1073_v58 = vadd.f32 0.00028619796, %v1072_v34  ;;  %v1200_v63 = vmul.f32 %v1199_v38, %v2339_v9  ;;  %v2411_v41 = vadd.f32 %v960_v33, %v899_v40 }
 0x12f   : > { %v1750_v48 = vclamps-f32 %v1027_v26, 1.0  ;;  %v1175_v56 = vsub.f32 1.0, %v1174_v46  ;;  %v2407_v1 = vadd.f32 1.0, %v1211_v35  ;;  %v1085_v3 = vmul.f32 %v1084_v52, %v2383_v18 }
 0x130   : > { %v1056_v31 = vmul.f32 %v1874_v7, %v1055_v21  ;;  %v2415_v4 = vmul.f32 0.70710677, %v2397_v47  ;;  %vm1179_vm8 = vweird.f32 %v1876_v36  ;;  %v1074_v11 = vmul.f32 %v1073_v58, %v2383_v18 }
 0x131   : > { %v1176_v22 = vmul.f32 %v1876_v36, %v1175_v56  ;;  %v1310_v5 = vadd.f32 1.0, %v1750_v48  ;;  %1877 = vrcp.f32 %v2407_v1  ;;  %v1086_v51 = vadd.f32 0.014752088, %v1085_v3 }
 0x132   : > { %v1057_v43 = vadd.f32 %v1874_v7, %v1056_v31  ;;  %v1162_v33 = vmul.f32 %v1161_v32, %v2315_v30  ;;  %vm1178_vm9 = vweird.f32 %v2369_v0  ;;  %v1110_v55 = vmul.f32 %v2415_v4, %v2415_v4 }
 0x133   : > { %v1177_v10 = vadd.f32 %v1876_v36, %v1176_v22  ;;  %vm2425_vm10 = vmor %vm1178_vm9, %vm1179_vm8  ;;  %vm2429_vm11 = vcmp.eq.f32.partialorder %v1182_v50, 8.507059e+37  ;;  %v1185_v17 = vor.u32 1.1754944e-38, %v1184_v57  ;;  %v1087_v30 = vmul.f32 %v1086_v51, %v2383_v18 }
 0x134   : > { %v1061_v53 = vsel %vm1060_vm7, %v1874_v7, %v1057_v43  ;;  %v927_v7 = vadd.f32 %v926_v61, %v912_v60  ;;  %v1318_v0 = vmul.f32 %v1310_v5, %v2358_v20  ;;  %v2437_v21 = vmin.f32 %v1110_v55, 16.0 }
 0x135   : > { %v1066_v62 = vsel %vm2390_vm6, %v1065_v44, %v1061_v53  ;;  %v1181_v19 = vsel %vm2425_vm10, %v1876_v36, %v1177_v10  ;;  %v2440_v23 = vmul.f32 0.70710677, %v2411_v41  ;;  %v1075_v27 = vadd.f32 0.0036580483, %v1074_v11 }
 0x136   : > { %v1067_v2 = vmul.f32 %v1066_v62, %v1042_v12  ;;  %v1201_v12 = vadd.f32 1.1283791, %v1200_v63  ;;  %v1088_v28 = vadd.f32 0.112945676, %v1087_v30  ;;  %v2445_v26 = vadd.f32 %v961_v6, %v927_v7 }
 0x137   : > { %v1878_v29 = vpop.eup %1877  ;;  %v1112_v20 = vmul.f32 2.1237322e-06, %v2437_v21  ;;  %v1123_v31 = vmul.f32 3.8918573e-05, %v2437_v21  ;;  %v1230_v32 = vmul.f32 %v2440_v23, %v2440_v23  ;;  %v1222_v8 = vand.u32 2147483647, %v2407_v1 }
 0x138   : > { %v1751_v9 = vclamps-f32 %v1067_v2, 1.0  ;;  %v1202_v42 = vmul.f32 %v1201_v12, %v2331_v59  ;;  %v1214_v36 = vmul.f32 %v1878_v29, %v2407_v1  ;;  %v1224_v6 = vand.u32 2147483648, %v2407_v1 }
 0x139   : > { %v1089_v37 = vmul.f32 %v1088_v28, %v2383_v18  ;;  %v1113_v59 = vadd.f32 0.00028619796, %v1112_v20  ;;  %v1124_v38 = vadd.f32 0.001143296, %v1123_v31  ;;  %v1076_v40 = vmul.f32 %v1075_v27, %v2383_v18 }
 0x13a   : > { %v1311_v14 = vadd.f32 1.0, %v1751_v9  ;;  %v1215_v39 = vsub.f32 1.0, %v1214_v36  ;;  %v2462_v43 = vmin.f32 %v1230_v32, 16.0  ;;  %v2465_v44 = vmul.f32 0.70710677, %v2445_v26 }
 0x13b   : > { %v1090_v48 = vadd.f32 0.4994258, %v1089_v37  ;;  %v1114_v50 = vmul.f32 %v1113_v59, %v2437_v21  ;;  %v1125_v35 = vmul.f32 %v1124_v38, %v2437_v21  ;;  %vm1219_vm12 = vweird.f32 %v1878_v29 }
 0x13c   : > { %v1319_v24 = vmul.f32 %v1311_v14, %v2362_v54  ;;  %v1186_v54 = vsel %vm2429_vm11, %v1185_v17, %v1181_v19  ;;  %v1216_v52 = vmul.f32 %v1878_v29, %v1215_v39  ;;  %v1232_v53 = vmul.f32 2.1237322e-06, %v2462_v43 }
 0x13d   : > { %v1187_v46 = vmul.f32 %v1186_v54, %v1162_v33  ;;  %v1243_v56 = vmul.f32 3.8918573e-05, %v2462_v43  ;;  %vm1218_vm13 = vweird.f32 %v2407_v1  ;;  %v1091_v57 = vmul.f32 %v1090_v48, %v2383_v18 }
 0x13e   : > { %v1326_v34 = vpack.c.bf16 %v1319_v24, %v1318_v0  ;;  %v1115_v58 = vadd.f32 0.0036580483, %v1114_v50  ;;  %v1126_v60 = vadd.f32 0.014752088, %v1125_v35  ;;  %v1217_v61 = vadd.f32 %v1878_v29, %v1216_v52  ;;  %vm1220_vm15 = vmor %vm1218_vm13, %vm1219_vm12 }
 0x13f   : > { %vm1223_vm14 = vcmp.eq.f32.partialorder %v1222_v8, 8.507059e+37  ;;  %v1244_v62 = vadd.f32 0.001143296, %v1243_v56  ;;  %v1270_v63 = vmul.f32 %v2465_v44, %v2465_v44  ;;  %v1225_v2 = vor.u32 1.1754944e-38, %v1224_v6 }
 0x140   : > { %1330 = vst [vmem:[%s2458_s12] sm:$0xff] %v1326_v34  ;;  %v1077_v22 = vadd.f32 0.05243302, %v1076_v40  ;;  %v2475_v3 = vadd.f32 1.0, %v1091_v57  ;;  %v1127_v5 = vmul.f32 %v1126_v60, %v2437_v21  ;;  %v1754_v7 = vclamps-f32 %v1187_v46, 1.0 }
 0x141   : > { %v1221_v9 = vsel %vm1220_vm15, %v1878_v29, %v1217_v61  ;;  %v1233_v1 = vadd.f32 0.00028619796, %v1232_v53  ;;  %v1245_v10 = vmul.f32 %v1244_v62, %v2462_v43  ;;  %v1116_v51 = vmul.f32 %v1115_v58, %v2437_v21 }
 0x142   : > { %v1226_v11 = vsel %vm1223_vm14, %v1225_v2, %v1221_v9  ;;  %1879 = vrcp.f32 %v2475_v3  ;;  %v2481_v33 = vmin.f32 %v1270_v63, 16.0  ;;  %v1128_v55 = vadd.f32 0.112945676, %v1127_v5 }
 0x143   : > { %v1227_v12 = vmul.f32 %v1226_v11, %v1202_v42  ;;  %v978_v14 = vmul.f32 0.5, %v2307_v25  ;;  %v1246_v15 = vadd.f32 0.014752088, %v1245_v10  ;;  %v1314_v16 = vadd.f32 1.0, %v1754_v7 }
 0x144   : > { %v1078_v30 = vmul.f32 %v1077_v22, %v2383_v18  ;;  %v1129_v0 = vmul.f32 %v1128_v55, %v2437_v21  ;;  %v1117_v19 = vadd.f32 0.05243302, %v1116_v51  ;;  %v1234_v24 = vmul.f32 %v1233_v1, %v2462_v43 }
 0x145   : > { %v1755_v17 = vclamps-f32 %v1227_v12, 1.0  ;;  %v1247_v27 = vmul.f32 %v1246_v15, %v2462_v43  ;;  %v1272_v28 = vmul.f32 2.1237322e-06, %v2481_v33  ;;  %v979_v29 = vmul.f32 0.5, %v2325_v45 }
 0x146   : > { %v1130_v20 = vadd.f32 0.4994258, %v1129_v0  ;;  %v1283_v25 = vmul.f32 3.8918573e-05, %v2481_v33  ;;  %v1322_v54 = vmul.f32 %v1314_v16, %v978_v14  ;;  %v1079_v6 = vadd.f32 0.18741608, %v1078_v30 }
 0x147   : > { %v1315_v42 = vadd.f32 1.0, %v1755_v17  ;;  %v1248_v32 = vadd.f32 0.112945676, %v1247_v27  ;;  %v1273_v34 = vadd.f32 0.00028619796, %v1272_v28  ;;  %v1118_v40 = vmul.f32 %v1117_v19, %v2437_v21 }
 0x148   : > { %v1880_v31 = vpop.eup %1879  ;;  %v1131_v37 = vmul.f32 %v1130_v20, %v2437_v21  ;;  %v1235_v59 = vadd.f32 0.0036580483, %v1234_v24  ;;  %v1284_v46 = vadd.f32 0.001143296, %v1283_v25  ;;  %v1080_v56 = vmul.f32 %v1079_v6, %v2383_v18 }
 0x149   : > { %v1323_v36 = vmul.f32 %v1315_v42, %v979_v29  ;;  %v1094_v8 = vmul.f32 %v1880_v31, %v2475_v3  ;;  %v1249_v38 = vmul.f32 %v1248_v32, %v2462_v43  ;;  %v1274_v35 = vmul.f32 %v1273_v34, %v2481_v33 }
 0x14a   : > { %v1132_v48 = vadd.f32 1.0, %v1131_v37  ;;  %v1285_v53 = vmul.f32 %v1284_v46, %v2481_v33  ;;  %v1236_v57 = vmul.f32 %v1235_v59, %v2462_v43  ;;  %vm1099_vm0 = vweird.f32 %v1880_v31 }
 0x14b   : > { %v1328_v39 = vpack.c.bf16 %v1323_v36, %v1322_v54  ;;  %v1095_v45 = vsub.f32 1.0, %v1094_v8  ;;  %v1250_v50 = vadd.f32 0.4994258, %v1249_v38  ;;  %v1119_v60 = vadd.f32 0.18741608, %v1118_v40 }
 0x14c   : > { %1881 = vrcp.f32 %v1132_v48  ;;  %v1104_v62 = vand.u32 2147483648, %v2475_v3  ;;  %v1275_v63 = vadd.f32 0.0036580483, %v1274_v35  ;;  %v1286_v2 = vadd.f32 0.014752088, %v1285_v53 }
 0x14d   : > { %1332 = vst [vmem:[%s2458_s12 + $0x10] sm:$0xff] %v1328_v39  ;;  %v1096_v52 = vmul.f32 %v1880_v31, %v1095_v45  ;;  %v1251_v61 = vmul.f32 %v1250_v50, %v2462_v43  ;;  %vm1098_vm1 = vweird.f32 %v2475_v3  ;;  %v1102_v22 = vand.u32 2147483647, %v2475_v3 }
 0x14e   : > { %v1081_v7 = vadd.f32 1.1283791, %v1080_v56  ;;  %vm1100_vm2 = vmor %vm1098_vm1, %vm1099_vm0  ;;  %v1287_v18 = vmul.f32 %v1286_v2, %v2481_v33  ;;  %v1120_v1 = vmul.f32 %v1119_v60, %v2437_v21  ;;  %v1237_v10 = vadd.f32 0.05243302, %v1236_v57 }
 0x14f   : > { %v1097_v58 = vadd.f32 %v1880_v31, %v1096_v52  ;;  %v2504_v5 = vadd.f32 1.0, %v1251_v61  ;;  %v1105_v51 = vor.u32 1.1754944e-38, %v1104_v62  ;;  %v1276_v12 = vmul.f32 %v1275_v63, %v2481_v33 }
 0x150   : > { %v1288_v55 = vadd.f32 0.112945676, %v1287_v18  ;;  %vm1103_vm3 = vcmp.eq.f32.partialorder %v1102_v22, 8.507059e+37  ;;  %v1082_v16 = vmul.f32 %v1081_v7, %v2367_v13  ;;  %v1121_v17 = vadd.f32 1.1283791, %v1120_v1 }
 0x151   : > { %v1101_v9 = vsel %vm1100_vm2, %v1880_v31, %v1097_v58  ;;  %1883 = vrcp.f32 %v2504_v5  ;;  %v1238_v0 = vmul.f32 %v1237_v10, %v2462_v43  ;;  %v1144_v21 = vand.u32 2147483648, %v1132_v48 }
 0x152   : > { %v1882_v11 = vpop.eup %1881  ;;  %v1106_v3 = vsel %vm1103_vm3, %v1105_v51, %v1101_v9  ;;  %v1289_v15 = vmul.f32 %v1288_v55, %v2481_v33  ;;  %v1277_v19 = vadd.f32 0.05243302, %v1276_v12  ;;  %v1142_v42 = vand.u32 2147483647, %v1132_v48 }
 0x153   : > { %v1134_v14 = vmul.f32 %v1882_v11, %v1132_v48  ;;  %v1107_v28 = vmul.f32 %v1106_v3, %v1082_v16  ;;  %vm1139_vm4 = vweird.f32 %v1882_v11  ;;  %vm1138_vm5 = vweird.f32 %v1132_v48 }
 0x154   : > { %v1290_v24 = vadd.f32 0.4994258, %v1289_v15  ;;  %v1239_v32 = vadd.f32 0.18741608, %v1238_v0  ;;  %vm1140_vm6 = vmor %vm1138_vm5, %vm1139_vm4  ;;  %v1145_v13 = vor.u32 1.1754944e-38, %v1144_v21  ;;  %v1278_v54 = vmul.f32 %v1277_v19, %v2481_v33 }
 0x155   : > { %v1135_v30 = vsub.f32 1.0, %v1134_v14  ;;  %v1752_v8 = vclamps-f32 %v1107_v28, 1.0  ;;  %v1122_v6 = vmul.f32 %v1121_v17, %v2415_v4  ;;  %vm1143_vm7 = vcmp.eq.f32.partialorder %v1142_v42, 8.507059e+37 }
 0x156   : > { %v1291_v25 = vmul.f32 %v1290_v24, %v2481_v33  ;;  %v1240_v45 = vmul.f32 %v1239_v32, %v2462_v43  ;;  %v1264_v46 = vand.u32 2147483648, %v2504_v5  ;;  %v1279_v48 = vadd.f32 0.18741608, %v1278_v54 }
 0x157   : > { %v1884_v27 = vpop.eup %1883  ;;  %v1136_v29 = vmul.f32 %v1882_v11, %v1135_v30  ;;  %v1312_v50 = vadd.f32 1.0, %v1752_v8  ;;  %vm1258_vm9 = vweird.f32 %v2504_v5  ;;  %v1262_v52 = vand.u32 2147483647, %v2504_v5 }
 0x158   : > { %v1254_v20 = vmul.f32 %v1884_v27, %v2504_v5  ;;  %v1292_v36 = vadd.f32 1.0, %v1291_v25  ;;  %vm1259_vm8 = vweird.f32 %v1884_v27  ;;  %v976_v4 = vmul.f32 0.5, %v2355_v49 }
 0x159   : > { %v1137_v31 = vadd.f32 %v1882_v11, %v1136_v29  ;;  %vm1260_vm10 = vmor %vm1258_vm9, %vm1259_vm8  ;;  %v977_v53 = vmul.f32 0.5, %v2397_v47  ;;  %v1241_v57 = vadd.f32 1.1283791, %v1240_v45  ;;  %v1265_v60 = vor.u32 1.1754944e-38, %v1264_v46 }
 0x15a   : > { %v1255_v34 = vsub.f32 1.0, %v1254_v20  ;;  %1885 = vrcp.f32 %v1292_v36  ;;  %v1280_v61 = vmul.f32 %v1279_v48, %v2481_v33  ;;  %v1320_v62 = vmul.f32 %v1312_v50, %v976_v4 }
 0x15b   : > { %v1141_v37 = vsel %vm1140_vm6, %v1882_v11, %v1137_v31  ;;  %vm1263_vm11 = vcmp.eq.f32.partialorder %v1262_v52, 8.507059e+37  ;;  %v1242_v5 = vmul.f32 %v1241_v57, %v2440_v23  ;;  %v1304_v9 = vand.u32 2147483648, %v1292_v36 }
 0x15c   : > { %v1146_v59 = vsel %vm1143_vm7, %v1145_v13, %v1141_v37  ;;  %v1256_v38 = vmul.f32 %v1884_v27, %v1255_v34  ;;  %v1281_v18 = vadd.f32 1.1283791, %v1280_v61  ;;  %v1302_v10 = vand.u32 2147483647, %v1292_v36 }
 0x15d   : > { %v1147_v39 = vmul.f32 %v1146_v59, %v1122_v6  ;;  %vm1298_vm13 = vweird.f32 %v1292_v36  ;;  %v1305_v33 = vor.u32 1.1754944e-38, %v1304_v9  ;;  %v980_v16 = vmul.f32 0.5, %v2411_v41  ;;  %v1363_v41 = vld [vmem:[%s2458_s12 + $0x10] sm:$0xff] (%p1982_p6) }
 0x15e   : > { %v1257_v40 = vadd.f32 %v1884_v27, %v1256_v38  ;;  %v1282_v12 = vmul.f32 %v1281_v18, %v2465_v44  ;;  %vm1303_vm15 = vcmp.eq.f32.partialorder %v1302_v10, 8.507059e+37  ;;  %v981_v17 = vmul.f32 0.5, %v2445_v26  ;;  %v1359_v44 = vld [vmem:[%s2458_s12] sm:$0xff] (%p1982_p6)  ;;  %1364 = vst [vmem:[%s1346_s30 + $0x20] sm:$0xff] (%p1982_p6), %v1363_v41 }
 0x15f   : > { %v1753_v35 = vclamps-f32 %v1147_v39, 1.0  ;;  %1360 = vst [vmem:[%s1346_s30] sm:$0xff] (%p1982_p6), %v1359_v44 }
 0x160   : > { %v1261_v43 = vsel %vm1260_vm10, %v1884_v27, %v1257_v40  ;;  %v1886_v58 = vpop.eup %1885 }
 0x161   : > { %v1313_v56 = vadd.f32 1.0, %v1753_v35  ;;  %v1294_v2 = vmul.f32 %v1886_v58, %v1292_v36  ;;  %v1266_v22 = vsel %vm1263_vm11, %v1265_v60, %v1261_v43  ;;  %vm1299_vm12 = vweird.f32 %v1886_v58 }
 0x162   : > { %v1267_v47 = vmul.f32 %v1266_v22, %v1242_v5  ;;  %vm1300_vm14 = vmor %vm1298_vm13, %vm1299_vm12 }
 0x163   : > { %v1321_v63 = vmul.f32 %v1313_v56, %v977_v53  ;;  %v1295_v49 = vsub.f32 1.0, %v1294_v2 }
 0x164   : > { %v1756_v51 = vclamps-f32 %v1267_v47, 1.0 }
 0x165   : > { %v1327_v7 = vpack.c.bf16 %v1321_v63, %v1320_v62  ;;  %v1296_v1 = vmul.f32 %v1886_v58, %v1295_v49 }
 0x166   : > { %v1316_v3 = vadd.f32 1.0, %v1756_v51 }
 0x167   : > { %1331 = vst [vmem:[%s2458_s12 + $0x8] sm:$0xff] %v1327_v7  ;;  %v1297_v11 = vadd.f32 %v1886_v58, %v1296_v1 }
 0x168   : > { %v1324_v0 = vmul.f32 %v1316_v3, %v980_v16 }
 0x169   : > { %v1301_v55 = vsel %vm1300_vm14, %v1886_v58, %v1297_v11 }
 0x16a   : > { %v1306_v14 = vsel %vm1303_vm15, %v1305_v33, %v1301_v55 }
 0x16b   : > { %v1307_v23 = vmul.f32 %v1306_v14, %v1282_v12 }
 0x16d   : > { %v1757_v15 = vclamps-f32 %v1307_v23, 1.0 }
 0x16e   : > { %v1361_v24 = vld [vmem:[%s2458_s12 + $0x8] sm:$0xff] (%p1982_p6) }
 0x16f   : > { %v1317_v30 = vadd.f32 1.0, %v1757_v15  ;;  %1362 = vst [vmem:[%s1346_s30 + $0x8] sm:$0xff] (%p1982_p6), %v1361_v24 }
 0x171   : > { %v1325_v21 = vmul.f32 %v1317_v30, %v981_v17  ;;  %1340 = sbr.rel (!%p1982_p6) target bundleno = 382 (0x17e), region = 67 }
 0x173   : > { %v1329_v19 = vpack.c.bf16 %v1325_v21, %v1324_v0 }
 0x175   : > { %1333 = vst [vmem:[%s2458_s12 + $0x18] sm:$0xff] %v1329_v19 }
 0x17c   : > { %v1365_v26 = vld [vmem:[%s2458_s12 + $0x18] sm:$0xff] }
 0x17d   : > { %1366 = vst [vmem:[%s1346_s30 + $0x28] sm:$0xff] %v1365_v26 }
 0x17e PF: > { %s13_s16 = sadd.s32 1, %s1925_s16   ;;  %s2566_s12 = smov %s1913_s13 }
 0x17f   : > { %p10_p12 = scmp.ge.s32.totalorder %s13_s16, 4   ;;  %s2567_s13 = smov %s1987_s22 }
 0x180   : > { %s2568_s14 = smov %s1921_s15  ;;  %s2569_s15 = smov %s2571_s17 }
 0x181   :  { %12 = sbr.rel (!%p10_p12) target bundleno = 3 (0x3), region = 127 }

// kernel: _lambda_.23
= control target key start
LH: loop header
LB: loop body
LE: loop exit
PB: predicated region body
PF: predicated region fallthrough
CT: control target
= control target key end

     0   :  { %9 = vsyncpa [#allocation5], 0  ;;  %s1885_s0 = inlined_call_operand.vmem [shape: bf16[16,1024], index: 0, kind: input, shape index: {}]   ;;  %s1886_s1 = inlined_call_operand.hbm [shape: bf16[1024,256], index: 1, kind: input, shape index: {}]   ;;  %s1887_s2 = inlined_call_operand.vmem [shape: f32[1,256], index: 2, kind: input, shape index: {}]   ;;  %s1888_s3 = inlined_call_operand.vmem [shape: bf16[16,256], index: 3, kind: input, shape index: {}]   ;;  %s1889_s4 = inlined_call_operand.vmem [shape: bf16[16,256], index: 4, kind: output, shape index: {}]  }
   0x1   :  { %11 = vsyncpa [#allocation5 + $0x1], 0  ;;  %s1622_s15 = smov 0   ;;  %s1624_s16 = smov 0  }
   0x2   :  { %s1626_s17 = smov 0   ;;  %s1628_s18 = smov 0  }
   0x3   :  { %s1630_s19 = smov 0   ;;  %s1632_s20 = smov 0  }
   0x4 LB: > { %s1097_s21 = sadd.s32 4294967295, %s1592_s20   ;;  %s29_s22 = sadd.s32 1, %s1588_s19  ;;  %s1592_s20 = sphi %s1632_s20, %s17_s20   ;;  %s1588_s19 = sphi %s1630_s19, %s1896_s19   ;;  %s1584_s18 = sphi %s1628_s18, %s1895_s18   ;;  %s1580_s17 = sphi %s1626_s17, %s1894_s17   ;;  %s1576_s16 = sphi %s1624_s16, %s1893_s16   ;;  %s1572_s15 = sphi %s1622_s15, %s1892_s15  }
   0x5   : > { %p30_p0 = scmp.ge.s32.totalorder %s29_s22, 2  ;;  %s45_s23 = sadd.s32 1, %s1580_s17 }
   0x6   : > { %p52_p1 = scmp.ne.s32.totalorder %s1580_s17, %s1576_s16  ;;  %p53_p2 = scmp.eq.s32.totalorder %s1592_s20, 0 }
   0x7   : > { %s1898_s22 = smov (%p30_p0, %s29_s22), 0  ;;  %p86_p4 = scmp.ne.s32.totalorder %s1576_s16, %s1572_s15 }
   0x8   : > { %p1658_p3 = por %p53_p2, %p52_p1  ;;  %s41_s25 = ssub.s32 %s1588_s19, %s1898_s22 }
   0x9   : > { %p87_p5 = scmp.eq.s32.totalorder %s1097_s21, 0  ;;  %p43_p6 = scmp.eq.s32.totalorder %s41_s25, 0 }
   0xa   : > { %p1101_p8 = scmp.ge.s32.totalorder %s1592_s20, 2 }
   0xb   : > { %p1665_p7 = por %p87_p5, %p86_p4 }
   0xc   : > { %s1670_s27 = scalar_select %p43_p6, %s1580_s17, %s45_s23  }
   0xd   : > { %211 = sbr.rel (%p1101_p8) target bundleno = 32 (0x20), region = 24 }
  0x12   : > { %214 = sbr.rel (!%p1658_p3) target bundleno = 26 (0x1a), region = 28  ;;  %s216_s28 = sand.u32 (%p1658_p3), 1, %s1580_s17  }
  0x13   : > { %s1390_s29 = sshll.u32 (%p1658_p3), %s1588_s19, 4  ;;  %s1102_s30 = sshll.u32 (%p1658_p3), %s216_s28, 5 }
  0x14   : > { %s224_s7 = scalar_lea.vmem (%p1658_p3), %s1885_s0, %s1390_s29  ;;  %s218_s8 = scalar_lea.vmem (%p1658_p3), [#allocation3], %s1102_s30 }
  0x15   : > { %v237_v0 = vld [vmem:[%s224_s7] sm:$0xff] (%p1658_p3)  ;;  %v239_v1 = vld [vmem:[%s224_s7 + $0x8] sm:$0xff] (%p1658_p3) }
  0x16   : > { %v241_v2 = vld [vmem:[%s224_s7 + $0x20] sm:$0xff] (%p1658_p3)  ;;  %238 = vst [vmem:[%s218_s8] sm:$0xff] (%p1658_p3), %v237_v0  ;;  %v243_v3 = vld [vmem:[%s224_s7 + $0x28] sm:$0xff] (%p1658_p3) }
  0x17   : > { %240 = vst [vmem:[%s218_s8 + $0x8] sm:$0xff] %v239_v1 }
  0x18   : > { %242 = vst [vmem:[%s218_s8 + $0x10] sm:$0xff] %v241_v2 }
  0x19   : > { %244 = vst [vmem:[%s218_s8 + $0x18] sm:$0xff] %v243_v3 }
  0x1a PF: > { %s251_s9 = sand.u32 1, %s1580_s17   ;;  %s1392_s10 = sshll.u32 %s1588_s19, 9 }
  0x1b   : > { %s1105_s11 = sshll.u32 %s251_s9, 9  ;;  %s263_s14 = scalar_lea.hbm %s1886_s1, %s1392_s10 }
  0x1c   : > { %s264_s15 = sshll.u32 %s263_s14, 4  ;;  %s255_s21 = scalar_lea.vmem [#allocation4], %s1105_s11  ;;  %s265_s15 = int_to_ptr.hbm [resolvable:$true] %s264_s15 }
  0x1d   : > { %s266_s23 = sshll.u32 %s255_s21, 4  ;;  %s252_s25 = scalar_lea.sflag [#allocation5], %s251_s9  ;;  %s267_s23 = int_to_ptr.vmem [resolvable:$true] %s266_s23 }
  0x1e   : > { %s1594_s28 = smov 128   ;;  %s1595_s29 = smov 8  }
  0x1f   : > { %1461 = dma.hbm_to_vmem [thread:$0]  (%p1658_p3), %s265_s15, 8192, %s267_s23, %s252_s25, %s1594_s28, %s1594_s28, %s1595_s29  }
  0x20 PF: > { %p1109_p9 = scmp.ge.s32.totalorder %s1592_s20, 1  ;;  %p274_p10 = scmp.lt.s32.totalorder %s1592_s20, 3 }
  0x22   : > { %p275_p11 = pnand %p1109_p9, %p274_p10 }
  0x23   : > { %s281_s30 = sand.u32 (!%p275_p11), 1, %s1576_s16  }
  0x24   : > { %278 = sbr.rel (%p275_p11) target bundleno = 283 (0x11b), region = 55  ;;  %s1110_s5 = sshll.u32 (!%p275_p11), %s281_s30, 5 }
  0x25   : > { %s1111_s6 = sshll.u32 (!%p275_p11), %s281_s30, 9  ;;  %s1690_s7 = scalar_lea.vmem (!%p275_p11), [#allocation3], %s1110_s5 }
  0x26   : > { %s288_s8 = scalar_lea.sflag (!%p275_p11), [#allocation5], %s281_s30  ;;  %s1692_s9 = scalar_lea.vmem (!%p275_p11), [#allocation4], %s1111_s6 }
  0x29   : > { %1567 = dma.done.wait (%p1665_p7), %s288_s8, 8192  }
  0x2a   : > { %1569 = vsyncadd (%p1665_p7), %s288_s8, 4294959104  ;;  %p1112_p12 = scmp.ne.s32.totalorder %s1584_s18, 0 }
  0x2c   : > { %376 = sbr.rel (%p1112_p12) target bundleno = 54 (0x36), region = 67 }
  0x31   : > { %v1596_v4 = vmov 0.0  }
  0x32   : > { %377 = vst [vmem:[#allocation2 + $0x10] sm:$0xff] %v1596_v4 }
  0x33   : > { %378 = vst [vmem:[#allocation2] sm:$0xff] %v1596_v4 }
  0x34   : > { %379 = vst [vmem:[#allocation2 + $0x18] sm:$0xff] %v1596_v4 }
  0x35   : > { %380 = vst [vmem:[#allocation2 + $0x8] sm:$0xff] %v1596_v4 }
  0x36 PF: > { %v1187_v5 = vld [vmem:[%s1692_s9 + $0x70] sm:$0xf]  ;;  %v1412_v6 = vld [vmem:[%s1692_s9 + $0x74] sm:$0xf0]  ;;  %v1179_v16 = vld [vmem:[%s1692_s9 + $0x60] sm:$0xf] }
  0x37   : > { %v1251_v7 = vld [vmem:[%s1692_s9 + $0xf0] sm:$0xf]  ;;  %v1188_v8 = vor.u32 %v1412_v6, %v1187_v5  ;;  %v1428_v9 = vld [vmem:[%s1692_s9 + $0xf4] sm:$0xf0]  ;;  %v1410_v18 = vld [vmem:[%s1692_s9 + $0x64] sm:$0xf0] }
  0x38   : > { %v1315_v10 = vld [vmem:[%s1692_s9 + $0x170] sm:$0xf]  ;;  %v1444_v11 = vld [vmem:[%s1692_s9 + $0x174] sm:$0xf0]  ;;  %v1252_v12 = vor.u32 %v1428_v9, %v1251_v7  ;;  %v1243_v19 = vld [vmem:[%s1692_s9 + $0xe0] sm:$0xf]  ;;  %v1180_v21 = vor.u32 %v1410_v18, %v1179_v16 }
  0x39   : > { %v1316_v13 = vor.u32 %v1444_v11, %v1315_v10  ;;  %v1379_v14 = vld [vmem:[%s1692_s9 + $0x1f0] sm:$0xf]  ;;  %v1460_v15 = vld [vmem:[%s1692_s9 + $0x1f4] sm:$0xf0]  ;;  %793 = vmatpush.bf16.msra.mxu0 %v1188_v8  ;;  %v1426_v20 = vld [vmem:[%s1692_s9 + $0xe4] sm:$0xf0] }
  0x3a   : > { %v1380_v17 = vor.u32 %v1460_v15, %v1379_v14  ;;  %807 = vmatpush.bf16.msra.mxu1 %v1252_v12  ;;  %v1244_v22 = vor.u32 %v1426_v20, %v1243_v19  ;;  %v1307_v23 = vld [vmem:[%s1692_s9 + $0x160] sm:$0xf]  ;;  %v1442_v24 = vld [vmem:[%s1692_s9 + $0x164] sm:$0xf0]  ;;  %v1171_v28 = vld [vmem:[%s1692_s9 + $0x50] sm:$0xf] }
  0x3b   : > { %821 = vmatpush.bf16.msra.mxu2 %v1316_v13  ;;  %v1371_v25 = vld [vmem:[%s1692_s9 + $0x1e0] sm:$0xf]  ;;  %v1308_v26 = vor.u32 %v1442_v24, %v1307_v23  ;;  %v1458_v27 = vld [vmem:[%s1692_s9 + $0x1e4] sm:$0xf0]  ;;  %v1408_v29 = vld [vmem:[%s1692_s9 + $0x54] sm:$0xf0] }
  0x3c   : > { %835 = vmatpush.bf16.msra.mxu3 %v1380_v17  ;;  %v1372_v30 = vor.u32 %v1458_v27, %v1371_v25  ;;  %v1235_v31 = vld [vmem:[%s1692_s9 + $0xd0] sm:$0xf]  ;;  %v1424_v32 = vld [vmem:[%s1692_s9 + $0xd4] sm:$0xf0]  ;;  %v1172_v34 = vor.u32 %v1408_v29, %v1171_v28  ;;  %v1163_v40 = vld [vmem:[%s1692_s9 + $0x40] sm:$0xf] }
  0x3d   : > { %v1299_v33 = vld [vmem:[%s1692_s9 + $0x150] sm:$0xf]  ;;  %794 = vmatpush.bf16.msra.mxu0 %v1180_v21  ;;  %v1440_v35 = vld [vmem:[%s1692_s9 + $0x154] sm:$0xf0]  ;;  %v1236_v38 = vor.u32 %v1424_v32, %v1235_v31  ;;  %v1406_v41 = vld [vmem:[%s1692_s9 + $0x44] sm:$0xf0] }
  0x3e   : > { %v1363_v36 = vld [vmem:[%s1692_s9 + $0x1d0] sm:$0xf]  ;;  %v1456_v37 = vld [vmem:[%s1692_s9 + $0x1d4] sm:$0xf0]  ;;  %808 = vmatpush.bf16.msra.mxu1 %v1244_v22  ;;  %v1300_v39 = vor.u32 %v1440_v35, %v1299_v33  ;;  %v1227_v42 = vld [vmem:[%s1692_s9 + $0xc0] sm:$0xf]  ;;  %v1164_v49 = vor.u32 %v1406_v41, %v1163_v40 }
  0x3f   : > { %822 = vmatpush.bf16.msra.mxu2 %v1308_v26  ;;  %v1364_v43 = vor.u32 %v1456_v37, %v1363_v36  ;;  %v1422_v44 = vld [vmem:[%s1692_s9 + $0xc4] sm:$0xf0]  ;;  %v1291_v45 = vld [vmem:[%s1692_s9 + $0x140] sm:$0xf]  ;;  %v1155_v52 = vld [vmem:[%s1692_s9 + $0x30] sm:$0xf] }
  0x40   : > { %836 = vmatpush.bf16.msra.mxu3 %v1372_v30  ;;  %v1438_v46 = vld [vmem:[%s1692_s9 + $0x144] sm:$0xf0]  ;;  %v1355_v47 = vld [vmem:[%s1692_s9 + $0x1c0] sm:$0xf]  ;;  %v1228_v50 = vor.u32 %v1422_v44, %v1227_v42  ;;  %v1404_v53 = vld [vmem:[%s1692_s9 + $0x34] sm:$0xf0] }
  0x41   : > { %v1454_v48 = vld [vmem:[%s1692_s9 + $0x1c4] sm:$0xf0]  ;;  %795 = vmatpush.bf16.msra.mxu0 %v1172_v34  ;;  %v1292_v51 = vor.u32 %v1438_v46, %v1291_v45  ;;  %v1219_v54 = vld [vmem:[%s1692_s9 + $0xb0] sm:$0xf]  ;;  %v1420_v56 = vld [vmem:[%s1692_s9 + $0xb4] sm:$0xf0]  ;;  %v1156_v61 = vor.u32 %v1404_v53, %v1155_v52 }
  0x42   : > { %809 = vmatpush.bf16.msra.mxu1 %v1236_v38  ;;  %v1356_v55 = vor.u32 %v1454_v48, %v1355_v47  ;;  %v1283_v57 = vld [vmem:[%s1692_s9 + $0x130] sm:$0xf]  ;;  %v1436_v58 = vld [vmem:[%s1692_s9 + $0x134] sm:$0xf0]  ;;  %v1220_v62 = vor.u32 %v1420_v56, %v1219_v54  ;;  %v1147_v0 = vld [vmem:[%s1692_s9 + $0x20] sm:$0xf] }
  0x43   : > { %823 = vmatpush.bf16.msra.mxu2 %v1300_v39  ;;  %v1347_v59 = vld [vmem:[%s1692_s9 + $0x1b0] sm:$0xf]  ;;  %v1452_v60 = vld [vmem:[%s1692_s9 + $0x1b4] sm:$0xf0]  ;;  %v1284_v63 = vor.u32 %v1436_v58, %v1283_v57  ;;  %v1402_v1 = vld [vmem:[%s1692_s9 + $0x24] sm:$0xf0] }
  0x44   : > { %837 = vmatpush.bf16.msra.mxu3 %v1364_v43  ;;  %v1211_v2 = vld [vmem:[%s1692_s9 + $0xa0] sm:$0xf]  ;;  %v1348_v3 = vor.u32 %v1452_v60, %v1347_v59  ;;  %v1418_v4 = vld [vmem:[%s1692_s9 + $0xa4] sm:$0xf0]  ;;  %v1148_v9 = vor.u32 %v1402_v1, %v1147_v0  ;;  %v1139_v12 = vld [vmem:[%s1692_s9 + $0x10] sm:$0xf] }
  0x45   : > { %796 = vmatpush.bf16.msra.mxu0 %v1164_v49  ;;  %v1275_v5 = vld [vmem:[%s1692_s9 + $0x120] sm:$0xf]  ;;  %v1434_v6 = vld [vmem:[%s1692_s9 + $0x124] sm:$0xf0]  ;;  %v1212_v10 = vor.u32 %v1418_v4, %v1211_v2  ;;  %v1400_v13 = vld [vmem:[%s1692_s9 + $0x14] sm:$0xf0] }
  0x46   : > { %810 = vmatpush.bf16.msra.mxu1 %v1228_v50  ;;  %v1339_v7 = vld [vmem:[%s1692_s9 + $0x1a0] sm:$0xf]  ;;  %v1450_v8 = vld [vmem:[%s1692_s9 + $0x1a4] sm:$0xf0]  ;;  %v1276_v11 = vor.u32 %v1434_v6, %v1275_v5  ;;  %v1203_v14 = vld [vmem:[%s1692_s9 + $0x90] sm:$0xf]  ;;  %v1140_v22 = vor.u32 %v1400_v13, %v1139_v12 }
  0x47   : > { %824 = vmatpush.bf16.msra.mxu2 %v1292_v51  ;;  %v1340_v15 = vor.u32 %v1450_v8, %v1339_v7  ;;  %v1416_v16 = vld [vmem:[%s1692_s9 + $0x94] sm:$0xf0]  ;;  %v1267_v17 = vld [vmem:[%s1692_s9 + $0x110] sm:$0xf]  ;;  %v1131_v21 = vld [vmem:[%s1692_s9] sm:$0xf] }
  0x48   : > { %838 = vmatpush.bf16.msra.mxu3 %v1356_v55  ;;  %v1432_v18 = vld [vmem:[%s1692_s9 + $0x114] sm:$0xf0]  ;;  %v1331_v19 = vld [vmem:[%s1692_s9 + $0x190] sm:$0xf]  ;;  %v1398_v23 = vld [vmem:[%s1692_s9 + $0x4] sm:$0xf0]  ;;  %v1204_v26 = vor.u32 %v1416_v16, %v1203_v14 }
  0x49   : > { %797 = vmatpush.bf16.msra.mxu0 %v1156_v61  ;;  %v1448_v20 = vld [vmem:[%s1692_s9 + $0x194] sm:$0xf0]  ;;  %v1195_v24 = vld [vmem:[%s1692_s9 + $0x80] sm:$0xf]  ;;  %v1414_v25 = vld [vmem:[%s1692_s9 + $0x84] sm:$0xf0]  ;;  %v1268_v27 = vor.u32 %v1432_v18, %v1267_v17  ;;  %v1132_v38 = vor.u32 %v1398_v23, %v1131_v21 }
  0x4a   : > { %811 = vmatpush.bf16.msra.mxu1 %v1220_v62  ;;  %v1259_v28 = vld [vmem:[%s1692_s9 + $0x100] sm:$0xf]  ;;  %v1430_v29 = vld [vmem:[%s1692_s9 + $0x104] sm:$0xf0]  ;;  %v1332_v31 = vor.u32 %v1448_v20, %v1331_v19  ;;  %v1411_v33 = vld [vmem:[%s1692_s9 + $0x74] sm:$0xf]  ;;  %v1196_v42 = vor.u32 %v1414_v25, %v1195_v24 }
  0x4b   : > { %825 = vmatpush.bf16.msra.mxu2 %v1284_v63  ;;  %v1323_v30 = vld [vmem:[%s1692_s9 + $0x180] sm:$0xf]  ;;  %v1446_v32 = vld [vmem:[%s1692_s9 + $0x184] sm:$0xf0]  ;;  %v1189_v34 = vld [vmem:[%s1692_s9 + $0x78] sm:$0xf0]  ;;  %v1260_v43 = vor.u32 %v1430_v29, %v1259_v28 }
  0x4c   : > { %839 = vmatpush.bf16.msra.mxu3 %v1348_v3  ;;  %v1427_v35 = vld [vmem:[%s1692_s9 + $0xf4] sm:$0xf]  ;;  %v1253_v36 = vld [vmem:[%s1692_s9 + $0xf8] sm:$0xf0]  ;;  %v1409_v44 = vld [vmem:[%s1692_s9 + $0x64] sm:$0xf]  ;;  %v1324_v48 = vor.u32 %v1446_v32, %v1323_v30  ;;  %v1192_v49 = vor.u32 %v1411_v33, %v1189_v34 }
  0x4d   : > { %798 = vmatpush.bf16.msra.mxu0 %v1148_v9  ;;  %v1443_v37 = vld [vmem:[%s1692_s9 + $0x174] sm:$0xf]  ;;  %v1317_v39 = vld [vmem:[%s1692_s9 + $0x178] sm:$0xf0]  ;;  %v1181_v45 = vld [vmem:[%s1692_s9 + $0x68] sm:$0xf0]  ;;  %v1256_v54 = vor.u32 %v1427_v35, %v1253_v36 }
  0x4e   : > { %812 = vmatpush.bf16.msra.mxu1 %v1212_v10  ;;  %v1459_v40 = vld [vmem:[%s1692_s9 + $0x1f4] sm:$0xf]  ;;  %v1381_v41 = vld [vmem:[%s1692_s9 + $0x1f8] sm:$0xf0]  ;;  %v1123_v46 = vld [vmem:[%s1690_s7 + $0x8] sm:$0xf]  ;;  %v1320_v55 = vor.u32 %v1443_v37, %v1317_v39  ;;  %v1184_v4 = vor.u32 %v1409_v44, %v1181_v45 }
  0x4f   : > { %826 = vmatpush.bf16.msra.mxu2 %v1276_v11  ;;  %v1396_v47 = vld [vmem:[%s1690_s7 + $0x14] sm:$0xf0]  ;;  %v1425_v50 = vld [vmem:[%s1692_s9 + $0xe4] sm:$0xf]  ;;  %v1245_v51 = vld [vmem:[%s1692_s9 + $0xe8] sm:$0xf0]  ;;  %v1384_v59 = vor.u32 %v1459_v40, %v1381_v41 }
  0x50   : > { %840 = vmatpush.bf16.msra.mxu3 %v1340_v15  ;;  %v1441_v52 = vld [vmem:[%s1692_s9 + $0x164] sm:$0xf]  ;;  %v1309_v53 = vld [vmem:[%s1692_s9 + $0x168] sm:$0xf0]  ;;  %v1125_v57 = vld [vmem:[%s1690_s7 + $0x18] sm:$0xf0]  ;;  %v1782_v60 = vor.u32 %v1396_v47, %v1123_v46  ;;  %v1248_v6 = vor.u32 %v1425_v50, %v1245_v51 }
  0x51   : > { %799 = vmatpush.bf16.msra.mxu0 %v1140_v22  ;;  %v1394_v56 = vld [vmem:[%s1690_s7 + $0xc] sm:$0xf]  ;;  %v1115_v58 = vld [vmem:[%s1690_s7] sm:$0xf]  ;;  %v1395_v61 = vld [vmem:[%s1690_s7 + $0xc] sm:$0xf0]  ;;  %v1312_v7 = vor.u32 %v1441_v52, %v1309_v53 }
  0x52   : > { %813 = vmatpush.bf16.msra.mxu1 %v1204_v26  ;;  %v1393_v62 = vld [vmem:[%s1690_s7 + $0x4] sm:$0xf]  ;;  %v1117_v63 = vld [vmem:[%s1690_s7 + $0x10] sm:$0xf0]  ;;  %v1373_v1 = vld [vmem:[%s1692_s9 + $0x1e8] sm:$0xf0]  ;;  %v1789_v2 = vor.u32 %v1394_v56, %v1125_v57  ;;  %v1791_v3 = vor.u32 %v1395_v61, %v1115_v58 }
  0x53   : > { %827 = vmatpush.bf16.msra.mxu2 %v1268_v27  ;;  %v1457_v0 = vld [vmem:[%s1692_s9 + $0x1e4] sm:$0xf]  ;;  %v1793_v5 = vor.u32 %v1393_v62, %v1117_v63  ;;  %v1407_v8 = vld [vmem:[%s1692_s9 + $0x54] sm:$0xf]  ;;  %v1173_v9 = vld [vmem:[%s1692_s9 + $0x58] sm:$0xf0] }
  0x54   : > { %841 = vmatpush.bf16.msra.mxu3 %v1332_v31  ;;  %v1423_v10 = vld [vmem:[%s1692_s9 + $0xd4] sm:$0xf]  ;;  %v1376_v11 = vor.u32 %v1457_v0, %v1373_v1  ;;  %v1237_v12 = vld [vmem:[%s1692_s9 + $0xd8] sm:$0xf0]  ;;  %v1176_v17 = vor.u32 %v1407_v8, %v1173_v9  ;;  %v1405_v20 = vld [vmem:[%s1692_s9 + $0x44] sm:$0xf] }
  0x55   : > { %800 = vmatpush.bf16.msra.mxu0 %v1132_v38  ;;  %v1439_v13 = vld [vmem:[%s1692_s9 + $0x154] sm:$0xf]  ;;  %v1301_v14 = vld [vmem:[%s1692_s9 + $0x158] sm:$0xf0]  ;;  %v1240_v18 = vor.u32 %v1423_v10, %v1237_v12  ;;  %v1165_v21 = vld [vmem:[%s1692_s9 + $0x48] sm:$0xf0] }
  0x56   : > { %814 = vmatpush.bf16.msra.mxu1 %v1196_v42  ;;  %v1455_v15 = vld [vmem:[%s1692_s9 + $0x1d4] sm:$0xf]  ;;  %v1365_v16 = vld [vmem:[%s1692_s9 + $0x1d8] sm:$0xf0]  ;;  %v1304_v19 = vor.u32 %v1439_v13, %v1301_v14  ;;  %v1421_v22 = vld [vmem:[%s1692_s9 + $0xc4] sm:$0xf]  ;;  %v1168_v29 = vor.u32 %v1405_v20, %v1165_v21 }
  0x57   : > { %828 = vmatpush.bf16.msra.mxu2 %v1260_v43  ;;  %v1368_v23 = vor.u32 %v1455_v15, %v1365_v16  ;;  %v1229_v24 = vld [vmem:[%s1692_s9 + $0xc8] sm:$0xf0]  ;;  %v1437_v25 = vld [vmem:[%s1692_s9 + $0x144] sm:$0xf]  ;;  %v1403_v32 = vld [vmem:[%s1692_s9 + $0x34] sm:$0xf] }
  0x58   : > { %842 = vmatpush.bf16.msra.mxu3 %v1324_v48  ;;  %801 = vmatmul.bf16.vlgmr.msra.gmra.mxu0 %v1791_v3  ;;  %v1293_v26 = vld [vmem:[%s1692_s9 + $0x148] sm:$0xf0]  ;;  %v1453_v27 = vld [vmem:[%s1692_s9 + $0x1c4] sm:$0xf]  ;;  %v1232_v30 = vor.u32 %v1421_v22, %v1229_v24  ;;  %v1157_v33 = vld [vmem:[%s1692_s9 + $0x38] sm:$0xf0] }
  0x59   : > { %849 = vmatpush.bf16.msrb.mxu0 %v1192_v49  ;;  %815 = vmatmul.bf16.vlgmr.msra.gmra.mxu1 %v1793_v5  ;;  %v1357_v28 = vld [vmem:[%s1692_s9 + $0x1c8] sm:$0xf0]  ;;  %v1296_v31 = vor.u32 %v1437_v25, %v1293_v26  ;;  %v1419_v34 = vld [vmem:[%s1692_s9 + $0xb4] sm:$0xf]  ;;  %v1221_v36 = vld [vmem:[%s1692_s9 + $0xb8] sm:$0xf0]  ;;  %v1160_v41 = vor.u32 %v1403_v32, %v1157_v33 }
  0x5a   : > { %863 = vmatpush.bf16.msrb.mxu1 %v1256_v54  ;;  %829 = vmatmul.bf16.vlgmr.msra.gmra.mxu2 %v1782_v60  ;;  %v1360_v35 = vor.u32 %v1453_v27, %v1357_v28  ;;  %v1435_v37 = vld [vmem:[%s1692_s9 + $0x134] sm:$0xf]  ;;  %v1285_v38 = vld [vmem:[%s1692_s9 + $0x138] sm:$0xf0]  ;;  %v1224_v42 = vor.u32 %v1419_v34, %v1221_v36  ;;  %v1401_v44 = vld [vmem:[%s1692_s9 + $0x24] sm:$0xf] }
  0x5b   : > { %877 = vmatpush.bf16.msrb.mxu2 %v1320_v55  ;;  %843 = vmatmul.bf16.vlgmr.msra.gmra.mxu3 %v1789_v2  ;;  %v1451_v39 = vld [vmem:[%s1692_s9 + $0x1b4] sm:$0xf]  ;;  %v1349_v40 = vld [vmem:[%s1692_s9 + $0x1b8] sm:$0xf0]  ;;  %v1288_v43 = vor.u32 %v1435_v37, %v1285_v38  ;;  %v1149_v45 = vld [vmem:[%s1692_s9 + $0x28] sm:$0xf0] }
  0x5c   : > { %891 = vmatpush.bf16.msrb.mxu3 %v1384_v59  ;;  %v1417_v46 = vld [vmem:[%s1692_s9 + $0xa4] sm:$0xf]  ;;  %v1352_v47 = vor.u32 %v1451_v39, %v1349_v40  ;;  %v1213_v48 = vld [vmem:[%s1692_s9 + $0xa8] sm:$0xf0]  ;;  %v1152_v53 = vor.u32 %v1401_v44, %v1149_v45  ;;  %v1399_v56 = vld [vmem:[%s1692_s9 + $0x14] sm:$0xf] }
  0x5d   : > { %850 = vmatpush.bf16.msrb.mxu0 %v1184_v4  ;;  %v1433_v49 = vld [vmem:[%s1692_s9 + $0x124] sm:$0xf]  ;;  %v1277_v50 = vld [vmem:[%s1692_s9 + $0x128] sm:$0xf0]  ;;  %v1216_v54 = vor.u32 %v1417_v46, %v1213_v48  ;;  %v1141_v57 = vld [vmem:[%s1692_s9 + $0x18] sm:$0xf0] }
  0x5e   : > { %864 = vmatpush.bf16.msrb.mxu1 %v1248_v6  ;;  %v1449_v51 = vld [vmem:[%s1692_s9 + $0x1a4] sm:$0xf]  ;;  %v1341_v52 = vld [vmem:[%s1692_s9 + $0x1a8] sm:$0xf0]  ;;  %v1280_v55 = vor.u32 %v1433_v49, %v1277_v50  ;;  %v1415_v58 = vld [vmem:[%s1692_s9 + $0x94] sm:$0xf]  ;;  %v1144_v4 = vor.u32 %v1399_v56, %v1141_v57 }
  0x5f   : > { %878 = vmatpush.bf16.msrb.mxu2 %v1312_v7  ;;  %v1344_v59 = vor.u32 %v1449_v51, %v1341_v52  ;;  %v1205_v61 = vld [vmem:[%s1692_s9 + $0x98] sm:$0xf0]  ;;  %v1431_v62 = vld [vmem:[%s1692_s9 + $0x114] sm:$0xf]  ;;  %v1397_v8 = vld [vmem:[%s1692_s9 + $0x4] sm:$0xf] }
  0x60   : > { %892 = vmatpush.bf16.msrb.mxu3 %v1376_v11  ;;  %v1269_v63 = vld [vmem:[%s1692_s9 + $0x118] sm:$0xf0]  ;;  %v1447_v0 = vld [vmem:[%s1692_s9 + $0x194] sm:$0xf]  ;;  %v1208_v6 = vor.u32 %v1415_v58, %v1205_v61  ;;  %v1133_v9 = vld [vmem:[%s1692_s9 + $0x8] sm:$0xf0] }
  0x61   : > { %851 = vmatpush.bf16.msrb.mxu0 %v1176_v17  ;;  %v1333_v1 = vld [vmem:[%s1692_s9 + $0x198] sm:$0xf0]  ;;  %v1272_v7 = vor.u32 %v1431_v62, %v1269_v63  ;;  %v1413_v10 = vld [vmem:[%s1692_s9 + $0x84] sm:$0xf]  ;;  %v1197_v12 = vld [vmem:[%s1692_s9 + $0x88] sm:$0xf0]  ;;  %v1136_v17 = vor.u32 %v1397_v8, %v1133_v9 }
  0x62   : > { %865 = vmatpush.bf16.msrb.mxu1 %v1240_v18  ;;  %v1336_v11 = vor.u32 %v1447_v0, %v1333_v1  ;;  %v1429_v13 = vld [vmem:[%s1692_s9 + $0x104] sm:$0xf]  ;;  %v1261_v14 = vld [vmem:[%s1692_s9 + $0x108] sm:$0xf0]  ;;  %v1200_v18 = vor.u32 %v1413_v10, %v1197_v12  ;;  %v381_v27 = vld [vmem:[#allocation2 + $0x10] sm:$0xff]  ;;  %p1385_p13 = scmp.ne.s32.totalorder %s1584_s18, 1 }
  0x63   : > { %879 = vmatpush.bf16.msrb.mxu2 %v1304_v19  ;;  %v1445_v15 = vld [vmem:[%s1692_s9 + $0x184] sm:$0xf]  ;;  %v1325_v16 = vld [vmem:[%s1692_s9 + $0x188] sm:$0xf0]  ;;  %v1264_v19 = vor.u32 %v1429_v13, %v1261_v14  ;;  %v383_v34 = vld [vmem:[#allocation2 + $0x18] sm:$0xff] }
  0x64   : > { %893 = vmatpush.bf16.msrb.mxu3 %v1368_v23  ;;  %v1328_v20 = vor.u32 %v1445_v15, %v1325_v16  ;;  %v384_v49 = vld [vmem:[#allocation2 + $0x8] sm:$0xff] }
  0x65   : > { %852 = vmatpush.bf16.msrb.mxu0 %v1168_v29 }
  0x66   : > { %866 = vmatpush.bf16.msrb.mxu1 %v1232_v30 }
  0x67   : > { %880 = vmatpush.bf16.msrb.mxu2 %v1296_v31 }
  0x68   : > { %894 = vmatpush.bf16.msrb.mxu3 %v1360_v35 }
  0x69   : > { %853 = vmatpush.bf16.msrb.mxu0 %v1160_v41  ;;  %v382_v41 = vld [vmem:[#allocation2] sm:$0xff] }
  0x6a   : > { %867 = vmatpush.bf16.msrb.mxu1 %v1224_v42 }
  0x6b   : > { %881 = vmatpush.bf16.msrb.mxu2 %v1288_v43 }
  0x6c   : > { %895 = vmatpush.bf16.msrb.mxu3 %v1352_v47 }
  0x6d   : > { %854 = vmatpush.bf16.msrb.mxu0 %v1152_v53 }
  0x6e   : > { %868 = vmatpush.bf16.msrb.mxu1 %v1216_v54 }
  0x6f   : > { %882 = vmatpush.bf16.msrb.mxu2 %v1280_v55 }
  0x70   : > { %896 = vmatpush.bf16.msrb.mxu3 %v1344_v59 }
  0x71   : > { %855 = vmatpush.bf16.msrb.mxu0 %v1144_v4 }
  0x72   : > { %869 = vmatpush.bf16.msrb.mxu1 %v1208_v6 }
  0x73   : > { %883 = vmatpush.bf16.msrb.mxu2 %v1272_v7 }
  0x74   : > { %897 = vmatpush.bf16.msrb.mxu3 %v1336_v11 }
  0x75   : > { %856 = vmatpush.bf16.msrb.mxu0 %v1136_v17 }
  0x76   : > { %870 = vmatpush.bf16.msrb.mxu1 %v1200_v18 }
  0x77   : > { %884 = vmatpush.bf16.msrb.mxu2 %v1264_v19 }
  0x78   : > { %898 = vmatpush.bf16.msrb.mxu3 %v1328_v20  ;;  %857 = vmatmul.bf16.vlgmr.msrb.gmra.mxu0 %v1791_v3 }
  0x79   : > { %871 = vmatmul.bf16.vlgmr.msrb.gmra.mxu1 %v1793_v5 }
  0x7a   : > { %885 = vmatmul.bf16.vlgmr.msrb.gmra.mxu2 %v1782_v60 }
  0x7b   : > { %899 = vmatmul.bf16.vlgmr.msrb.gmra.mxu3 %v1789_v2 }
  0xd5   : > { %v802_v21 = vpop.f32.mrf.mxu0 }
  0xd6   : > { %v816_v22 = vpop.f32.mrf.mxu1 }
  0xd7   : > { %v817_v23 = vadd.f32 %v816_v22, %v802_v21 }
  0xdd   : > { %v830_v24 = vpop.f32.mrf.mxu2  ;;  %v804_v29 = vpop.f32.mrf.mxu0 }
  0xde   : > { %v831_v25 = vadd.f32 %v830_v24, %v817_v23  ;;  %v844_v26 = vpop.f32.mrf.mxu3  ;;  %v818_v30 = vpop.f32.mrf.mxu1 }
  0xdf   : > { %v819_v32 = vadd.f32 %v818_v30, %v804_v29 }
  0xe0   : > { %v845_v28 = vadd.f32 %v844_v26, %v831_v25 }
  0xe2   : > { %v905_v31 = vadd.f32 %v845_v28, %v381_v27 }
  0xe4   : > { %909 = vst [vmem:[#allocation2 + $0x10] sm:$0xff] %v905_v31 }
  0xe5   : > { %v832_v3 = vpop.f32.mrf.mxu2 }
  0xe6   : > { %v833_v33 = vadd.f32 %v832_v3, %v819_v32  ;;  %v846_v5 = vpop.f32.mrf.mxu3 }
  0xe8   : > { %v847_v60 = vadd.f32 %v846_v5, %v833_v33 }
  0xea   : > { %v907_v35 = vadd.f32 %v847_v60, %v383_v34 }
  0xec   : > { %911 = vst [vmem:[#allocation2 + $0x18] sm:$0xff] %v907_v35 }
  0xf5   : > { %v858_v2 = vpop.f32.mrf.mxu0 }
  0xf6   : > { %v872_v36 = vpop.f32.mrf.mxu1 }
  0xf7   : > { %v873_v37 = vadd.f32 %v872_v36, %v858_v2 }
  0xfd   : > { %v886_v38 = vpop.f32.mrf.mxu2  ;;  %v860_v43 = vpop.f32.mrf.mxu0 }
  0xfe   : > { %v887_v39 = vadd.f32 %v886_v38, %v873_v37  ;;  %v900_v40 = vpop.f32.mrf.mxu3  ;;  %v874_v44 = vpop.f32.mrf.mxu1 }
  0xff   : > { %v875_v46 = vadd.f32 %v874_v44, %v860_v43 }
 0x100   : > { %v901_v42 = vadd.f32 %v900_v40, %v887_v39 }
 0x102   : > { %v906_v45 = vadd.f32 %v901_v42, %v382_v41 }
 0x104   : > { %910 = vst [vmem:[#allocation2] sm:$0xff] %v906_v45 }
 0x105   : > { %v888_v47 = vpop.f32.mrf.mxu2 }
 0x106   : > { %v889_v48 = vadd.f32 %v888_v47, %v875_v46  ;;  %v902_v50 = vpop.f32.mrf.mxu3 }
 0x108   : > { %v903_v51 = vadd.f32 %v902_v50, %v889_v48  ;;  %916 = sbr.rel (%p1385_p13) target bundleno = 283 (0x11b), region = 71 }
 0x10a   : > { %v908_v52 = vadd.f32 %v903_v51, %v384_v49 }
 0x10c   : > { %912 = vst [vmem:[#allocation2 + $0x8] sm:$0xff] %v908_v52 }
 0x10d   : > { %v917_v53 = vld [vmem:[#allocation2 + $0x10] sm:$0xff]  ;;  %v918_v54 = vld [vmem:[#allocation2] sm:$0xff]  ;;  %v919_v59 = vld [vmem:[#allocation2 + $0x18] sm:$0xff] }
 0x10e   : > { %v921_v55 = vld [vmem:[%s1887_s2] sm:$0x3]  ;;  %v932_v0 = vld [vmem:[%s1888_s3 + $0x8] sm:$0xff] }
 0x10f   : > { %v923_v56 = vperm.slane %v921_v55, 0  ;;  %v924_v57 = vperm.slane %v921_v55, 1  ;;  %v931_v58 = vld [vmem:[%s1888_s3] sm:$0xff]  ;;  %v935_v8 = vunpack.c.l.bf16 %v932_v0  ;;  %v936_v9 = vunpack.c.h.bf16 %v932_v0 }
 0x110   : > { %v933_v62 = vunpack.c.l.bf16 %v931_v58  ;;  %v934_v63 = vunpack.c.h.bf16 %v931_v58 }
 0x111   : > { %v927_v1 = vadd.f32 %v923_v56, %v917_v53  ;;  %v928_v4 = vadd.f32 %v924_v57, %v918_v54  ;;  %v929_v6 = vadd.f32 %v923_v56, %v919_v59 }
 0x113   : > { %v920_v61 = vld [vmem:[#allocation2 + $0x8] sm:$0xff]  ;;  %v937_v10 = vadd.f32 %v933_v62, %v927_v1  ;;  %v938_v11 = vadd.f32 %v934_v63, %v928_v4  ;;  %v939_v12 = vadd.f32 %v935_v8, %v929_v6 }
 0x114   : > { %v930_v7 = vadd.f32 %v924_v57, %v920_v61 }
 0x115   : > { %v941_v14 = vpack.c.bf16 %v938_v11, %v937_v10 }
 0x116   : > { %v940_v13 = vadd.f32 %v936_v9, %v930_v7 }
 0x117   : > { %943 = vst [vmem:[%s1889_s4] sm:$0xff] %v941_v14 }
 0x118   : > { %v942_v15 = vpack.c.bf16 %v940_v13, %v939_v12 }
 0x11a   : > { %944 = vst [vmem:[%s1889_s4 + $0x8] sm:$0xff] %v942_v15 }
 0x11b PF: > { %s17_s20 = sadd.s32 1, %s1592_s20   ;;  %s1892_s15 = smov %s1576_s16 }
 0x11c   : > { %p14_p0 = scmp.ge.s32.totalorder %s17_s20, 4   ;;  %s1893_s16 = smov %s1580_s17 }
 0x11d   : > { %s1894_s17 = smov %s1670_s27  ;;  %s1895_s18 = smov %s1588_s19 }
 0x11e   : > { %s1896_s19 = smov %s1898_s22  ;;  %16 = sbr.rel (!%p14_p0) target bundleno = 4 (0x4), region = 121 }
 0x123   :  { %978 = vsyncpa [#allocation5], 1 }
 0x124   :  { %980 = vsyncpa [#allocation5 + $0x1], 1 }

// kernel: _lambda_.29
= control target key start
LH: loop header
LB: loop body
LE: loop exit
PB: predicated region body
PF: predicated region fallthrough
CT: control target
= control target key end

     0   :  { %8 = vsyncpa [#allocation4], 0  ;;  %s2389_s0 = inlined_call_operand.vmem [shape: bf16[16,256], index: 0, kind: input, shape index: {}]   ;;  %s2390_s1 = inlined_call_operand.hbm [shape: bf16[256,1024], index: 1, kind: input, shape index: {}]   ;;  %s2391_s2 = inlined_call_operand.vmem [shape: f32[1,1024], index: 2, kind: input, shape index: {}]   ;;  %s2392_s3 = inlined_call_operand.vmem [shape: bf16[16,1024], index: 3, kind: output, shape index: {}]  }
   0x1   :  { %10 = vsyncpa [#allocation4 + $0x1], 0  ;;  %s1891_s12 = smov 0   ;;  %s1893_s13 = smov 0  }
   0x2   :  { %s1895_s14 = smov 0   ;;  %s1897_s15 = smov 0  }
   0x3   :  { %s1899_s16 = smov 0   ;;  %s1901_s17 = smov 0  }
   0x4 LB: > { %s1355_s18 = sadd.s32 4294967295, %s1866_s17   ;;  %s31_s19 = sadd.s32 1, %s1862_s16  ;;  %s1866_s17 = sphi %s1901_s17, %s16_s17   ;;  %s1862_s16 = sphi %s1899_s16, %s2406_s16   ;;  %s1858_s15 = sphi %s1897_s15, %s2405_s15   ;;  %s1854_s14 = sphi %s1895_s14, %s2404_s14   ;;  %s1850_s13 = sphi %s1893_s13, %s2403_s13   ;;  %s1846_s12 = sphi %s1891_s12, %s2402_s12  }
   0x5   : > { %p33_p0 = scmp.ge.s32.totalorder %s31_s19, 2  ;;  %s72_s20 = sadd.s32 1, %s1854_s14 }
   0x6   : > { %p79_p1 = scmp.ne.s32.totalorder %s1854_s14, %s1850_s13  ;;  %p80_p2 = scmp.eq.s32.totalorder %s1866_s17, 0 }
   0x7   : > { %s2408_s19 = smov (%p33_p0, %s31_s19), 0  ;;  %p85_p4 = scmp.ne.s32.totalorder %s1850_s13, %s1846_s12 }
   0x8   : > { %p1927_p3 = por %p80_p2, %p79_p1  ;;  %s68_s22 = ssub.s32 %s1862_s16, %s2408_s19 }
   0x9   : > { %p86_p5 = scmp.eq.s32.totalorder %s1355_s18, 0  ;;  %p70_p6 = scmp.eq.s32.totalorder %s68_s22, 0 }
   0xa   : > { %p137_p7 = scmp.eq.s32.totalorder %s1355_s18, 1  ;;  %p1718_p10 = scmp.lt.s32.totalorder %s1866_s17, 2 }
   0xb   : > { %p1934_p8 = por %p86_p5, %p85_p4  ;;  %s178_s26 = sand.u32 1, %s1854_s14  }
   0xc   : > { %s1939_s24 = scalar_select %p70_p6, %s1854_s14, %s72_s20  }
   0xd   : > { %p1941_p9 = por %p137_p7, %p79_p1  ;;  %s1644_s27 = sshll.u32 %s1862_s16, 4 }
   0xe   : > { %s1360_s28 = sshll.u32 %s178_s26, 9  ;;  %s190_s4 = scalar_lea.hbm %s2390_s1, %s1644_s27 }
   0xf   : > { %s191_s5 = sshll.u32 %s190_s4, 4  ;;  %s182_s6 = scalar_lea.vmem [#allocation3], %s1360_s28  ;;  %s192_s5 = int_to_ptr.hbm [resolvable:$true] %s191_s5 }
  0x10   : > { %s193_s7 = sshll.u32 %s182_s6, 4  ;;  %p1715_p11 = pnand %p1718_p10, %p1927_p3  ;;  %s194_s7 = int_to_ptr.vmem [resolvable:$true] %s193_s7 }
  0x11   : > { %p1363_p12 = scmp.ge.s32.totalorder %s1866_s17, 1  ;;  %s179_s8 = scalar_lea.sflag [#allocation4], %s178_s26 }
  0x12   : > { %s1868_s9 = smov 512   ;;  %s1869_s10 = smov 256  }
  0x13   : > { %s1870_s11 = smov 16   ;;  %p209_p13 = scmp.lt.s32.totalorder %s1866_s17, 3 }
  0x14   : > { %1717 = dma.hbm_to_vmem [thread:$0]  (!%p1715_p11), %s192_s5, 8192, %s194_s7, %s179_s8, %s1868_s9, %s1869_s10, %s1870_s11  }
  0x15   : > { %p210_p0 = pnand %p1363_p12, %p209_p13 }
  0x16   : > { %s1956_s12 = sand.u32 (!%p210_p0), 1, %s1850_s13  }
  0x17   : > { %213 = sbr.rel (%p210_p0) target bundleno = 318 (0x13e), region = 32  ;;  %s1364_s18 = sshll.u32 (!%p210_p0), %s1956_s12, 9 }
  0x18   : > { %s216_s20 = scalar_lea.sflag (!%p210_p0), [#allocation4], %s1956_s12  ;;  %s1960_s22 = scalar_lea.vmem (!%p210_p0), [#allocation3], %s1364_s18 }
  0x1c   : > { %1841 = dma.done.wait (%p1934_p8), %s216_s20, 8192  }
  0x1d   : > { %1843 = vsyncadd (%p1934_p8), %s216_s20, 4294959104  ;;  %v1489_v0 = vld [vmem:[%s1960_s22 + $0xe0] sm:$0xf]  ;;  %v1677_v1 = vld [vmem:[%s1960_s22 + $0xec] sm:$0xf0]  ;;  %s1366_s5 = sshll.u32 %s1858_s15, 2 }
  0x1e   : > { %v1617_v2 = vld [vmem:[%s1960_s22 + $0x1e0] sm:$0xf]  ;;  %v1490_v3 = vor.u32 %v1677_v1, %v1489_v0  ;;  %v1709_v4 = vld [vmem:[%s1960_s22 + $0x1ec] sm:$0xf0]  ;;  %v1675_v5 = vld [vmem:[%s1960_s22 + $0xe4] sm:$0xf] }
  0x1f   : > { %v1491_v6 = vld [vmem:[%s1960_s22 + $0xf0] sm:$0xf0]  ;;  %v1618_v7 = vor.u32 %v1709_v4, %v1617_v2  ;;  %v1707_v9 = vld [vmem:[%s1960_s22 + $0x1e4] sm:$0xf]  ;;  %v1473_v11 = vld [vmem:[%s1960_s22 + $0xc0] sm:$0xf] }
  0x20   : > { %v1494_v8 = vor.u32 %v1675_v5, %v1491_v6  ;;  %v1619_v10 = vld [vmem:[%s1960_s22 + $0x1f0] sm:$0xf0]  ;;  %693 = vmatpush.bf16.msra.mxu0 %v1490_v3  ;;  %v1673_v13 = vld [vmem:[%s1960_s22 + $0xcc] sm:$0xf0]  ;;  %v1601_v14 = vld [vmem:[%s1960_s22 + $0x1c0] sm:$0xf] }
  0x21   : > { %v1622_v12 = vor.u32 %v1707_v9, %v1619_v10  ;;  %v1705_v15 = vld [vmem:[%s1960_s22 + $0x1cc] sm:$0xf0]  ;;  %707 = vmatpush.bf16.msra.mxu1 %v1618_v7  ;;  %v1474_v16 = vor.u32 %v1673_v13, %v1473_v11  ;;  %v1671_v18 = vld [vmem:[%s1960_s22 + $0xc4] sm:$0xf]  ;;  %v1475_v19 = vld [vmem:[%s1960_s22 + $0xd0] sm:$0xf0] }
  0x22   : > { %721 = vmatpush.bf16.msra.mxu2 %v1494_v8  ;;  %v1602_v17 = vor.u32 %v1705_v15, %v1601_v14  ;;  %v1703_v20 = vld [vmem:[%s1960_s22 + $0x1c4] sm:$0xf]  ;;  %v1478_v21 = vor.u32 %v1671_v18, %v1475_v19  ;;  %v1603_v22 = vld [vmem:[%s1960_s22 + $0x1d0] sm:$0xf0]  ;;  %v1457_v23 = vld [vmem:[%s1960_s22 + $0xa0] sm:$0xf] }
  0x23   : > { %735 = vmatpush.bf16.msra.mxu3 %v1622_v12  ;;  %v1669_v24 = vld [vmem:[%s1960_s22 + $0xac] sm:$0xf0]  ;;  %v1606_v25 = vor.u32 %v1703_v20, %v1603_v22  ;;  %v1585_v26 = vld [vmem:[%s1960_s22 + $0x1a0] sm:$0xf]  ;;  %v1667_v28 = vld [vmem:[%s1960_s22 + $0xa4] sm:$0xf] }
  0x24   : > { %v1701_v27 = vld [vmem:[%s1960_s22 + $0x1ac] sm:$0xf0]  ;;  %694 = vmatpush.bf16.msra.mxu0 %v1474_v16  ;;  %v1458_v29 = vor.u32 %v1669_v24, %v1457_v23  ;;  %v1459_v30 = vld [vmem:[%s1960_s22 + $0xb0] sm:$0xf0]  ;;  %v1699_v31 = vld [vmem:[%s1960_s22 + $0x1a4] sm:$0xf] }
  0x25   : > { %v1587_v32 = vld [vmem:[%s1960_s22 + $0x1b0] sm:$0xf0]  ;;  %708 = vmatpush.bf16.msra.mxu1 %v1602_v17  ;;  %v1586_v33 = vor.u32 %v1701_v27, %v1585_v26  ;;  %v1462_v34 = vor.u32 %v1667_v28, %v1459_v30  ;;  %v1441_v35 = vld [vmem:[%s1960_s22 + $0x80] sm:$0xf]  ;;  %v1665_v36 = vld [vmem:[%s1960_s22 + $0x8c] sm:$0xf0] }
  0x26   : > { %722 = vmatpush.bf16.msra.mxu2 %v1478_v21  ;;  %v1569_v37 = vld [vmem:[%s1960_s22 + $0x180] sm:$0xf]  ;;  %v1590_v38 = vor.u32 %v1699_v31, %v1587_v32  ;;  %v1697_v39 = vld [vmem:[%s1960_s22 + $0x18c] sm:$0xf0]  ;;  %v1663_v40 = vld [vmem:[%s1960_s22 + $0x84] sm:$0xf]  ;;  %v1442_v44 = vor.u32 %v1665_v36, %v1441_v35 }
  0x27   : > { %736 = vmatpush.bf16.msra.mxu3 %v1606_v25  ;;  %v1443_v41 = vld [vmem:[%s1960_s22 + $0x90] sm:$0xf0]  ;;  %v1695_v42 = vld [vmem:[%s1960_s22 + $0x184] sm:$0xf]  ;;  %v1570_v45 = vor.u32 %v1697_v39, %v1569_v37  ;;  %v1425_v47 = vld [vmem:[%s1960_s22 + $0x60] sm:$0xf] }
  0x28   : > { %v1571_v43 = vld [vmem:[%s1960_s22 + $0x190] sm:$0xf0]  ;;  %695 = vmatpush.bf16.msra.mxu0 %v1458_v29  ;;  %v1446_v46 = vor.u32 %v1663_v40, %v1443_v41  ;;  %v1661_v48 = vld [vmem:[%s1960_s22 + $0x6c] sm:$0xf0]  ;;  %v1553_v49 = vld [vmem:[%s1960_s22 + $0x160] sm:$0xf] }
  0x29   : > { %709 = vmatpush.bf16.msra.mxu1 %v1586_v33  ;;  %v1574_v50 = vor.u32 %v1695_v42, %v1571_v43  ;;  %v1693_v51 = vld [vmem:[%s1960_s22 + $0x16c] sm:$0xf0]  ;;  %v1659_v52 = vld [vmem:[%s1960_s22 + $0x64] sm:$0xf]  ;;  %v1427_v53 = vld [vmem:[%s1960_s22 + $0x70] sm:$0xf0]  ;;  %v1426_v56 = vor.u32 %v1661_v48, %v1425_v47 }
  0x2a   : > { %723 = vmatpush.bf16.msra.mxu2 %v1462_v34  ;;  %v1691_v54 = vld [vmem:[%s1960_s22 + $0x164] sm:$0xf]  ;;  %v1555_v55 = vld [vmem:[%s1960_s22 + $0x170] sm:$0xf0]  ;;  %v1554_v57 = vor.u32 %v1693_v51, %v1553_v49  ;;  %v1430_v58 = vor.u32 %v1659_v52, %v1427_v53  ;;  %v1409_v59 = vld [vmem:[%s1960_s22 + $0x40] sm:$0xf] }
  0x2b   : > { %737 = vmatpush.bf16.msra.mxu3 %v1590_v38  ;;  %v1657_v60 = vld [vmem:[%s1960_s22 + $0x4c] sm:$0xf0]  ;;  %v1537_v61 = vld [vmem:[%s1960_s22 + $0x140] sm:$0xf]  ;;  %v1558_v62 = vor.u32 %v1691_v54, %v1555_v55  ;;  %v1655_v0 = vld [vmem:[%s1960_s22 + $0x44] sm:$0xf] }
  0x2c   : > { %696 = vmatpush.bf16.msra.mxu0 %v1442_v44  ;;  %v1689_v63 = vld [vmem:[%s1960_s22 + $0x14c] sm:$0xf0]  ;;  %v1411_v1 = vld [vmem:[%s1960_s22 + $0x50] sm:$0xf0]  ;;  %v1687_v2 = vld [vmem:[%s1960_s22 + $0x144] sm:$0xf]  ;;  %v1410_v4 = vor.u32 %v1657_v60, %v1409_v59 }
  0x2d   : > { %710 = vmatpush.bf16.msra.mxu1 %v1570_v45  ;;  %v1539_v3 = vld [vmem:[%s1960_s22 + $0x150] sm:$0xf0]  ;;  %v1538_v5 = vor.u32 %v1689_v63, %v1537_v61  ;;  %v1414_v6 = vor.u32 %v1655_v0, %v1411_v1  ;;  %v1393_v7 = vld [vmem:[%s1960_s22 + $0x20] sm:$0xf]  ;;  %v1653_v8 = vld [vmem:[%s1960_s22 + $0x2c] sm:$0xf0] }
  0x2e   : > { %724 = vmatpush.bf16.msra.mxu2 %v1446_v46  ;;  %v1521_v9 = vld [vmem:[%s1960_s22 + $0x120] sm:$0xf]  ;;  %v1542_v10 = vor.u32 %v1687_v2, %v1539_v3  ;;  %v1685_v11 = vld [vmem:[%s1960_s22 + $0x12c] sm:$0xf0]  ;;  %v1651_v12 = vld [vmem:[%s1960_s22 + $0x24] sm:$0xf]  ;;  %v1394_v16 = vor.u32 %v1653_v8, %v1393_v7 }
  0x2f   : > { %738 = vmatpush.bf16.msra.mxu3 %v1574_v50  ;;  %v1395_v13 = vld [vmem:[%s1960_s22 + $0x30] sm:$0xf0]  ;;  %v1683_v14 = vld [vmem:[%s1960_s22 + $0x124] sm:$0xf]  ;;  %v1377_v17 = vld [vmem:[%s1960_s22] sm:$0xf]  ;;  %v1522_v20 = vor.u32 %v1685_v11, %v1521_v9 }
  0x30   : > { %697 = vmatpush.bf16.msra.mxu0 %v1426_v56  ;;  %v1523_v15 = vld [vmem:[%s1960_s22 + $0x130] sm:$0xf0]  ;;  %v1649_v18 = vld [vmem:[%s1960_s22 + $0xc] sm:$0xf0]  ;;  %v1505_v19 = vld [vmem:[%s1960_s22 + $0x100] sm:$0xf]  ;;  %v1398_v21 = vor.u32 %v1651_v12, %v1395_v13 }
  0x31   : > { %711 = vmatpush.bf16.msra.mxu1 %v1554_v57  ;;  %v1681_v22 = vld [vmem:[%s1960_s22 + $0x10c] sm:$0xf0]  ;;  %v1647_v23 = vld [vmem:[%s1960_s22 + $0x4] sm:$0xf]  ;;  %v1379_v24 = vld [vmem:[%s1960_s22 + $0x10] sm:$0xf0]  ;;  %v1526_v25 = vor.u32 %v1683_v14, %v1523_v15  ;;  %v1378_v32 = vor.u32 %v1649_v18, %v1377_v17 }
  0x32   : > { %725 = vmatpush.bf16.msra.mxu2 %v1430_v58  ;;  %v1679_v26 = vld [vmem:[%s1960_s22 + $0x104] sm:$0xf]  ;;  %v1507_v27 = vld [vmem:[%s1960_s22 + $0x110] sm:$0xf0]  ;;  %v1497_v28 = vld [vmem:[%s1960_s22 + $0xe8] sm:$0xf]  ;;  %v1506_v36 = vor.u32 %v1681_v22, %v1505_v19  ;;  %v1382_v37 = vor.u32 %v1647_v23, %v1379_v24 }
  0x33   : > { %739 = vmatpush.bf16.msra.mxu3 %v1558_v62  ;;  %v1678_v29 = vld [vmem:[%s1960_s22 + $0xf4] sm:$0xf0]  ;;  %v1625_v30 = vld [vmem:[%s1960_s22 + $0x1e8] sm:$0xf]  ;;  %v1676_v33 = vld [vmem:[%s1960_s22 + $0xec] sm:$0xf]  ;;  %v1510_v41 = vor.u32 %v1679_v26, %v1507_v27 }
  0x34   : > { %698 = vmatpush.bf16.msra.mxu0 %v1410_v4  ;;  %v1710_v31 = vld [vmem:[%s1960_s22 + $0x1f4] sm:$0xf0]  ;;  %v1499_v34 = vld [vmem:[%s1960_s22 + $0xf8] sm:$0xf0]  ;;  %v1708_v35 = vld [vmem:[%s1960_s22 + $0x1ec] sm:$0xf]  ;;  %v1498_v42 = vor.u32 %v1678_v29, %v1497_v28 }
  0x35   : > { %712 = vmatpush.bf16.msra.mxu1 %v1538_v5  ;;  %v1627_v38 = vld [vmem:[%s1960_s22 + $0x1f8] sm:$0xf0]  ;;  %v1369_v39 = vld [vmem:[%s2389_s0] sm:$0xf]  ;;  %v1646_v40 = vld [vmem:[%s2389_s0 + $0x4] sm:$0xf0]  ;;  %v1626_v45 = vor.u32 %v1710_v31, %v1625_v30  ;;  %v1502_v46 = vor.u32 %v1676_v33, %v1499_v34 }
  0x36   : > { %726 = vmatpush.bf16.msra.mxu2 %v1414_v6  ;;  %v1645_v43 = vld [vmem:[%s2389_s0 + $0x4] sm:$0xf]  ;;  %v1371_v44 = vld [vmem:[%s2389_s0 + $0x8] sm:$0xf0]  ;;  %v1481_v47 = vld [vmem:[%s1960_s22 + $0xc8] sm:$0xf]  ;;  %v1630_v50 = vor.u32 %v1708_v35, %v1627_v38  ;;  %v2053_v51 = vor.u32 %v1646_v40, %v1369_v39 }
  0x37   : > { %740 = vmatpush.bf16.msra.mxu3 %v1542_v10  ;;  %v1674_v48 = vld [vmem:[%s1960_s22 + $0xd4] sm:$0xf0]  ;;  %v1609_v49 = vld [vmem:[%s1960_s22 + $0x1c8] sm:$0xf]  ;;  %v1672_v53 = vld [vmem:[%s1960_s22 + $0xcc] sm:$0xf]  ;;  %v2058_v55 = vor.u32 %v1645_v43, %v1371_v44 }
  0x38   : > { %699 = vmatpush.bf16.msra.mxu0 %v1394_v16  ;;  %v1706_v52 = vld [vmem:[%s1960_s22 + $0x1d4] sm:$0xf0]  ;;  %v1483_v54 = vld [vmem:[%s1960_s22 + $0xd8] sm:$0xf0]  ;;  %v1704_v56 = vld [vmem:[%s1960_s22 + $0x1cc] sm:$0xf]  ;;  %v1482_v58 = vor.u32 %v1674_v48, %v1481_v47 }
  0x39   : > { %713 = vmatpush.bf16.msra.mxu1 %v1522_v20  ;;  %v1611_v57 = vld [vmem:[%s1960_s22 + $0x1d8] sm:$0xf0]  ;;  %v1610_v59 = vor.u32 %v1706_v52, %v1609_v49  ;;  %v1486_v60 = vor.u32 %v1672_v53, %v1483_v54  ;;  %v1465_v61 = vld [vmem:[%s1960_s22 + $0xa8] sm:$0xf]  ;;  %v1670_v62 = vld [vmem:[%s1960_s22 + $0xb4] sm:$0xf0] }
  0x3a   : > { %727 = vmatpush.bf16.msra.mxu2 %v1398_v21  ;;  %v1593_v63 = vld [vmem:[%s1960_s22 + $0x1a8] sm:$0xf]  ;;  %v1614_v0 = vor.u32 %v1704_v56, %v1611_v57  ;;  %v1702_v1 = vld [vmem:[%s1960_s22 + $0x1b4] sm:$0xf0]  ;;  %v1668_v2 = vld [vmem:[%s1960_s22 + $0xac] sm:$0xf]  ;;  %v1466_v6 = vor.u32 %v1670_v62, %v1465_v61 }
  0x3b   : > { %741 = vmatpush.bf16.msra.mxu3 %v1526_v25  ;;  %v1467_v3 = vld [vmem:[%s1960_s22 + $0xb8] sm:$0xf0]  ;;  %v1700_v4 = vld [vmem:[%s1960_s22 + $0x1ac] sm:$0xf]  ;;  %v1594_v7 = vor.u32 %v1702_v1, %v1593_v63  ;;  %v1449_v9 = vld [vmem:[%s1960_s22 + $0x88] sm:$0xf] }
  0x3c   : > { %700 = vmatpush.bf16.msra.mxu0 %v1378_v32  ;;  %v1595_v5 = vld [vmem:[%s1960_s22 + $0x1b8] sm:$0xf0]  ;;  %v1470_v8 = vor.u32 %v1668_v2, %v1467_v3  ;;  %v1666_v10 = vld [vmem:[%s1960_s22 + $0x94] sm:$0xf0]  ;;  %v1577_v11 = vld [vmem:[%s1960_s22 + $0x188] sm:$0xf] }
  0x3d   : > { %714 = vmatpush.bf16.msra.mxu1 %v1506_v36  ;;  %v1598_v12 = vor.u32 %v1700_v4, %v1595_v5  ;;  %v1698_v13 = vld [vmem:[%s1960_s22 + $0x194] sm:$0xf0]  ;;  %v1664_v14 = vld [vmem:[%s1960_s22 + $0x8c] sm:$0xf]  ;;  %v1451_v15 = vld [vmem:[%s1960_s22 + $0x98] sm:$0xf0]  ;;  %v1450_v18 = vor.u32 %v1666_v10, %v1449_v9 }
  0x3e   : > { %728 = vmatpush.bf16.msra.mxu2 %v1382_v37  ;;  %v1696_v16 = vld [vmem:[%s1960_s22 + $0x18c] sm:$0xf]  ;;  %v1579_v17 = vld [vmem:[%s1960_s22 + $0x198] sm:$0xf0]  ;;  %v1578_v19 = vor.u32 %v1698_v13, %v1577_v11  ;;  %v1454_v20 = vor.u32 %v1664_v14, %v1451_v15  ;;  %v1433_v21 = vld [vmem:[%s1960_s22 + $0x68] sm:$0xf] }
  0x3f   : > { %742 = vmatpush.bf16.msra.mxu3 %v1510_v41  ;;  %701 = vmatmul.bf16.vlgmr.msra.gmra.mxu0 %v2053_v51  ;;  %v1662_v22 = vld [vmem:[%s1960_s22 + $0x74] sm:$0xf0]  ;;  %v1561_v23 = vld [vmem:[%s1960_s22 + $0x168] sm:$0xf]  ;;  %v1582_v24 = vor.u32 %v1696_v16, %v1579_v17  ;;  %v1660_v26 = vld [vmem:[%s1960_s22 + $0x6c] sm:$0xf] }
  0x40   : > { %749 = vmatpush.bf16.msrb.mxu0 %v1498_v42  ;;  %715 = vmatmul.bf16.vlgmr.msra.gmra.mxu1 %v2058_v55  ;;  %v1694_v25 = vld [vmem:[%s1960_s22 + $0x174] sm:$0xf0]  ;;  %v1435_v27 = vld [vmem:[%s1960_s22 + $0x78] sm:$0xf0]  ;;  %v1692_v28 = vld [vmem:[%s1960_s22 + $0x16c] sm:$0xf]  ;;  %v1434_v30 = vor.u32 %v1662_v22, %v1433_v21 }
  0x41   : > { %763 = vmatpush.bf16.msrb.mxu1 %v1626_v45  ;;  %729 = vmatmul.bf16.vlgmr.msra.gmra.mxu2 %v2053_v51  ;;  %v1563_v29 = vld [vmem:[%s1960_s22 + $0x178] sm:$0xf0]  ;;  %v1562_v31 = vor.u32 %v1694_v25, %v1561_v23  ;;  %v1438_v32 = vor.u32 %v1660_v26, %v1435_v27  ;;  %v1417_v33 = vld [vmem:[%s1960_s22 + $0x48] sm:$0xf]  ;;  %v1658_v34 = vld [vmem:[%s1960_s22 + $0x54] sm:$0xf0] }
  0x42   : > { %777 = vmatpush.bf16.msrb.mxu2 %v1502_v46  ;;  %743 = vmatmul.bf16.vlgmr.msra.gmra.mxu3 %v2058_v55  ;;  %v1545_v35 = vld [vmem:[%s1960_s22 + $0x148] sm:$0xf]  ;;  %v1566_v36 = vor.u32 %v1692_v28, %v1563_v29  ;;  %v1690_v37 = vld [vmem:[%s1960_s22 + $0x154] sm:$0xf0]  ;;  %v1656_v38 = vld [vmem:[%s1960_s22 + $0x4c] sm:$0xf]  ;;  %v1418_v42 = vor.u32 %v1658_v34, %v1417_v33 }
  0x43   : > { %791 = vmatpush.bf16.msrb.mxu3 %v1630_v50  ;;  %v1419_v39 = vld [vmem:[%s1960_s22 + $0x58] sm:$0xf0]  ;;  %v1688_v40 = vld [vmem:[%s1960_s22 + $0x14c] sm:$0xf]  ;;  %v1546_v43 = vor.u32 %v1690_v37, %v1545_v35  ;;  %v1401_v45 = vld [vmem:[%s1960_s22 + $0x28] sm:$0xf] }
  0x44   : > { %750 = vmatpush.bf16.msrb.mxu0 %v1482_v58  ;;  %v1547_v41 = vld [vmem:[%s1960_s22 + $0x158] sm:$0xf0]  ;;  %v1422_v44 = vor.u32 %v1656_v38, %v1419_v39  ;;  %v1654_v46 = vld [vmem:[%s1960_s22 + $0x34] sm:$0xf0]  ;;  %v1529_v47 = vld [vmem:[%s1960_s22 + $0x128] sm:$0xf] }
  0x45   : > { %764 = vmatpush.bf16.msrb.mxu1 %v1610_v59  ;;  %v1550_v48 = vor.u32 %v1688_v40, %v1547_v41  ;;  %v1686_v49 = vld [vmem:[%s1960_s22 + $0x134] sm:$0xf0]  ;;  %v1652_v50 = vld [vmem:[%s1960_s22 + $0x2c] sm:$0xf]  ;;  %v1403_v52 = vld [vmem:[%s1960_s22 + $0x38] sm:$0xf0]  ;;  %v1402_v56 = vor.u32 %v1654_v46, %v1401_v45 }
  0x46   : > { %778 = vmatpush.bf16.msrb.mxu2 %v1486_v60  ;;  %v1684_v53 = vld [vmem:[%s1960_s22 + $0x12c] sm:$0xf]  ;;  %v1531_v54 = vld [vmem:[%s1960_s22 + $0x138] sm:$0xf0]  ;;  %v1530_v57 = vor.u32 %v1686_v49, %v1529_v47  ;;  %v1406_v58 = vor.u32 %v1652_v50, %v1403_v52  ;;  %v1385_v59 = vld [vmem:[%s1960_s22 + $0x8] sm:$0xf] }
  0x47   : > { %792 = vmatpush.bf16.msrb.mxu3 %v1614_v0  ;;  %v1650_v60 = vld [vmem:[%s1960_s22 + $0x14] sm:$0xf0]  ;;  %v1513_v61 = vld [vmem:[%s1960_s22 + $0x108] sm:$0xf]  ;;  %v1534_v62 = vor.u32 %v1684_v53, %v1531_v54  ;;  %v1648_v0 = vld [vmem:[%s1960_s22 + $0xc] sm:$0xf] }
  0x48   : > { %751 = vmatpush.bf16.msrb.mxu0 %v1466_v6  ;;  %v1682_v63 = vld [vmem:[%s1960_s22 + $0x114] sm:$0xf0]  ;;  %v1387_v1 = vld [vmem:[%s1960_s22 + $0x18] sm:$0xf0]  ;;  %v1680_v2 = vld [vmem:[%s1960_s22 + $0x10c] sm:$0xf]  ;;  %v1386_v4 = vor.u32 %v1650_v60, %v1385_v59 }
  0x49   : > { %765 = vmatpush.bf16.msrb.mxu1 %v1594_v7  ;;  %v1515_v3 = vld [vmem:[%s1960_s22 + $0x118] sm:$0xf0]  ;;  %v1514_v5 = vor.u32 %v1682_v63, %v1513_v61  ;;  %v1390_v6 = vor.u32 %v1648_v0, %v1387_v1  ;;  %p271_p1 = scmp.lt.s32.totalorder %s1366_s5, 7  ;;  %s1365_s9 = sshll.u32 %s1956_s12, 5 }
  0x4a   : > { %779 = vmatpush.bf16.msrb.mxu2 %v1470_v8  ;;  %v1518_v7 = vor.u32 %v1680_v2, %v1515_v3  ;;  %s2289_s10 = scalar_lea.vmem [#allocation5], %s1365_s9  ;;  %s1711_s11 = sshll.u32 (%p1941_p9), %s1858_s15, 4 }
  0x4b   : > { %793 = vmatpush.bf16.msrb.mxu3 %v1598_v12  ;;  %s2410_s5 = smov (!%p271_p1, %s1366_s5), 7  ;;  %s1222_s20 = scalar_lea.vmem (%p1941_p9), %s2392_s3, %s1711_s11 }
  0x4c   : > { %752 = vmatpush.bf16.msrb.mxu0 %v1450_v18  ;;  %s273_s8 = scalar_lea.vmem %s2391_s2, %s2410_s5 }
  0x4d   : > { %766 = vmatpush.bf16.msrb.mxu1 %v1578_v19  ;;  %v2122_v8 = vld [vmem:[%s273_s8] sm:$0xf] }
  0x4e   : > { %780 = vmatpush.bf16.msrb.mxu2 %v1454_v20  ;;  %v834_v10 = vperm.slane %v2122_v8, 0  ;;  %v835_v14 = vperm.slane %v2122_v8, 1 }
  0x4f   : > { %794 = vmatpush.bf16.msrb.mxu3 %v1582_v24 }
  0x50   : > { %753 = vmatpush.bf16.msrb.mxu0 %v1434_v30 }
  0x51   : > { %767 = vmatpush.bf16.msrb.mxu1 %v1562_v31 }
  0x52   : > { %781 = vmatpush.bf16.msrb.mxu2 %v1438_v32 }
  0x53   : > { %795 = vmatpush.bf16.msrb.mxu3 %v1566_v36 }
  0x54   : > { %754 = vmatpush.bf16.msrb.mxu0 %v1418_v42 }
  0x55   : > { %768 = vmatpush.bf16.msrb.mxu1 %v1546_v43 }
  0x56   : > { %782 = vmatpush.bf16.msrb.mxu2 %v1422_v44 }
  0x57   : > { %796 = vmatpush.bf16.msrb.mxu3 %v1550_v48 }
  0x58   : > { %755 = vmatpush.bf16.msrb.mxu0 %v1402_v56 }
  0x59   : > { %769 = vmatpush.bf16.msrb.mxu1 %v1530_v57 }
  0x5a   : > { %783 = vmatpush.bf16.msrb.mxu2 %v1406_v58 }
  0x5b   : > { %797 = vmatpush.bf16.msrb.mxu3 %v1534_v62 }
  0x5c   : > { %756 = vmatpush.bf16.msrb.mxu0 %v1386_v4 }
  0x5d   : > { %770 = vmatpush.bf16.msrb.mxu1 %v1514_v5 }
  0x5e   : > { %784 = vmatpush.bf16.msrb.mxu2 %v1390_v6 }
  0x5f   : > { %798 = vmatpush.bf16.msrb.mxu3 %v1518_v7  ;;  %757 = vmatmul.bf16.vlgmr.msrb.gmra.mxu0 %v2053_v51 }
  0x60   : > { %771 = vmatmul.bf16.vlgmr.msrb.gmra.mxu1 %v2058_v55 }
  0x61   : > { %785 = vmatmul.bf16.vlgmr.msrb.gmra.mxu2 %v2053_v51 }
  0x62   : > { %799 = vmatmul.bf16.vlgmr.msrb.gmra.mxu3 %v2058_v55 }
  0xbc   : > { %v702_v9 = vpop.f32.mrf.mxu0 }
  0xbd   : > { %v716_v11 = vpop.f32.mrf.mxu1 }
  0xbe   : > { %v717_v12 = vadd.f32 %v716_v11, %v702_v9 }
  0xc0   : > { %v2125_v13 = vadd.f32 %v834_v10, %v717_v12 }
  0xc2   : > { %v2128_v51 = vmul.f32 0.70710677, %v2125_v13 }
  0xc4   : > { %v730_v55 = vpop.f32.mrf.mxu2  ;;  %v866_v15 = vmul.f32 %v2128_v51, %v2128_v51  ;;  %v704_v17 = vpop.f32.mrf.mxu0 }
  0xc5   : > { %v744_v16 = vpop.f32.mrf.mxu3  ;;  %v718_v19 = vpop.f32.mrf.mxu1 }
  0xc6   : > { %v745_v18 = vadd.f32 %v744_v16, %v730_v55  ;;  %v2133_v20 = vmin.f32 %v866_v15, 16.0  ;;  %v719_v21 = vadd.f32 %v718_v19, %v704_v17 }
  0xc8   : > { %v2135_v22 = vadd.f32 %v835_v14, %v745_v18  ;;  %v868_v23 = vmul.f32 2.1237322e-06, %v2133_v20  ;;  %v879_v24 = vmul.f32 3.8918573e-05, %v2133_v20  ;;  %v2139_v25 = vadd.f32 %v834_v10, %v719_v21 }
  0xca   : > { %v2142_v26 = vmul.f32 0.70710677, %v2135_v22  ;;  %v869_v27 = vadd.f32 0.00028619796, %v868_v23  ;;  %v880_v28 = vadd.f32 0.001143296, %v879_v24 }
  0xcb   : > { %v2147_v30 = vmul.f32 0.70710677, %v2139_v25 }
  0xcc   : > { %v906_v29 = vmul.f32 %v2142_v26, %v2142_v26  ;;  %v732_v31 = vpop.f32.mrf.mxu2  ;;  %v870_v32 = vmul.f32 %v869_v27, %v2133_v20  ;;  %v881_v33 = vmul.f32 %v880_v28, %v2133_v20 }
  0xcd   : > { %v746_v34 = vpop.f32.mrf.mxu3  ;;  %v1026_v36 = vmul.f32 %v2147_v30, %v2147_v30 }
  0xce   : > { %v907_v35 = vmin.f32 %v906_v29, 16.0  ;;  %v747_v37 = vadd.f32 %v746_v34, %v732_v31  ;;  %v871_v38 = vadd.f32 0.0036580483, %v870_v32  ;;  %v882_v39 = vadd.f32 0.014752088, %v881_v33 }
  0xcf   : > { %v2153_v42 = vmin.f32 %v1026_v36, 16.0  ;;  %v836_v33 = vperm.slane %v2122_v8, 2 }
  0xd0   : > { %v908_v40 = vmul.f32 2.1237322e-06, %v907_v35  ;;  %v919_v41 = vmul.f32 3.8918573e-05, %v907_v35  ;;  %v872_v43 = vmul.f32 %v871_v38, %v2133_v20  ;;  %v883_v44 = vmul.f32 %v882_v39, %v2133_v20 }
  0xd1   : > { %v2157_v45 = vadd.f32 %v835_v14, %v747_v37  ;;  %v1028_v48 = vmul.f32 2.1237322e-06, %v2153_v42  ;;  %v1039_v50 = vmul.f32 3.8918573e-05, %v2153_v42 }
  0xd2   : > { %v909_v46 = vadd.f32 0.00028619796, %v908_v40  ;;  %v920_v47 = vadd.f32 0.001143296, %v919_v41  ;;  %v884_v49 = vadd.f32 0.112945676, %v883_v44 }
  0xd3   : > { %v1029_v54 = vadd.f32 0.00028619796, %v1028_v48  ;;  %v873_v56 = vadd.f32 0.05243302, %v872_v43  ;;  %v1040_v58 = vadd.f32 0.001143296, %v1039_v50 }
  0xd4   : > { %v910_v52 = vmul.f32 %v909_v46, %v907_v35  ;;  %v921_v53 = vmul.f32 %v920_v47, %v907_v35  ;;  %v885_v57 = vmul.f32 %v884_v49, %v2133_v20  ;;  %v2163_v59 = vmul.f32 0.70710677, %v2157_v45 }
  0xd5   : > { %v1030_v62 = vmul.f32 %v1029_v54, %v2153_v42  ;;  %v1041_v0 = vmul.f32 %v1040_v58, %v2153_v42  ;;  %v874_v5 = vmul.f32 %v873_v56, %v2133_v20  ;;  %v2194_v54 = vmul.f32 0.5, %v2135_v22 }
  0xd6   : > { %v911_v60 = vadd.f32 0.0036580483, %v910_v52  ;;  %v922_v61 = vadd.f32 0.014752088, %v921_v53  ;;  %v886_v63 = vadd.f32 0.4994258, %v885_v57  ;;  %v1066_v1 = vmul.f32 %v2163_v59, %v2163_v59 }
  0xd7   : > { %v1031_v4 = vadd.f32 0.0036580483, %v1030_v62  ;;  %v1042_v7 = vadd.f32 0.014752088, %v1041_v0  ;;  %v875_v21 = vadd.f32 0.18741608, %v874_v5 }
  0xd8   : > { %v912_v2 = vmul.f32 %v911_v60, %v907_v35  ;;  %v923_v3 = vmul.f32 %v922_v61, %v907_v35  ;;  %v887_v6 = vmul.f32 %v886_v63, %v2133_v20  ;;  %v2171_v9 = vmin.f32 %v1066_v1, 16.0 }
  0xd9   : > { %v1032_v12 = vmul.f32 %v1031_v4, %v2153_v42  ;;  %v1043_v14 = vmul.f32 %v1042_v7, %v2153_v42  ;;  %v876_v36 = vmul.f32 %v875_v21, %v2133_v20  ;;  %v2190_v20 = vmul.f32 0.5, %v2125_v13 }
  0xda   : > { %v913_v10 = vadd.f32 0.05243302, %v912_v2  ;;  %v924_v11 = vadd.f32 0.112945676, %v923_v3  ;;  %v888_v55 = vadd.f32 1.0, %v887_v6  ;;  %v837_v6 = vperm.slane %v2122_v8, 3 }
  0xdb   : > { %v1068_v15 = vmul.f32 2.1237322e-06, %v2171_v9  ;;  %v1079_v23 = vmul.f32 3.8918573e-05, %v2171_v9  ;;  %v1033_v28 = vadd.f32 0.05243302, %v1032_v12 }
  0xdc   : > { %v914_v16 = vmul.f32 %v913_v10, %v907_v35  ;;  %v925_v17 = vmul.f32 %v924_v11, %v907_v35  ;;  %v758_v18 = vpop.f32.mrf.mxu0  ;;  %1770 = vrcp.f32 %v888_v55  ;;  %v1044_v29 = vadd.f32 0.112945676, %v1043_v14 }
  0xdd   : > { %v772_v19 = vpop.f32.mrf.mxu1  ;;  %v1069_v31 = vadd.f32 0.00028619796, %v1068_v15  ;;  %v1080_v39 = vadd.f32 0.001143296, %v1079_v23  ;;  %v1034_v43 = vmul.f32 %v1033_v28, %v2153_v42  ;;  %v898_v52 = vand.u32 2147483647, %v888_v55 }
  0xde   : > { %v915_v24 = vadd.f32 0.18741608, %v914_v16  ;;  %v926_v27 = vadd.f32 0.4994258, %v925_v17  ;;  %v773_v32 = vadd.f32 %v772_v19, %v758_v18  ;;  %v1045_v37 = vmul.f32 %v1044_v29, %v2153_v42 }
  0xdf   : > { %v1070_v38 = vmul.f32 %v1069_v31, %v2171_v9  ;;  %v1081_v48 = vmul.f32 %v1080_v39, %v2171_v9  ;;  %v900_v53 = vand.u32 2147483648, %v888_v55  ;;  %v1035_v62 = vadd.f32 0.18741608, %v1034_v43 }
  0xe0   : > { %v927_v34 = vmul.f32 %v926_v27, %v907_v35  ;;  %v916_v40 = vmul.f32 %v915_v24, %v907_v35  ;;  %v1046_v46 = vadd.f32 0.4994258, %v1045_v37  ;;  %v2187_v49 = vadd.f32 %v836_v33, %v773_v32 }
  0xe1   : > { %v1071_v47 = vadd.f32 0.0036580483, %v1070_v38  ;;  %v877_v35 = vadd.f32 1.1283791, %v876_v36  ;;  %v1082_v60 = vadd.f32 0.014752088, %v1081_v48  ;;  %vm894_vm1 = vweird.f32 %v888_v55 }
  0xe2   : > { %v2181_v41 = vadd.f32 1.0, %v927_v34  ;;  %v1771_v44 = vpop.eup %1770  ;;  %v1047_v57 = vmul.f32 %v1046_v46, %v2153_v42  ;;  %v917_v61 = vadd.f32 1.1283791, %v916_v40  ;;  %v2199_v13 = vmul.f32 0.70710677, %v2187_v49 }
  0xe3   : > { %v890_v50 = vmul.f32 %v1771_v44, %v888_v55  ;;  %v1072_v58 = vmul.f32 %v1071_v47, %v2171_v9  ;;  %vm895_vm0 = vweird.f32 %v1771_v44  ;;  %v1083_v2 = vmul.f32 %v1082_v60, %v2171_v9 }
  0xe4   : > { %1772 = vrcp.f32 %v2181_v41  ;;  %v2201_v0 = vadd.f32 1.0, %v1047_v57  ;;  %v878_v22 = vmul.f32 %v877_v35, %v2128_v51  ;;  %v946_v3 = vmul.f32 %v2199_v13, %v2199_v13  ;;  %v786_v4 = vpop.f32.mrf.mxu2  ;;  %vm896_vm3 = vmor %vm894_vm1, %vm895_vm0  ;;  %v760_v27 = vpop.f32.mrf.mxu0 }
  0xe5   : > { %v891_v56 = vsub.f32 1.0, %v890_v50  ;;  %v1073_v1 = vadd.f32 0.05243302, %v1072_v58  ;;  %v800_v5 = vpop.f32.mrf.mxu3  ;;  %vm899_vm2 = vcmp.eq.f32.partialorder %v898_v52, 8.507059e+37  ;;  %v901_v11 = vor.u32 1.1754944e-38, %v900_v53  ;;  %v774_v28 = vpop.f32.mrf.mxu1 }
  0xe6   : > { %1774 = vrcp.f32 %v2201_v0  ;;  %v918_v12 = vmul.f32 %v917_v61, %v2142_v26  ;;  %v938_v55 = vand.u32 2147483647, %v2181_v41  ;;  %v1036_v14 = vmul.f32 %v1035_v62, %v2153_v42 }
  0xe7   : > { %v892_v63 = vmul.f32 %v1771_v44, %v891_v56  ;;  %v1074_v16 = vmul.f32 %v1073_v1, %v2171_v9  ;;  %v1084_v17 = vadd.f32 0.112945676, %v1083_v2  ;;  %v2215_v18 = vmin.f32 %v946_v3, 16.0 }
  0xe8   : > { %v940_v23 = vand.u32 2147483648, %v2181_v41  ;;  %v801_v24 = vadd.f32 %v800_v5, %v786_v4  ;;  %vm934_vm4 = vweird.f32 %v2181_v41  ;;  %v1037_v32 = vadd.f32 1.1283791, %v1036_v14 }
  0xe9   : > { %v893_v10 = vadd.f32 %v1771_v44, %v892_v63  ;;  %v1085_v29 = vmul.f32 %v1084_v17, %v2171_v9  ;;  %v959_v42 = vmul.f32 3.8918573e-05, %v2215_v18  ;;  %v948_v34 = vmul.f32 2.1237322e-06, %v2215_v18 }
  0xea   : > { %v1773_v7 = vpop.eup %1772  ;;  %vm2222_vm6 = vcmp.eq.f32.partialorder %v938_v55, 8.507059e+37  ;;  %v1075_v38 = vadd.f32 0.18741608, %v1074_v16  ;;  %v775_v40 = vadd.f32 %v774_v28, %v760_v27  ;;  %v2229_v47 = vadd.f32 %v837_v6, %v801_v24 }
  0xeb   : > { %v930_v51 = vmul.f32 %v1773_v7, %v2181_v41  ;;  %v897_v15 = vsel %vm896_vm3, %v1771_v44, %v893_v10  ;;  %vm935_vm5 = vweird.f32 %v1773_v7  ;;  %v1086_v39 = vadd.f32 0.4994258, %v1085_v29 }
  0xec   : > { %v902_v19 = vsel %vm899_vm2, %v901_v11, %v897_v15  ;;  %v1775_v36 = vpop.eup %1774  ;;  %v941_v44 = vor.u32 1.1754944e-38, %v940_v23  ;;  %vm936_vm7 = vmor %vm934_vm4, %vm935_vm5  ;;  %v1058_v50 = vand.u32 2147483647, %v2201_v0  ;;  %v960_v52 = vadd.f32 0.001143296, %v959_v42  ;;  %v788_v60 = vpop.f32.mrf.mxu2 }
  0xed   : > { %v931_v21 = vsub.f32 1.0, %v930_v51  ;;  %v903_v26 = vmul.f32 %v902_v19, %v878_v22  ;;  %v1050_v46 = vmul.f32 %v1775_v36, %v2201_v0  ;;  %v1087_v35 = vmul.f32 %v1086_v39, %v2171_v9  ;;  %v802_v61 = vpop.f32.mrf.mxu3 }
  0xee   : > { %v1060_v57 = vand.u32 2147483648, %v2201_v0  ;;  %v949_v58 = vadd.f32 0.00028619796, %v948_v34  ;;  %v1076_v63 = vmul.f32 %v1075_v38, %v2171_v9  ;;  %v2243_v41 = vadd.f32 %v836_v33, %v775_v40 }
  0xef   : > { %v932_v31 = vmul.f32 %v1773_v7, %v931_v21  ;;  %v1631_v48 = vclamps-f32 %v903_v26, 1.0  ;;  %v1051_v56 = vsub.f32 1.0, %v1050_v46  ;;  %v2239_v1 = vadd.f32 1.0, %v1087_v35 }
  0xf0   : > { %v961_v3 = vmul.f32 %v960_v52, %v2215_v18  ;;  %v2247_v4 = vmul.f32 0.70710677, %v2229_v47  ;;  %vm1055_vm8 = vweird.f32 %v1775_v36  ;;  %v950_v11 = vmul.f32 %v949_v58, %v2215_v18 }
  0xf1   : > { %v933_v43 = vadd.f32 %v1773_v7, %v932_v31  ;;  %v1052_v22 = vmul.f32 %v1775_v36, %v1051_v56  ;;  %v1186_v5 = vadd.f32 1.0, %v1631_v48  ;;  %1776 = vrcp.f32 %v2239_v1 }
  0xf2   : > { %v962_v51 = vadd.f32 0.014752088, %v961_v3  ;;  %v1038_v33 = vmul.f32 %v1037_v32, %v2147_v30  ;;  %vm1054_vm9 = vweird.f32 %v2201_v0  ;;  %v986_v55 = vmul.f32 %v2247_v4, %v2247_v4 }
  0xf3   : > { %v937_v53 = vsel %vm936_vm7, %v1773_v7, %v933_v43  ;;  %v803_v7 = vadd.f32 %v802_v61, %v788_v60  ;;  %v1053_v10 = vadd.f32 %v1775_v36, %v1052_v22  ;;  %vm2256_vm10 = vmor %vm1054_vm9, %vm1055_vm8  ;;  %vm2260_vm11 = vcmp.eq.f32.partialorder %v1058_v50, 8.507059e+37 }
  0xf4   : > { %v942_v62 = vsel %vm2222_vm6, %v941_v44, %v937_v53  ;;  %v1061_v17 = vor.u32 1.1754944e-38, %v1060_v57  ;;  %v963_v19 = vmul.f32 %v962_v51, %v2215_v18  ;;  %v1194_v30 = vmul.f32 %v1186_v5, %v2190_v20 }
  0xf5   : > { %v943_v2 = vmul.f32 %v942_v62, %v918_v12  ;;  %v1077_v12 = vadd.f32 1.1283791, %v1076_v63  ;;  %v1057_v0 = vsel %vm2256_vm10, %v1775_v36, %v1053_v10  ;;  %v2268_v21 = vmin.f32 %v986_v55, 16.0 }
  0xf6   : > { %v2271_v23 = vmul.f32 0.70710677, %v2243_v41  ;;  %v951_v27 = vadd.f32 0.0036580483, %v950_v11  ;;  %v964_v28 = vadd.f32 0.112945676, %v963_v19  ;;  %v2276_v26 = vadd.f32 %v837_v6, %v803_v7 }
  0xf7   : > { %v1632_v9 = vclamps-f32 %v943_v2, 1.0  ;;  %v1777_v29 = vpop.eup %1776  ;;  %v1078_v42 = vmul.f32 %v1077_v12, %v2163_v59  ;;  %v988_v20 = vmul.f32 2.1237322e-06, %v2268_v21  ;;  %v999_v31 = vmul.f32 3.8918573e-05, %v2268_v21 }
  0xf8   : > { %v1106_v32 = vmul.f32 %v2271_v23, %v2271_v23  ;;  %v1090_v36 = vmul.f32 %v1777_v29, %v2239_v1  ;;  %v1098_v8 = vand.u32 2147483647, %v2239_v1  ;;  %v1100_v6 = vand.u32 2147483648, %v2239_v1 }
  0xf9   : > { %v1187_v14 = vadd.f32 1.0, %v1632_v9  ;;  %v965_v37 = vmul.f32 %v964_v28, %v2215_v18  ;;  %v989_v59 = vadd.f32 0.00028619796, %v988_v20  ;;  %v1000_v38 = vadd.f32 0.001143296, %v999_v31 }
  0xfa   : > { %v1091_v39 = vsub.f32 1.0, %v1090_v36  ;;  %v952_v40 = vmul.f32 %v951_v27, %v2215_v18  ;;  %v2293_v43 = vmin.f32 %v1106_v32, 16.0  ;;  %v2296_v44 = vmul.f32 0.70710677, %v2276_v26 }
  0xfb   : > { %v1195_v24 = vmul.f32 %v1187_v14, %v2194_v54  ;;  %v1062_v54 = vsel %vm2260_vm11, %v1061_v17, %v1057_v0  ;;  %v966_v48 = vadd.f32 0.4994258, %v965_v37  ;;  %v990_v50 = vmul.f32 %v989_v59, %v2268_v21 }
  0xfc   : > { %v1063_v46 = vmul.f32 %v1062_v54, %v1038_v33  ;;  %v1001_v35 = vmul.f32 %v1000_v38, %v2268_v21  ;;  %v1092_v52 = vmul.f32 %v1777_v29, %v1091_v39  ;;  %vm1095_vm12 = vweird.f32 %v1777_v29 }
  0xfd   : > { %v1202_v34 = vpack.c.bf16 %v1195_v24, %v1194_v30  ;;  %v1108_v53 = vmul.f32 2.1237322e-06, %v2293_v43  ;;  %v1119_v56 = vmul.f32 3.8918573e-05, %v2293_v43  ;;  %vm1094_vm13 = vweird.f32 %v2239_v1 }
  0xfe   : > { %v967_v57 = vmul.f32 %v966_v48, %v2215_v18  ;;  %v991_v58 = vadd.f32 0.0036580483, %v990_v50  ;;  %v1002_v60 = vadd.f32 0.014752088, %v1001_v35  ;;  %v1093_v61 = vadd.f32 %v1777_v29, %v1092_v52  ;;  %vm1096_vm15 = vmor %vm1094_vm13, %vm1095_vm12 }
  0xff   : > { %1206 = vst [vmem:[%s2289_s10] sm:$0xff] %v1202_v34  ;;  %vm1099_vm14 = vcmp.eq.f32.partialorder %v1098_v8, 8.507059e+37  ;;  %v1120_v62 = vadd.f32 0.001143296, %v1119_v56  ;;  %v1146_v63 = vmul.f32 %v2296_v44, %v2296_v44  ;;  %v1101_v2 = vor.u32 1.1754944e-38, %v1100_v6 }
 0x100   : > { %v953_v22 = vadd.f32 0.05243302, %v952_v40  ;;  %v2306_v3 = vadd.f32 1.0, %v967_v57  ;;  %v1003_v5 = vmul.f32 %v1002_v60, %v2268_v21  ;;  %v1635_v7 = vclamps-f32 %v1063_v46, 1.0 }
 0x101   : > { %v1097_v9 = vsel %vm1096_vm15, %v1777_v29, %v1093_v61  ;;  %v1109_v1 = vadd.f32 0.00028619796, %v1108_v53  ;;  %v1121_v10 = vmul.f32 %v1120_v62, %v2293_v43  ;;  %v992_v51 = vmul.f32 %v991_v58, %v2268_v21 }
 0x102   : > { %v1102_v11 = vsel %vm1099_vm14, %v1101_v2, %v1097_v9  ;;  %1778 = vrcp.f32 %v2306_v3  ;;  %v2312_v33 = vmin.f32 %v1146_v63, 16.0  ;;  %v1004_v55 = vadd.f32 0.112945676, %v1003_v5 }
 0x103   : > { %v1103_v12 = vmul.f32 %v1102_v11, %v1078_v42  ;;  %v854_v14 = vmul.f32 0.5, %v2139_v25  ;;  %v1122_v15 = vadd.f32 0.014752088, %v1121_v10  ;;  %v1190_v16 = vadd.f32 1.0, %v1635_v7 }
 0x104   : > { %v954_v19 = vmul.f32 %v953_v22, %v2215_v18  ;;  %v1005_v30 = vmul.f32 %v1004_v55, %v2268_v21  ;;  %v993_v0 = vadd.f32 0.05243302, %v992_v51  ;;  %v1110_v24 = vmul.f32 %v1109_v1, %v2293_v43 }
 0x105   : > { %v1636_v17 = vclamps-f32 %v1103_v12, 1.0  ;;  %v1123_v27 = vmul.f32 %v1122_v15, %v2293_v43  ;;  %v1148_v28 = vmul.f32 2.1237322e-06, %v2312_v33  ;;  %v855_v29 = vmul.f32 0.5, %v2157_v45 }
 0x106   : > { %v1006_v20 = vadd.f32 0.4994258, %v1005_v30  ;;  %v1159_v25 = vmul.f32 3.8918573e-05, %v2312_v33  ;;  %v1198_v54 = vmul.f32 %v1190_v16, %v854_v14  ;;  %v955_v6 = vadd.f32 0.18741608, %v954_v19 }
 0x107   : > { %v1191_v42 = vadd.f32 1.0, %v1636_v17  ;;  %v1124_v32 = vadd.f32 0.112945676, %v1123_v27  ;;  %v1149_v34 = vadd.f32 0.00028619796, %v1148_v28  ;;  %v994_v40 = vmul.f32 %v993_v0, %v2268_v21 }
 0x108   : > { %v1779_v31 = vpop.eup %1778  ;;  %v1007_v37 = vmul.f32 %v1006_v20, %v2268_v21  ;;  %v1111_v59 = vadd.f32 0.0036580483, %v1110_v24  ;;  %v1160_v46 = vadd.f32 0.001143296, %v1159_v25  ;;  %v956_v56 = vmul.f32 %v955_v6, %v2215_v18 }
 0x109   : > { %v1199_v36 = vmul.f32 %v1191_v42, %v855_v29  ;;  %v970_v8 = vmul.f32 %v1779_v31, %v2306_v3  ;;  %v1125_v38 = vmul.f32 %v1124_v32, %v2293_v43  ;;  %v1150_v35 = vmul.f32 %v1149_v34, %v2312_v33 }
 0x10a   : > { %v1008_v48 = vadd.f32 1.0, %v1007_v37  ;;  %v1161_v53 = vmul.f32 %v1160_v46, %v2312_v33  ;;  %v1112_v57 = vmul.f32 %v1111_v59, %v2293_v43  ;;  %vm975_vm0 = vweird.f32 %v1779_v31 }
 0x10b   : > { %v1204_v39 = vpack.c.bf16 %v1199_v36, %v1198_v54  ;;  %v971_v45 = vsub.f32 1.0, %v970_v8  ;;  %v1126_v50 = vadd.f32 0.4994258, %v1125_v38  ;;  %v995_v60 = vadd.f32 0.18741608, %v994_v40 }
 0x10c   : > { %1780 = vrcp.f32 %v1008_v48  ;;  %v980_v62 = vand.u32 2147483648, %v2306_v3  ;;  %v1151_v63 = vadd.f32 0.0036580483, %v1150_v35  ;;  %v1162_v2 = vadd.f32 0.014752088, %v1161_v53 }
 0x10d   : > { %1208 = vst [vmem:[%s2289_s10 + $0x10] sm:$0xff] %v1204_v39  ;;  %v972_v52 = vmul.f32 %v1779_v31, %v971_v45  ;;  %v1127_v61 = vmul.f32 %v1126_v50, %v2293_v43  ;;  %vm974_vm1 = vweird.f32 %v2306_v3  ;;  %v978_v22 = vand.u32 2147483647, %v2306_v3 }
 0x10e   : > { %v957_v7 = vadd.f32 1.1283791, %v956_v56  ;;  %vm976_vm2 = vmor %vm974_vm1, %vm975_vm0  ;;  %v1163_v18 = vmul.f32 %v1162_v2, %v2312_v33  ;;  %v996_v1 = vmul.f32 %v995_v60, %v2268_v21  ;;  %v1113_v10 = vadd.f32 0.05243302, %v1112_v57 }
 0x10f   : > { %v973_v58 = vadd.f32 %v1779_v31, %v972_v52  ;;  %v2335_v5 = vadd.f32 1.0, %v1127_v61  ;;  %v981_v51 = vor.u32 1.1754944e-38, %v980_v62  ;;  %v1152_v12 = vmul.f32 %v1151_v63, %v2312_v33 }
 0x110   : > { %v1164_v55 = vadd.f32 0.112945676, %v1163_v18  ;;  %vm979_vm3 = vcmp.eq.f32.partialorder %v978_v22, 8.507059e+37  ;;  %v958_v16 = vmul.f32 %v957_v7, %v2199_v13  ;;  %v997_v17 = vadd.f32 1.1283791, %v996_v1 }
 0x111   : > { %v977_v9 = vsel %vm976_vm2, %v1779_v31, %v973_v58  ;;  %1782 = vrcp.f32 %v2335_v5  ;;  %v1114_v30 = vmul.f32 %v1113_v10, %v2293_v43  ;;  %v1020_v21 = vand.u32 2147483648, %v1008_v48 }
 0x112   : > { %v1781_v11 = vpop.eup %1780  ;;  %v982_v3 = vsel %vm979_vm3, %v981_v51, %v977_v9  ;;  %v1165_v15 = vmul.f32 %v1164_v55, %v2312_v33  ;;  %v1153_v0 = vadd.f32 0.05243302, %v1152_v12  ;;  %v1018_v42 = vand.u32 2147483647, %v1008_v48 }
 0x113   : > { %v1010_v14 = vmul.f32 %v1781_v11, %v1008_v48  ;;  %v983_v28 = vmul.f32 %v982_v3, %v958_v16  ;;  %vm1015_vm4 = vweird.f32 %v1781_v11  ;;  %vm1014_vm5 = vweird.f32 %v1008_v48 }
 0x114   : > { %v1166_v24 = vadd.f32 0.4994258, %v1165_v15  ;;  %v1115_v32 = vadd.f32 0.18741608, %v1114_v30  ;;  %vm1016_vm6 = vmor %vm1014_vm5, %vm1015_vm4  ;;  %v1021_v13 = vor.u32 1.1754944e-38, %v1020_v21  ;;  %v1154_v54 = vmul.f32 %v1153_v0, %v2312_v33 }
 0x115   : > { %v1011_v19 = vsub.f32 1.0, %v1010_v14  ;;  %v1633_v8 = vclamps-f32 %v983_v28, 1.0  ;;  %v998_v6 = vmul.f32 %v997_v17, %v2247_v4  ;;  %vm1019_vm7 = vcmp.eq.f32.partialorder %v1018_v42, 8.507059e+37 }
 0x116   : > { %v1167_v25 = vmul.f32 %v1166_v24, %v2312_v33  ;;  %v1116_v45 = vmul.f32 %v1115_v32, %v2293_v43  ;;  %v1140_v46 = vand.u32 2147483648, %v2335_v5  ;;  %v1155_v48 = vadd.f32 0.18741608, %v1154_v54 }
 0x117   : > { %v1783_v27 = vpop.eup %1782  ;;  %v1012_v29 = vmul.f32 %v1781_v11, %v1011_v19  ;;  %v1188_v50 = vadd.f32 1.0, %v1633_v8  ;;  %vm1134_vm9 = vweird.f32 %v2335_v5  ;;  %v1138_v52 = vand.u32 2147483647, %v2335_v5 }
 0x118   : > { %v1130_v20 = vmul.f32 %v1783_v27, %v2335_v5  ;;  %v1168_v36 = vadd.f32 1.0, %v1167_v25  ;;  %vm1135_vm8 = vweird.f32 %v1783_v27  ;;  %v852_v4 = vmul.f32 0.5, %v2187_v49 }
 0x119   : > { %v1013_v31 = vadd.f32 %v1781_v11, %v1012_v29  ;;  %vm1136_vm10 = vmor %vm1134_vm9, %vm1135_vm8  ;;  %v853_v53 = vmul.f32 0.5, %v2229_v47  ;;  %v1117_v57 = vadd.f32 1.1283791, %v1116_v45  ;;  %v1141_v60 = vor.u32 1.1754944e-38, %v1140_v46 }
 0x11a   : > { %v1131_v34 = vsub.f32 1.0, %v1130_v20  ;;  %1784 = vrcp.f32 %v1168_v36  ;;  %v1156_v61 = vmul.f32 %v1155_v48, %v2312_v33  ;;  %v1196_v62 = vmul.f32 %v1188_v50, %v852_v4 }
 0x11b   : > { %v1017_v37 = vsel %vm1016_vm6, %v1781_v11, %v1013_v31  ;;  %vm1139_vm11 = vcmp.eq.f32.partialorder %v1138_v52, 8.507059e+37  ;;  %v1118_v5 = vmul.f32 %v1117_v57, %v2271_v23  ;;  %v1180_v9 = vand.u32 2147483648, %v1168_v36 }
 0x11c   : > { %v1022_v59 = vsel %vm1019_vm7, %v1021_v13, %v1017_v37  ;;  %v1132_v38 = vmul.f32 %v1783_v27, %v1131_v34  ;;  %v1157_v18 = vadd.f32 1.1283791, %v1156_v61  ;;  %v1178_v10 = vand.u32 2147483647, %v1168_v36 }
 0x11d   : > { %v1023_v39 = vmul.f32 %v1022_v59, %v998_v6  ;;  %vm1174_vm13 = vweird.f32 %v1168_v36  ;;  %v1181_v33 = vor.u32 1.1754944e-38, %v1180_v9  ;;  %v856_v16 = vmul.f32 0.5, %v2243_v41  ;;  %v1239_v41 = vld [vmem:[%s2289_s10 + $0x10] sm:$0xff] (%p1941_p9) }
 0x11e   : > { %v1133_v40 = vadd.f32 %v1783_v27, %v1132_v38  ;;  %v1158_v12 = vmul.f32 %v1157_v18, %v2296_v44  ;;  %vm1179_vm15 = vcmp.eq.f32.partialorder %v1178_v10, 8.507059e+37  ;;  %v857_v17 = vmul.f32 0.5, %v2276_v26  ;;  %v1235_v44 = vld [vmem:[%s2289_s10] sm:$0xff] (%p1941_p9)  ;;  %1240 = vst [vmem:[%s1222_s20 + $0x20] sm:$0xff] (%p1941_p9), %v1239_v41 }
 0x11f   : > { %v1634_v35 = vclamps-f32 %v1023_v39, 1.0  ;;  %1236 = vst [vmem:[%s1222_s20] sm:$0xff] (%p1941_p9), %v1235_v44 }
 0x120   : > { %v1137_v43 = vsel %vm1136_vm10, %v1783_v27, %v1133_v40  ;;  %v1785_v58 = vpop.eup %1784 }
 0x121   : > { %v1189_v56 = vadd.f32 1.0, %v1634_v35  ;;  %v1170_v2 = vmul.f32 %v1785_v58, %v1168_v36  ;;  %v1142_v22 = vsel %vm1139_vm11, %v1141_v60, %v1137_v43  ;;  %vm1175_vm12 = vweird.f32 %v1785_v58 }
 0x122   : > { %v1143_v47 = vmul.f32 %v1142_v22, %v1118_v5  ;;  %vm1176_vm14 = vmor %vm1174_vm13, %vm1175_vm12 }
 0x123   : > { %v1197_v63 = vmul.f32 %v1189_v56, %v853_v53  ;;  %v1171_v49 = vsub.f32 1.0, %v1170_v2 }
 0x124   : > { %v1637_v51 = vclamps-f32 %v1143_v47, 1.0 }
 0x125   : > { %v1203_v7 = vpack.c.bf16 %v1197_v63, %v1196_v62  ;;  %v1172_v1 = vmul.f32 %v1785_v58, %v1171_v49 }
 0x126   : > { %v1192_v3 = vadd.f32 1.0, %v1637_v51 }
 0x127   : > { %1207 = vst [vmem:[%s2289_s10 + $0x8] sm:$0xff] %v1203_v7  ;;  %v1173_v11 = vadd.f32 %v1785_v58, %v1172_v1 }
 0x128   : > { %v1200_v30 = vmul.f32 %v1192_v3, %v856_v16 }
 0x129   : > { %v1177_v55 = vsel %vm1176_vm14, %v1785_v58, %v1173_v11 }
 0x12a   : > { %v1182_v14 = vsel %vm1179_vm15, %v1181_v33, %v1177_v55 }
 0x12b   : > { %v1183_v23 = vmul.f32 %v1182_v14, %v1158_v12 }
 0x12d   : > { %v1638_v15 = vclamps-f32 %v1183_v23, 1.0 }
 0x12e   : > { %v1237_v24 = vld [vmem:[%s2289_s10 + $0x8] sm:$0xff] (%p1941_p9) }
 0x12f   : > { %v1193_v19 = vadd.f32 1.0, %v1638_v15  ;;  %1238 = vst [vmem:[%s1222_s20 + $0x8] sm:$0xff] (%p1941_p9), %v1237_v24 }
 0x131   : > { %v1201_v21 = vmul.f32 %v1193_v19, %v857_v17  ;;  %1216 = sbr.rel (!%p1941_p9) target bundleno = 318 (0x13e), region = 48 }
 0x133   : > { %v1205_v0 = vpack.c.bf16 %v1201_v21, %v1200_v30 }
 0x135   : > { %1209 = vst [vmem:[%s2289_s10 + $0x18] sm:$0xff] %v1205_v0 }
 0x13c   : > { %v1241_v26 = vld [vmem:[%s2289_s10 + $0x18] sm:$0xff] }
 0x13d   : > { %1242 = vst [vmem:[%s1222_s20 + $0x28] sm:$0xff] %v1241_v26 }
 0x13e PF: > { %s16_s17 = sadd.s32 1, %s1866_s17   ;;  %s2402_s12 = smov %s1850_s13 }
 0x13f   : > { %p13_p2 = scmp.ge.s32.totalorder %s16_s17, 4   ;;  %s2403_s13 = smov %s1854_s14 }
 0x140   : > { %s2404_s14 = smov %s1939_s24  ;;  %s2405_s15 = smov %s1862_s16 }
 0x141   : > { %s2406_s16 = smov %s2408_s19  ;;  %15 = sbr.rel (!%p13_p2) target bundleno = 4 (0x4), region = 109 }
 0x146   :  { %1258 = vsyncpa [#allocation4], 1 }
 0x147   :  { %1260 = vsyncpa [#allocation4 + $0x1], 1 }

</bundles_post_ra>
